<compile_context>
chip_gen: v7x
topology: tpu7x:2x2x1
jax: 0.10.0
libtpu: 0.0.40
codegen_flags: <defaults>
</compile_context>

<pallas_src>
import jax
import jax.numpy as jnp
from jax import lax
from jax.experimental import pallas as pl
from jax.experimental.pallas import tpu as pltpu

DILATIONS = (6, 12, 18)   # must be ascending (valid tap rectangles shrink)
EPS = 0.0003              # positional-arg quirk in the PyTorch module (momentum -> eps)


def _stale_rects(prev, cur):
    """Static rectangles (r0, r1, c0, c1).  Return rectangles covering
    prev \\ cur -- the part of the previously-written ("dirty") region of a tap
    slice that the current branch will NOT overwrite with data and therefore
    must zero.  All pure Python; resolved at trace time."""
    pr0, pr1, pc0, pc1 = prev
    if pr0 >= pr1 or pc0 >= pc1:
        return []
    if cur is None:
        return [prev]
    cr0, cr1 = max(cur[0], pr0), min(cur[1], pr1)
    cc0, cc1 = max(cur[2], pc0), min(cur[3], pc1)
    if cr0 >= cr1 or cc0 >= cc1:
        return [prev]
    rects = []
    if cr0 > pr0:
        rects.append((pr0, cr0, pc0, pc1))
    if pr1 > cr1:
        rects.append((cr1, pr1, pc0, pc1))
    if cc0 > pc0:
        rects.append((cr0, cr1, pc0, cc0))
    if pc1 > cc1:
        rects.append((cr0, cr1, cc1, pc1))
    return rects


def _aspp_kernel(x_ref, w1_ref, w2_ref, w3_ref, w4_ref, w5_ref,
                 wc_ref, scale_ref, bias_ref, o_ref, tap_ref):
    _, H, W, Cin = x_ref.shape
    Caspp = w1_ref.shape[1]
    f32 = jnp.float32
    bf16 = jnp.bfloat16

    def bn_relu(y, idx):
        s = scale_ref[idx, :][None, :]
        b = bias_ref[idx, :][None, :]
        return jnp.maximum(y * s + b, 0.0)

    # ---- branch 1: 1x1 conv -> BN -> ReLU -> its slice of the final 1x1 ----
    # Read the (already bf16, contiguous) input block directly.
    x2d = x_ref[0].reshape(H * W, Cin)
    b1 = bn_relu(jnp.dot(x2d, w1_ref[...], preferred_element_type=f32), 0)
    acc = jnp.dot(b1.astype(bf16), wc_ref[0], preferred_element_type=f32)

    # ---- branches 2-4: dilated 3x3 conv as one fused-K matmul per branch ----
    # tap_ref (H, W, 9*Cin) bf16 is the im2col ("tapmat") scratch, rebuilt per
    # branch with statically-predicated boundary taps; no padded image copy.
    dirty = [(0, H, 0, W)] * 9   # scratch is uninitialized: whole slice dirty
    branch_params = ((w2_ref, DILATIONS[0], 1, 1),
                     (w3_ref, DILATIONS[1], 2, 2),
                     (w4_ref, DILATIONS[2], 3, 3))
    for (w_ref, d, bn_idx, wc_idx) in branch_params:
        for kh in range(3):
            for kw in range(3):
                k = kh * 3 + kw
                ksl = slice(k * Cin, (k + 1) * Cin)
                dr, dc = (kh - 1) * d, (kw - 1) * d
                r0, r1 = max(0, -dr), min(H, H - dr)
                c0, c1 = max(0, -dc), min(W, W - dc)
                cur = (r0, r1, c0, c1) if (r0 < r1 and c0 < c1) else None
                # zero only the stale parts of this tap's K-slice
                for (zr0, zr1, zc0, zc1) in _stale_rects(dirty[k], cur):
                    tap_ref[zr0:zr1, zc0:zc1, ksl] = jnp.zeros(
                        (zr1 - zr0, zc1 - zc0, Cin), bf16)
                if cur is not None:
                    tap_ref[r0:r1, c0:c1, ksl] = x_ref[
                        0, r0 + dr:r1 + dr, c0 + dc:c1 + dc, :]
                    dirty[k] = cur
                else:
                    dirty[k] = (0, 0, 0, 0)
        y = jnp.dot(tap_ref[...].reshape(H * W, 9 * Cin), w_ref[...],
                    preferred_element_type=f32)
        b = bn_relu(y, bn_idx)
        acc = acc + jnp.dot(b.astype(bf16), wc_ref[wc_idx],
                            preferred_element_type=f32)

    # ---- branch 5: global avg pool -> 1x1 -> BN -> ReLU.  The bilinear
    # upsample of a 1x1 map (align_corners=True) is a pure broadcast, so its
    # contribution through the final 1x1 conv is a rank-1 row added everywhere.
    pooled = jnp.mean(x2d.astype(f32), axis=0, keepdims=True)          # (1, Cin)
    y5 = jnp.dot(pooled.astype(bf16), w5_ref[...], preferred_element_type=f32)
    b5 = bn_relu(y5, 4)                                                # (1, Caspp)
    acc = acc + jnp.dot(b5.astype(bf16), wc_ref[4], preferred_element_type=f32)

    # ---- final BN + ReLU and lane-dense store ----
    out = bn_relu(acc, 5)
    o_ref[0] = out.reshape(H, W, Caspp).astype(o_ref.dtype)


def aspp_forward_nhwc(x_nhwc, w1, w2t, w3t, w4t, w5, wc, scale, bias):
    """x_nhwc: (N, H, W, Cin) float.  Weights in bf16 kernel layouts.
    Returns (N, H, W, Caspp) f32."""
    N, H, W, Cin = x_nhwc.shape
    Caspp = w1.shape[1]

    # Halve the dominant HBM->VMEM DMA; in a full model the upstream layer
    # would already produce bf16 activations.
    x_bf16 = x_nhwc.astype(jnp.bfloat16)

    def full(arr):
        return pl.BlockSpec(arr.shape, lambda n, _nd=arr.ndim: (0,) * _nd)

    grid_spec = pltpu.PrefetchScalarGridSpec(
        num_scalar_prefetch=0,
        grid=(N,),
        in_specs=[
            pl.BlockSpec((1, H, W, Cin), lambda n: (n, 0, 0, 0)),
            full(w1), full(w2t), full(w3t), full(w4t), full(w5), full(wc),
            full(scale), full(bias),
        ],
        out_specs=pl.BlockSpec((1, H, W, Caspp), lambda n: (n, 0, 0, 0)),
        scratch_shapes=[pltpu.VMEM((H, W, 9 * Cin), jnp.bfloat16)],
    )

    # VMEM budget from actual block/scratch sizes: assume double buffering on
    # every block, 2x headroom for compiler temporaries, clamp under v7x's
    # 64 MiB physical VMEM.
    weight_bytes = sum(int(a.size) * a.dtype.itemsize
                       for a in (w1, w2t, w3t, w4t, w5, wc, scale, bias))
    block_bytes = H * W * Cin * 2 + H * W * Caspp * 4      # in (bf16) + out (f32)
    scratch_bytes = H * W * 9 * Cin * 2
    vmem_limit = int(min(48 * 1024 * 1024,
                         max(8 * 1024 * 1024,
                             2 * (2 * (weight_bytes + block_bytes)
                                  + scratch_bytes))))

    flops = 2 * N * H * W * Caspp * (28 * Cin + 5 * Caspp)
    bytes_accessed = (x_bf16.size * 2 + weight_bytes + N * H * W * Caspp * 4)

    return pl.pallas_call(
        _aspp_kernel,
        out_shape=jax.ShapeDtypeStruct((N, H, W, Caspp), jnp.float32),
        grid_spec=grid_spec,
        compiler_params=pltpu.CompilerParams(
            dimension_semantics=("parallel",),
            vmem_limit_bytes=vmem_limit),
        cost_estimate=pl.CostEstimate(flops=flops, transcendentals=0,
                                      bytes_accessed=bytes_accessed),
    )(x_bf16, w1, w2t, w3t, w4t, w5, wc, scale, bias)


def ref_forward_nhwc(x, w1h, w2h, w3h, w4h, w5h, wch, scale, bias):
    """Pure-JAX reference (lax convs, HWIO weights).  Matmul operands are cast
    to bf16 with f32 accumulation to match the kernel's MXU precision."""
    dn = ('NHWC', 'HWIO', 'NHWC')
    bf16 = jnp.bfloat16

    def conv(inp, w, d=1, pad=0):
        return lax.conv_general_dilated(
            inp.astype(bf16), w.astype(bf16), window_strides=(1, 1),
            padding=[(pad, pad), (pad, pad)], rhs_dilation=(d, d),
            dimension_numbers=dn, preferred_element_type=jnp.float32)

    def bnrelu(y, i):
        return jnp.maximum(y * scale[i] + bias[i], 0.0)

    b1 = bnrelu(conv(x, w1h), 0)
    b2 = bnrelu(conv(x, w2h, 6, 6), 1)
    b3 = bnrelu(conv(x, w3h, 12, 12), 2)
    b4 = bnrelu(conv(x, w4h, 18, 18), 3)
    pooled = jnp.mean(x.astype(bf16).astype(jnp.float32), axis=(1, 2), keepdims=True)
    b5 = bnrelu(conv(pooled, w5h), 4)
    b5 = jnp.broadcast_to(b5, b1.shape)
    cat = jnp.concatenate([b1, b2, b3, b4, b5], axis=-1)
    return bnrelu(conv(cat, wch), 5)


if __name__ == "__main__":
    key = jax.random.PRNGKey(0)
    # Small demo shapes (Caspp=128 keeps the output / intermediates lane-dense).
    N, C_IN, C_ASPP, H, W = 2, 16, 128, 16, 16

    keys = jax.random.split(key, 16)
    x_nchw = jax.random.normal(keys[0], (N, C_IN, H, W), dtype=jnp.float32)
    x_nhwc = jnp.transpose(x_nchw, (0, 2, 3, 1))

    # conv weights (HWIO), scaled small
    w1h = 0.1 * jax.random.normal(keys[1], (1, 1, C_IN, C_ASPP), jnp.float32)
    w2h = 0.1 * jax.random.normal(keys[2], (3, 3, C_IN, C_ASPP), jnp.float32)
    w3h = 0.1 * jax.random.normal(keys[3], (3, 3, C_IN, C_ASPP), jnp.float32)
    w4h = 0.1 * jax.random.normal(keys[4], (3, 3, C_IN, C_ASPP), jnp.float32)
    w5h = 0.1 * jax.random.normal(keys[5], (1, 1, C_IN, C_ASPP), jnp.float32)
    wch = 0.1 * jax.random.normal(keys[6], (1, 1, 5 * C_ASPP, C_ASPP), jnp.float32)

    # BatchNorm params (inference form)
    gamma = 1.0 + 0.1 * jax.random.normal(keys[7], (6, C_ASPP), jnp.float32)
    beta = 0.1 * jax.random.normal(keys[8], (6, C_ASPP), jnp.float32)
    rmean = 0.05 * jax.random.normal(keys[9], (6, C_ASPP), jnp.float32)
    rvar = 1.0 + 0.1 * jax.random.uniform(keys[10], (6, C_ASPP), jnp.float32)
    scale = gamma / jnp.sqrt(rvar + EPS)
    bias = beta - rmean * scale

    # kernel-side weight layouts (bf16 halves weight DMA / VMEM footprint)
    bf16 = jnp.bfloat16
    w1 = w1h.reshape(C_IN, C_ASPP).astype(bf16)
    w5 = w5h.reshape(C_IN, C_ASPP).astype(bf16)
    wc = wch.reshape(5, C_ASPP, C_ASPP).astype(bf16)      # per-branch slabs
    w2t = w2h.reshape(9 * C_IN, C_ASPP).astype(bf16)      # fused-K tap layout
    w3t = w3h.reshape(9 * C_IN, C_ASPP).astype(bf16)
    w4t = w4h.reshape(9 * C_IN, C_ASPP).astype(bf16)

    out_nhwc = jax.block_until_ready(
        aspp_forward_nhwc(x_nhwc, w1, w2t, w3t, w4t, w5, wc, scale, bias))
    out_nchw = jnp.transpose(out_nhwc, (0, 3, 1, 2))      # back to PyTorch layout

    ref_nhwc = jax.block_until_ready(
        ref_forward_nhwc(x_nhwc, w1h, w2h, w3h, w4h, w5h, wch, scale, bias))

    assert out_nchw.shape == (N, C_ASPP, H, W)
    max_err = float(jnp.max(jnp.abs(out_nhwc - ref_nhwc)))
    assert jnp.allclose(out_nhwc, ref_nhwc, rtol=1e-2, atol=1e-2), max_err

    print("KERNEL_OK")
</pallas_src>

<mosaic_0001>
module attributes {stable_mosaic.version = 11 : i64} {
  func.func @_aspp_kernel(%arg0: i32, %arg1: memref<1x16x16x16xbf16, #tpu.memory_space<vmem>>, %arg2: memref<16x128xbf16, #tpu.memory_space<vmem>>, %arg3: memref<144x128xbf16, #tpu.memory_space<vmem>>, %arg4: memref<144x128xbf16, #tpu.memory_space<vmem>>, %arg5: memref<144x128xbf16, #tpu.memory_space<vmem>>, %arg6: memref<16x128xbf16, #tpu.memory_space<vmem>>, %arg7: memref<5x128x128xbf16, #tpu.memory_space<vmem>>, %arg8: memref<6x128xf32, #tpu.memory_space<vmem>>, %arg9: memref<6x128xf32, #tpu.memory_space<vmem>>, %arg10: memref<1x16x16x128xf32, #tpu.memory_space<vmem>>, %arg11: memref<16x16x144xbf16, #tpu.memory_space<vmem>>) attributes {dimension_semantics = [#tpu.dimension_semantics<parallel>], iteration_bounds = array<i64: 2>, scalar_prefetch = 0 : i64, scratch_operands = 1 : i64, tpu.core_type = #tpu.core_type<tc>, window_params = [{transform_indices = @transform_0, window_bounds = array<i64: 1, 16, 16, 16>}, {pipeline_mode = #tpu.pipeline_mode<synchronous>, transform_indices = @transform_1, window_bounds = array<i64: 16, 128>}, {pipeline_mode = #tpu.pipeline_mode<synchronous>, transform_indices = @transform_2, window_bounds = array<i64: 144, 128>}, {pipeline_mode = #tpu.pipeline_mode<synchronous>, transform_indices = @transform_3, window_bounds = array<i64: 144, 128>}, {pipeline_mode = #tpu.pipeline_mode<synchronous>, transform_indices = @transform_4, window_bounds = array<i64: 144, 128>}, {pipeline_mode = #tpu.pipeline_mode<synchronous>, transform_indices = @transform_5, window_bounds = array<i64: 16, 128>}, {pipeline_mode = #tpu.pipeline_mode<synchronous>, transform_indices = @transform_6, window_bounds = array<i64: 5, 128, 128>}, {pipeline_mode = #tpu.pipeline_mode<synchronous>, transform_indices = @transform_7, window_bounds = array<i64: 6, 128>}, {pipeline_mode = #tpu.pipeline_mode<synchronous>, transform_indices = @transform_8, window_bounds = array<i64: 6, 128>}, {transform_indices = @transform_9, window_bounds = array<i64: 1, 16, 16, 128>}]} {
    %c0 = arith.constant 0 : index
    %c0_0 = arith.constant 0 : index
    %c0_1 = arith.constant 0 : index
    %c0_2 = arith.constant 0 : index
    %0 = vector.load %arg1[%c0, %c0_0, %c0_1, %c0_2] : memref<1x16x16x16xbf16, #tpu.memory_space<vmem>>, vector<1x16x16x16xbf16>
    %1 = vector.shape_cast %0 : vector<1x16x16x16xbf16> to vector<16x16x16xbf16>
    %2 = vector.shape_cast %1 : vector<16x16x16xbf16> to vector<256x16xbf16>
    %c0_3 = arith.constant 0 : index
    %c0_4 = arith.constant 0 : index
    %3 = vector.load %arg2[%c0_3, %c0_4] : memref<16x128xbf16, #tpu.memory_space<vmem>>, vector<16x128xbf16>
    %cst = arith.constant dense<0.000000e+00> : vector<256x128xf32>
    %4 = tpu.matmul %2, %3, %cst {dimension_numbers = #tpu.dot_dimension_numbers<[1], [0], [0], [1], [0, 0, 1, 1], [], []>} : vector<256x16xbf16>, vector<16x128xbf16>, vector<256x128xf32> -> vector<256x128xf32>
    %c0_5 = arith.constant 0 : index
    %c0_6 = arith.constant 0 : index
    %5 = vector.load %arg8[%c0_5, %c0_6] : memref<6x128xf32, #tpu.memory_space<vmem>>, vector<1x128xf32>
    %6 = vector.shape_cast %5 : vector<1x128xf32> to vector<128xf32>
    %7 = vector.shape_cast %6 : vector<128xf32> to vector<1x128xf32>
    %c0_7 = arith.constant 0 : index
    %c0_8 = arith.constant 0 : index
    %8 = vector.load %arg9[%c0_7, %c0_8] : memref<6x128xf32, #tpu.memory_space<vmem>>, vector<1x128xf32>
    %9 = vector.shape_cast %8 : vector<1x128xf32> to vector<128xf32>
    %10 = vector.shape_cast %9 : vector<128xf32> to vector<1x128xf32>
    %11 = vector.broadcast %7 : vector<1x128xf32> to vector<256x128xf32>
    %12 = arith.mulf %4, %11 : vector<256x128xf32>
    %13 = vector.broadcast %10 : vector<1x128xf32> to vector<256x128xf32>
    %14 = arith.addf %12, %13 : vector<256x128xf32>
    %cst_9 = arith.constant 0.000000e+00 : f32
    %15 = vector.broadcast %cst_9 : f32 to vector<256x128xf32>
    %16 = arith.maximumf %14, %15 : vector<256x128xf32>
    %17 = arith.truncf %16 : vector<256x128xf32> to vector<256x128xbf16>
    %c0_10 = arith.constant 0 : index
    %c0_11 = arith.constant 0 : index
    %c0_12 = arith.constant 0 : index
    %18 = vector.load %arg7[%c0_10, %c0_11, %c0_12] : memref<5x128x128xbf16, #tpu.memory_space<vmem>>, vector<1x128x128xbf16>
    %19 = vector.shape_cast %18 : vector<1x128x128xbf16> to vector<128x128xbf16>
    %cst_13 = arith.constant dense<0.000000e+00> : vector<256x128xf32>
    %20 = tpu.matmul %17, %19, %cst_13 {dimension_numbers = #tpu.dot_dimension_numbers<[1], [0], [0], [1], [0, 0, 1, 1], [], []>} : vector<256x128xbf16>, vector<128x128xbf16>, vector<256x128xf32> -> vector<256x128xf32>
    %cst_14 = arith.constant 0.000000e+00 : bf16
    %21 = vector.broadcast %cst_14 : bf16 to vector<6x16x16xbf16>
    %c0_15 = arith.constant 0 : index
    %c0_16 = arith.constant 0 : index
    %c0_17 = arith.constant 0 : index
    %22 = vector.load %arg11[%c0_15, %c0_16, %c0_17] : memref<16x16x144xbf16, #tpu.memory_space<vmem>>, vector<6x16x16xbf16>
    tpu.vector_store %arg11[%c0_15, %c0_16, %c0_17], %21 {strides = array<i32>} : memref<16x16x144xbf16, #tpu.memory_space<vmem>>, vector<6x16x16xbf16>,
    %cst_18 = arith.constant 0.000000e+00 : bf16
    %23 = vector.broadcast %cst_18 : bf16 to vector<10x6x16xbf16>
    %c6 = arith.constant 6 : index
    %c0_19 = arith.constant 0 : index
    %c0_20 = arith.constant 0 : index
    %24 = vector.load %arg11[%c6, %c0_19, %c0_20] : memref<16x16x144xbf16, #tpu.memory_space<vmem>>, vector<10x6x16xbf16>
    tpu.vector_store %arg11[%c6, %c0_19, %c0_20], %23 {strides = array<i32>} : memref<16x16x144xbf16, #tpu.memory_space<vmem>>, vector<10x6x16xbf16>,
    %c0_21 = arith.constant 0 : index
    %c0_22 = arith.constant 0 : index
    %c0_23 = arith.constant 0 : index
    %c0_24 = arith.constant 0 : index
    %25 = vector.load %arg1[%c0_21, %c0_22, %c0_23, %c0_24] : memref<1x16x16x16xbf16, #tpu.memory_space<vmem>>, vector<1x10x10x16xbf16>
    %26 = vector.shape_cast %25 : vector<1x10x10x16xbf16> to vector<10x10x16xbf16>
    %c6_25 = arith.constant 6 : index
    %c6_26 = arith.constant 6 : index
    %c0_27 = arith.constant 0 : index
    %27 = vector.load %arg11[%c6_25, %c6_26, %c0_27] : memref<16x16x144xbf16, #tpu.memory_space<vmem>>, vector<10x10x16xbf16>
    tpu.vector_store %arg11[%c6_25, %c6_26, %c0_27], %26 {strides = array<i32>} : memref<16x16x144xbf16, #tpu.memory_space<vmem>>, vector<10x10x16xbf16>,
    %cst_28 = arith.constant 0.000000e+00 : bf16
    %28 = vector.broadcast %cst_28 : bf16 to vector<6x16x16xbf16>
    %c0_29 = arith.constant 0 : index
    %c0_30 = arith.constant 0 : index
    %c16 = arith.constant 16 : index
    %29 = vector.load %arg11[%c0_29, %c0_30, %c16] : memref<16x16x144xbf16, #tpu.memory_space<vmem>>, vector<6x16x16xbf16>
    tpu.vector_store %arg11[%c0_29, %c0_30, %c16], %28 {strides = array<i32>} : memref<16x16x144xbf16, #tpu.memory_space<vmem>>, vector<6x16x16xbf16>,
    %c0_31 = arith.constant 0 : index
    %c0_32 = arith.constant 0 : index
    %c0_33 = arith.constant 0 : index
    %c0_34 = arith.constant 0 : index
    %30 = vector.load %arg1[%c0_31, %c0_32, %c0_33, %c0_34] : memref<1x16x16x16xbf16, #tpu.memory_space<vmem>>, vector<1x10x16x16xbf16>
    %31 = vector.shape_cast %30 : vector<1x10x16x16xbf16> to vector<10x16x16xbf16>
    %c6_35 = arith.constant 6 : index
    %c0_36 = arith.constant 0 : index
    %c16_37 = arith.constant 16 : index
    %32 = vector.load %arg11[%c6_35, %c0_36, %c16_37] : memref<16x16x144xbf16, #tpu.memory_space<vmem>>, vector<10x16x16xbf16>
    tpu.vector_store %arg11[%c6_35, %c0_36, %c16_37], %31 {strides = array<i32>} : memref<16x16x144xbf16, #tpu.memory_space<vmem>>, vector<10x16x16xbf16>,
    %cst_38 = arith.constant 0.000000e+00 : bf16
    %33 = vector.broadcast %cst_38 : bf16 to vector<6x16x16xbf16>
    %c0_39 = arith.constant 0 : index
    %c0_40 = arith.constant 0 : index
    %c32 = arith.constant 32 : index
    %34 = vector.load %arg11[%c0_39, %c0_40, %c32] : memref<16x16x144xbf16, #tpu.memory_space<vmem>>, vector<6x16x16xbf16>
    tpu.vector_store %arg11[%c0_39, %c0_40, %c32], %33 {strides = array<i32>} : memref<16x16x144xbf16, #tpu.memory_space<vmem>>, vector<6x16x16xbf16>,
    %cst_41 = arith.constant 0.000000e+00 : bf16
    %35 = vector.broadcast %cst_41 : bf16 to vector<10x6x16xbf16>
    %c6_42 = arith.constant 6 : index
    %c10 = arith.constant 10 : index
    %c32_43 = arith.constant 32 : index
    %36 = vector.load %arg11[%c6_42, %c10, %c32_43] : memref<16x16x144xbf16, #tpu.memory_space<vmem>>, vector<10x6x16xbf16>
    tpu.vector_store %arg11[%c6_42, %c10, %c32_43], %35 {strides = array<i32>} : memref<16x16x144xbf16, #tpu.memory_space<vmem>>, vector<10x6x16xbf16>,
    %c0_44 = arith.constant 0 : index
    %c0_45 = arith.constant 0 : index
    %c6_46 = arith.constant 6 : index
    %c0_47 = arith.constant 0 : index
    %37 = vector.load %arg1[%c0_44, %c0_45, %c6_46, %c0_47] : memref<1x16x16x16xbf16, #tpu.memory_space<vmem>>, vector<1x10x10x16xbf16>
    %38 = vector.shape_cast %37 : vector<1x10x10x16xbf16> to vector<10x10x16xbf16>
    %c6_48 = arith.constant 6 : index
    %c0_49 = arith.constant 0 : index
    %c32_50 = arith.constant 32 : index
    %39 = vector.load %arg11[%c6_48, %c0_49, %c32_50] : memref<16x16x144xbf16, #tpu.memory_space<vmem>>, vector<10x10x16xbf16>
    tpu.vector_store %arg11[%c6_48, %c0_49, %c32_50], %38 {strides = array<i32>} : memref<16x16x144xbf16, #tpu.memory_space<vmem>>, vector<10x10x16xbf16>,
    %cst_51 = arith.constant 0.000000e+00 : bf16
    %40 = vector.broadcast %cst_51 : bf16 to vector<16x6x16xbf16>
    %c0_52 = arith.constant 0 : index
    %c0_53 = arith.constant 0 : index
    %c48 = arith.constant 48 : index
    %41 = vector.load %arg11[%c0_52, %c0_53, %c48] : memref<16x16x144xbf16, #tpu.memory_space<vmem>>, vector<16x6x16xbf16>
    tpu.vector_store %arg11[%c0_52, %c0_53, %c48], %40 {strides = array<i32>} : memref<16x16x144xbf16, #tpu.memory_space<vmem>>, vector<16x6x16xbf16>,
    %c0_54 = arith.constant 0 : index
    %c0_55 = arith.constant 0 : index
    %c0_56 = arith.constant 0 : index
    %c0_57 = arith.constant 0 : index
    %42 = vector.load %arg1[%c0_54, %c0_55, %c0_56, %c0_57] : memref<1x16x16x16xbf16, #tpu.memory_space<vmem>>, vector<1x16x10x16xbf16>
    %43 = vector.shape_cast %42 : vector<1x16x10x16xbf16> to vector<16x10x16xbf16>
    %c0_58 = arith.constant 0 : index
    %c6_59 = arith.constant 6 : index
    %c48_60 = arith.constant 48 : index
    %44 = vector.load %arg11[%c0_58, %c6_59, %c48_60] : memref<16x16x144xbf16, #tpu.memory_space<vmem>>, vector<16x10x16xbf16>
    tpu.vector_store %arg11[%c0_58, %c6_59, %c48_60], %43 {strides = array<i32>} : memref<16x16x144xbf16, #tpu.memory_space<vmem>>, vector<16x10x16xbf16>,
    %c0_61 = arith.constant 0 : index
    %c0_62 = arith.constant 0 : index
    %c0_63 = arith.constant 0 : index
    %c0_64 = arith.constant 0 : index
    %45 = vector.load %arg1[%c0_61, %c0_62, %c0_63, %c0_64] : memref<1x16x16x16xbf16, #tpu.memory_space<vmem>>, vector<1x16x16x16xbf16>
    %46 = vector.shape_cast %45 : vector<1x16x16x16xbf16> to vector<16x16x16xbf16>
    %c0_65 = arith.constant 0 : index
    %c0_66 = arith.constant 0 : index
    %c64 = arith.constant 64 : index
    %47 = vector.load %arg11[%c0_65, %c0_66, %c64] : memref<16x16x144xbf16, #tpu.memory_space<vmem>>, vector<16x16x16xbf16>
    tpu.vector_store %arg11[%c0_65, %c0_66, %c64], %46 {strides = array<i32>} : memref<16x16x144xbf16, #tpu.memory_space<vmem>>, vector<16x16x16xbf16>,
    %cst_67 = arith.constant 0.000000e+00 : bf16
    %48 = vector.broadcast %cst_67 : bf16 to vector<16x6x16xbf16>
    %c0_68 = arith.constant 0 : index
    %c10_69 = arith.constant 10 : index
    %c80 = arith.constant 80 : index
    %49 = vector.load %arg11[%c0_68, %c10_69, %c80] : memref<16x16x144xbf16, #tpu.memory_space<vmem>>, vector<16x6x16xbf16>
    tpu.vector_store %arg11[%c0_68, %c10_69, %c80], %48 {strides = array<i32>} : memref<16x16x144xbf16, #tpu.memory_space<vmem>>, vector<16x6x16xbf16>,
    %c0_70 = arith.constant 0 : index
    %c0_71 = arith.constant 0 : index
    %c6_72 = arith.constant 6 : index
    %c0_73 = arith.constant 0 : index
    %50 = vector.load %arg1[%c0_70, %c0_71, %c6_72, %c0_73] : memref<1x16x16x16xbf16, #tpu.memory_space<vmem>>, vector<1x16x10x16xbf16>
    %51 = vector.shape_cast %50 : vector<1x16x10x16xbf16> to vector<16x10x16xbf16>
    %c0_74 = arith.constant 0 : index
    %c0_75 = arith.constant 0 : index
    %c80_76 = arith.constant 80 : index
    %52 = vector.load %arg11[%c0_74, %c0_75, %c80_76] : memref<16x16x144xbf16, #tpu.memory_space<vmem>>, vector<16x10x16xbf16>
    tpu.vector_store %arg11[%c0_74, %c0_75, %c80_76], %51 {strides = array<i32>} : memref<16x16x144xbf16, #tpu.memory_space<vmem>>, vector<16x10x16xbf16>,
    %cst_77 = arith.constant 0.000000e+00 : bf16
    %53 = vector.broadcast %cst_77 : bf16 to vector<6x16x16xbf16>
    %c10_78 = arith.constant 10 : index
    %c0_79 = arith.constant 0 : index
    %c96 = arith.constant 96 : index
    %54 = vector.load %arg11[%c10_78, %c0_79, %c96] : memref<16x16x144xbf16, #tpu.memory_space<vmem>>, vector<6x16x16xbf16>
    tpu.vector_store %arg11[%c10_78, %c0_79, %c96], %53 {strides = array<i32>} : memref<16x16x144xbf16, #tpu.memory_space<vmem>>, vector<6x16x16xbf16>,
    %cst_80 = arith.constant 0.000000e+00 : bf16
    %55 = vector.broadcast %cst_80 : bf16 to vector<10x6x16xbf16>
    %c0_81 = arith.constant 0 : index
    %c0_82 = arith.constant 0 : index
    %c96_83 = arith.constant 96 : index
    %56 = vector.load %arg11[%c0_81, %c0_82, %c96_83] : memref<16x16x144xbf16, #tpu.memory_space<vmem>>, vector<10x6x16xbf16>
    tpu.vector_store %arg11[%c0_81, %c0_82, %c96_83], %55 {strides = array<i32>} : memref<16x16x144xbf16, #tpu.memory_space<vmem>>, vector<10x6x16xbf16>,
    %c0_84 = arith.constant 0 : index
    %c6_85 = arith.constant 6 : index
    %c0_86 = arith.constant 0 : index
    %c0_87 = arith.constant 0 : index
    %57 = vector.load %arg1[%c0_84, %c6_85, %c0_86, %c0_87] : memref<1x16x16x16xbf16, #tpu.memory_space<vmem>>, vector<1x10x10x16xbf16>
    %58 = vector.shape_cast %57 : vector<1x10x10x16xbf16> to vector<10x10x16xbf16>
    %c0_88 = arith.constant 0 : index
    %c6_89 = arith.constant 6 : index
    %c96_90 = arith.constant 96 : index
    %59 = vector.load %arg11[%c0_88, %c6_89, %c96_90] : memref<16x16x144xbf16, #tpu.memory_space<vmem>>, vector<10x10x16xbf16>
    tpu.vector_store %arg11[%c0_88, %c6_89, %c96_90], %58 {strides = array<i32>} : memref<16x16x144xbf16, #tpu.memory_space<vmem>>, vector<10x10x16xbf16>,
    %cst_91 = arith.constant 0.000000e+00 : bf16
    %60 = vector.broadcast %cst_91 : bf16 to vector<6x16x16xbf16>
    %c10_92 = arith.constant 10 : index
    %c0_93 = arith.constant 0 : index
    %c112 = arith.constant 112 : index
    %61 = vector.load %arg11[%c10_92, %c0_93, %c112] : memref<16x16x144xbf16, #tpu.memory_space<vmem>>, vector<6x16x16xbf16>
    tpu.vector_store %arg11[%c10_92, %c0_93, %c112], %60 {strides = array<i32>} : memref<16x16x144xbf16, #tpu.memory_space<vmem>>, vector<6x16x16xbf16>,
    %c0_94 = arith.constant 0 : index
    %c6_95 = arith.constant 6 : index
    %c0_96 = arith.constant 0 : index
    %c0_97 = arith.constant 0 : index
    %62 = vector.load %arg1[%c0_94, %c6_95, %c0_96, %c0_97] : memref<1x16x16x16xbf16, #tpu.memory_space<vmem>>, vector<1x10x16x16xbf16>
    %63 = vector.shape_cast %62 : vector<1x10x16x16xbf16> to vector<10x16x16xbf16>
    %c0_98 = arith.constant 0 : index
    %c0_99 = arith.constant 0 : index
    %c112_100 = arith.constant 112 : index
    %64 = vector.load %arg11[%c0_98, %c0_99, %c112_100] : memref<16x16x144xbf16, #tpu.memory_space<vmem>>, vector<10x16x16xbf16>
    tpu.vector_store %arg11[%c0_98, %c0_99, %c112_100], %63 {strides = array<i32>} : memref<16x16x144xbf16, #tpu.memory_space<vmem>>, vector<10x16x16xbf16>,
    %cst_101 = arith.constant 0.000000e+00 : bf16
    %65 = vector.broadcast %cst_101 : bf16 to vector<6x16x16xbf16>
    %c10_102 = arith.constant 10 : index
    %c0_103 = arith.constant 0 : index
    %c128 = arith.constant 128 : index
    %66 = vector.load %arg11[%c10_102, %c0_103, %c128] : memref<16x16x144xbf16, #tpu.memory_space<vmem>>, vector<6x16x16xbf16>
    tpu.vector_store %arg11[%c10_102, %c0_103, %c128], %65 {strides = array<i32>} : memref<16x16x144xbf16, #tpu.memory_space<vmem>>, vector<6x16x16xbf16>,
    %cst_104 = arith.constant 0.000000e+00 : bf16
    %67 = vector.broadcast %cst_104 : bf16 to vector<10x6x16xbf16>
    %c0_105 = arith.constant 0 : index
    %c10_106 = arith.constant 10 : index
    %c128_107 = arith.constant 128 : index
    %68 = vector.load %arg11[%c0_105, %c10_106, %c128_107] : memref<16x16x144xbf16, #tpu.memory_space<vmem>>, vector<10x6x16xbf16>
    tpu.vector_store %arg11[%c0_105, %c10_106, %c128_107], %67 {strides = array<i32>} : memref<16x16x144xbf16, #tpu.memory_space<vmem>>, vector<10x6x16xbf16>,
    %c0_108 = arith.constant 0 : index
    %c6_109 = arith.constant 6 : index
    %c6_110 = arith.constant 6 : index
    %c0_111 = arith.constant 0 : index
    %69 = vector.load %arg1[%c0_108, %c6_109, %c6_110, %c0_111] : memref<1x16x16x16xbf16, #tpu.memory_space<vmem>>, vector<1x10x10x16xbf16>
    %70 = vector.shape_cast %69 : vector<1x10x10x16xbf16> to vector<10x10x16xbf16>
    %c0_112 = arith.constant 0 : index
    %c0_113 = arith.constant 0 : index
    %c128_114 = arith.constant 128 : index
    %71 = vector.load %arg11[%c0_112, %c0_113, %c128_114] : memref<16x16x144xbf16, #tpu.memory_space<vmem>>, vector<10x10x16xbf16>
    tpu.vector_store %arg11[%c0_112, %c0_113, %c128_114], %70 {strides = array<i32>} : memref<16x16x144xbf16, #tpu.memory_space<vmem>>, vector<10x10x16xbf16>,
    %c0_115 = arith.constant 0 : index
    %c0_116 = arith.constant 0 : index
    %c0_117 = arith.constant 0 : index
    %72 = vector.load %arg11[%c0_115, %c0_116, %c0_117] : memref<16x16x144xbf16, #tpu.memory_space<vmem>>, vector<16x16x144xbf16>
    %73 = vector.shape_cast %72 : vector<16x16x144xbf16> to vector<256x144xbf16>
    %c0_118 = arith.constant 0 : index
    %c0_119 = arith.constant 0 : index
    %74 = vector.load %arg3[%c0_118, %c0_119] : memref<144x128xbf16, #tpu.memory_space<vmem>>, vector<144x128xbf16>
    %cst_120 = arith.constant dense<0.000000e+00> : vector<256x128xf32>
    %75 = tpu.matmul %73, %74, %cst_120 {dimension_numbers = #tpu.dot_dimension_numbers<[1], [0], [0], [1], [0, 0, 1, 1], [], []>} : vector<256x144xbf16>, vector<144x128xbf16>, vector<256x128xf32> -> vector<256x128xf32>
    %c1 = arith.constant 1 : index
    %c0_121 = arith.constant 0 : index
    %76 = vector.load %arg8[%c1, %c0_121] : memref<6x128xf32, #tpu.memory_space<vmem>>, vector<1x128xf32>
    %77 = vector.shape_cast %76 : vector<1x128xf32> to vector<128xf32>
    %78 = vector.shape_cast %77 : vector<128xf32> to vector<1x128xf32>
    %c1_122 = arith.constant 1 : index
    %c0_123 = arith.constant 0 : index
    %79 = vector.load %arg9[%c1_122, %c0_123] : memref<6x128xf32, #tpu.memory_space<vmem>>, vector<1x128xf32>
    %80 = vector.shape_cast %79 : vector<1x128xf32> to vector<128xf32>
    %81 = vector.shape_cast %80 : vector<128xf32> to vector<1x128xf32>
    %82 = vector.broadcast %78 : vector<1x128xf32> to vector<256x128xf32>
    %83 = arith.mulf %75, %82 : vector<256x128xf32>
    %84 = vector.broadcast %81 : vector<1x128xf32> to vector<256x128xf32>
    %85 = arith.addf %83, %84 : vector<256x128xf32>
    %cst_124 = arith.constant 0.000000e+00 : f32
    %86 = vector.broadcast %cst_124 : f32 to vector<256x128xf32>
    %87 = arith.maximumf %85, %86 : vector<256x128xf32>
    %88 = arith.truncf %87 : vector<256x128xf32> to vector<256x128xbf16>
    %c1_125 = arith.constant 1 : index
    %c0_126 = arith.constant 0 : index
    %c0_127 = arith.constant 0 : index
    %89 = vector.load %arg7[%c1_125, %c0_126, %c0_127] : memref<5x128x128xbf16, #tpu.memory_space<vmem>>, vector<1x128x128xbf16>
    %90 = vector.shape_cast %89 : vector<1x128x128xbf16> to vector<128x128xbf16>
    %cst_128 = arith.constant dense<0.000000e+00> : vector<256x128xf32>
    %91 = tpu.matmul %88, %90, %cst_128 {dimension_numbers = #tpu.dot_dimension_numbers<[1], [0], [0], [1], [0, 0, 1, 1], [], []>} : vector<256x128xbf16>, vector<128x128xbf16>, vector<256x128xf32> -> vector<256x128xf32>
    %92 = arith.addf %20, %91 : vector<256x128xf32>
    %cst_129 = arith.constant 0.000000e+00 : bf16
    %93 = vector.broadcast %cst_129 : bf16 to vector<6x10x16xbf16>
    %c6_130 = arith.constant 6 : index
    %c6_131 = arith.constant 6 : index
    %c0_132 = arith.constant 0 : index
    %94 = vector.load %arg11[%c6_130, %c6_131, %c0_132] : memref<16x16x144xbf16, #tpu.memory_space<vmem>>, vector<6x10x16xbf16>
    tpu.vector_store %arg11[%c6_130, %c6_131, %c0_132], %93 {strides = array<i32>} : memref<16x16x144xbf16, #tpu.memory_space<vmem>>, vector<6x10x16xbf16>,
    %cst_133 = arith.constant 0.000000e+00 : bf16
    %95 = vector.broadcast %cst_133 : bf16 to vector<4x6x16xbf16>
    %c12 = arith.constant 12 : index
    %c6_134 = arith.constant 6 : index
    %c0_135 = arith.constant 0 : index
    %96 = vector.load %arg11[%c12, %c6_134, %c0_135] : memref<16x16x144xbf16, #tpu.memory_space<vmem>>, vector<4x6x16xbf16>
    tpu.vector_store %arg11[%c12, %c6_134, %c0_135], %95 {strides = array<i32>} : memref<16x16x144xbf16, #tpu.memory_space<vmem>>, vector<4x6x16xbf16>,
    %c0_136 = arith.constant 0 : index
    %c0_137 = arith.constant 0 : index
    %c0_138 = arith.constant 0 : index
    %c0_139 = arith.constant 0 : index
    %97 = vector.load %arg1[%c0_136, %c0_137, %c0_138, %c0_139] : memref<1x16x16x16xbf16, #tpu.memory_space<vmem>>, vector<1x4x4x16xbf16>
    %98 = vector.shape_cast %97 : vector<1x4x4x16xbf16> to vector<4x4x16xbf16>
    %c12_140 = arith.constant 12 : index
    %c12_141 = arith.constant 12 : index
    %c0_142 = arith.constant 0 : index
    %99 = vector.load %arg11[%c12_140, %c12_141, %c0_142] : memref<16x16x144xbf16, #tpu.memory_space<vmem>>, vector<4x4x16xbf16>
    tpu.vector_store %arg11[%c12_140, %c12_141, %c0_142], %98 {strides = array<i32>} : memref<16x16x144xbf16, #tpu.memory_space<vmem>>, vector<4x4x16xbf16>,
    %cst_143 = arith.constant 0.000000e+00 : bf16
    %100 = vector.broadcast %cst_143 : bf16 to vector<6x16x16xbf16>
    %c6_144 = arith.constant 6 : index
    %c0_145 = arith.constant 0 : index
    %c16_146 = arith.constant 16 : index
    %101 = vector.load %arg11[%c6_144, %c0_145, %c16_146] : memref<16x16x144xbf16, #tpu.memory_space<vmem>>, vector<6x16x16xbf16>
    tpu.vector_store %arg11[%c6_144, %c0_145, %c16_146], %100 {strides = array<i32>} : memref<16x16x144xbf16, #tpu.memory_space<vmem>>, vector<6x16x16xbf16>,
    %c0_147 = arith.constant 0 : index
    %c0_148 = arith.constant 0 : index
    %c0_149 = arith.constant 0 : index
    %c0_150 = arith.constant 0 : index
    %102 = vector.load %arg1[%c0_147, %c0_148, %c0_149, %c0_150] : memref<1x16x16x16xbf16, #tpu.memory_space<vmem>>, vector<1x4x16x16xbf16>
    %103 = vector.shape_cast %102 : vector<1x4x16x16xbf16> to vector<4x16x16xbf16>
    %c12_151 = arith.constant 12 : index
    %c0_152 = arith.constant 0 : index
    %c16_153 = arith.constant 16 : index
    %104 = vector.load %arg11[%c12_151, %c0_152, %c16_153] : memref<16x16x144xbf16, #tpu.memory_space<vmem>>, vector<4x16x16xbf16>
    tpu.vector_store %arg11[%c12_151, %c0_152, %c16_153], %103 {strides = array<i32>} : memref<16x16x144xbf16, #tpu.memory_space<vmem>>, vector<4x16x16xbf16>,
    %cst_154 = arith.constant 0.000000e+00 : bf16
    %105 = vector.broadcast %cst_154 : bf16 to vector<6x10x16xbf16>
    %c6_155 = arith.constant 6 : index
    %c0_156 = arith.constant 0 : index
    %c32_157 = arith.constant 32 : index
    %106 = vector.load %arg11[%c6_155, %c0_156, %c32_157] : memref<16x16x144xbf16, #tpu.memory_space<vmem>>, vector<6x10x16xbf16>
    tpu.vector_store %arg11[%c6_155, %c0_156, %c32_157], %105 {strides = array<i32>} : memref<16x16x144xbf16, #tpu.memory_space<vmem>>, vector<6x10x16xbf16>,
    %cst_158 = arith.constant 0.000000e+00 : bf16
    %107 = vector.broadcast %cst_158 : bf16 to vector<4x6x16xbf16>
    %c12_159 = arith.constant 12 : index
    %c4 = arith.constant 4 : index
    %c32_160 = arith.constant 32 : index
    %108 = vector.load %arg11[%c12_159, %c4, %c32_160] : memref<16x16x144xbf16, #tpu.memory_space<vmem>>, vector<4x6x16xbf16>
    tpu.vector_store %arg11[%c12_159, %c4, %c32_160], %107 {strides = array<i32>} : memref<16x16x144xbf16, #tpu.memory_space<vmem>>, vector<4x6x16xbf16>,
    %c0_161 = arith.constant 0 : index
    %c0_162 = arith.constant 0 : index
    %c12_163 = arith.constant 12 : index
    %c0_164 = arith.constant 0 : index
    %109 = vector.load %arg1[%c0_161, %c0_162, %c12_163, %c0_164] : memref<1x16x16x16xbf16, #tpu.memory_space<vmem>>, vector<1x4x4x16xbf16>
    %110 = vector.shape_cast %109 : vector<1x4x4x16xbf16> to vector<4x4x16xbf16>
    %c12_165 = arith.constant 12 : index
    %c0_166 = arith.constant 0 : index
    %c32_167 = arith.constant 32 : index
    %111 = vector.load %arg11[%c12_165, %c0_166, %c32_167] : memref<16x16x144xbf16, #tpu.memory_space<vmem>>, vector<4x4x16xbf16>
    tpu.vector_store %arg11[%c12_165, %c0_166, %c32_167], %110 {strides = array<i32>} : memref<16x16x144xbf16, #tpu.memory_space<vmem>>, vector<4x4x16xbf16>,
    %cst_168 = arith.constant 0.000000e+00 : bf16
    %112 = vector.broadcast %cst_168 : bf16 to vector<16x6x16xbf16>
    %c0_169 = arith.constant 0 : index
    %c6_170 = arith.constant 6 : index
    %c48_171 = arith.constant 48 : index
    %113 = vector.load %arg11[%c0_169, %c6_170, %c48_171] : memref<16x16x144xbf16, #tpu.memory_space<vmem>>, vector<16x6x16xbf16>
    tpu.vector_store %arg11[%c0_169, %c6_170, %c48_171], %112 {strides = array<i32>} : memref<16x16x144xbf16, #tpu.memory_space<vmem>>, vector<16x6x16xbf16>,
    %c0_172 = arith.constant 0 : index
    %c0_173 = arith.constant 0 : index
    %c0_174 = arith.constant 0 : index
    %c0_175 = arith.constant 0 : index
    %114 = vector.load %arg1[%c0_172, %c0_173, %c0_174, %c0_175] : memref<1x16x16x16xbf16, #tpu.memory_space<vmem>>, vector<1x16x4x16xbf16>
    %115 = vector.shape_cast %114 : vector<1x16x4x16xbf16> to vector<16x4x16xbf16>
    %c0_176 = arith.constant 0 : index
    %c12_177 = arith.constant 12 : index
    %c48_178 = arith.constant 48 : index
    %116 = vector.load %arg11[%c0_176, %c12_177, %c48_178] : memref<16x16x144xbf16, #tpu.memory_space<vmem>>, vector<16x4x16xbf16>
    tpu.vector_store %arg11[%c0_176, %c12_177, %c48_178], %115 {strides = array<i32>} : memref<16x16x144xbf16, #tpu.memory_space<vmem>>, vector<16x4x16xbf16>,
    %c0_179 = arith.constant 0 : index
    %c0_180 = arith.constant 0 : index
    %c0_181 = arith.constant 0 : index
    %c0_182 = arith.constant 0 : index
    %117 = vector.load %arg1[%c0_179, %c0_180, %c0_181, %c0_182] : memref<1x16x16x16xbf16, #tpu.memory_space<vmem>>, vector<1x16x16x16xbf16>
    %118 = vector.shape_cast %117 : vector<1x16x16x16xbf16> to vector<16x16x16xbf16>
    %c0_183 = arith.constant 0 : index
    %c0_184 = arith.constant 0 : index
    %c64_185 = arith.constant 64 : index
    %119 = vector.load %arg11[%c0_183, %c0_184, %c64_185] : memref<16x16x144xbf16, #tpu.memory_space<vmem>>, vector<16x16x16xbf16>
    tpu.vector_store %arg11[%c0_183, %c0_184, %c64_185], %118 {strides = array<i32>} : memref<16x16x144xbf16, #tpu.memory_space<vmem>>, vector<16x16x16xbf16>,
    %cst_186 = arith.constant 0.000000e+00 : bf16
    %120 = vector.broadcast %cst_186 : bf16 to vector<16x6x16xbf16>
    %c0_187 = arith.constant 0 : index
    %c4_188 = arith.constant 4 : index
    %c80_189 = arith.constant 80 : index
    %121 = vector.load %arg11[%c0_187, %c4_188, %c80_189] : memref<16x16x144xbf16, #tpu.memory_space<vmem>>, vector<16x6x16xbf16>
    tpu.vector_store %arg11[%c0_187, %c4_188, %c80_189], %120 {strides = array<i32>} : memref<16x16x144xbf16, #tpu.memory_space<vmem>>, vector<16x6x16xbf16>,
    %c0_190 = arith.constant 0 : index
    %c0_191 = arith.constant 0 : index
    %c12_192 = arith.constant 12 : index
    %c0_193 = arith.constant 0 : index
    %122 = vector.load %arg1[%c0_190, %c0_191, %c12_192, %c0_193] : memref<1x16x16x16xbf16, #tpu.memory_space<vmem>>, vector<1x16x4x16xbf16>
    %123 = vector.shape_cast %122 : vector<1x16x4x16xbf16> to vector<16x4x16xbf16>
    %c0_194 = arith.constant 0 : index
    %c0_195 = arith.constant 0 : index
    %c80_196 = arith.constant 80 : index
    %124 = vector.load %arg11[%c0_194, %c0_195, %c80_196] : memref<16x16x144xbf16, #tpu.memory_space<vmem>>, vector<16x4x16xbf16>
    tpu.vector_store %arg11[%c0_194, %c0_195, %c80_196], %123 {strides = array<i32>} : memref<16x16x144xbf16, #tpu.memory_space<vmem>>, vector<16x4x16xbf16>,
    %cst_197 = arith.constant 0.000000e+00 : bf16
    %125 = vector.broadcast %cst_197 : bf16 to vector<6x10x16xbf16>
    %c4_198 = arith.constant 4 : index
    %c6_199 = arith.constant 6 : index
    %c96_200 = arith.constant 96 : index
    %126 = vector.load %arg11[%c4_198, %c6_199, %c96_200] : memref<16x16x144xbf16, #tpu.memory_space<vmem>>, vector<6x10x16xbf16>
    tpu.vector_store %arg11[%c4_198, %c6_199, %c96_200], %125 {strides = array<i32>} : memref<16x16x144xbf16, #tpu.memory_space<vmem>>, vector<6x10x16xbf16>,
    %cst_201 = arith.constant 0.000000e+00 : bf16
    %127 = vector.broadcast %cst_201 : bf16 to vector<4x6x16xbf16>
    %c0_202 = arith.constant 0 : index
    %c6_203 = arith.constant 6 : index
    %c96_204 = arith.constant 96 : index
    %128 = vector.load %arg11[%c0_202, %c6_203, %c96_204] : memref<16x16x144xbf16, #tpu.memory_space<vmem>>, vector<4x6x16xbf16>
    tpu.vector_store %arg11[%c0_202, %c6_203, %c96_204], %127 {strides = array<i32>} : memref<16x16x144xbf16, #tpu.memory_space<vmem>>, vector<4x6x16xbf16>,
    %c0_205 = arith.constant 0 : index
    %c12_206 = arith.constant 12 : index
    %c0_207 = arith.constant 0 : index
    %c0_208 = arith.constant 0 : index
    %129 = vector.load %arg1[%c0_205, %c12_206, %c0_207, %c0_208] : memref<1x16x16x16xbf16, #tpu.memory_space<vmem>>, vector<1x4x4x16xbf16>
    %130 = vector.shape_cast %129 : vector<1x4x4x16xbf16> to vector<4x4x16xbf16>
    %c0_209 = arith.constant 0 : index
    %c12_210 = arith.constant 12 : index
    %c96_211 = arith.constant 96 : index
    %131 = vector.load %arg11[%c0_209, %c12_210, %c96_211] : memref<16x16x144xbf16, #tpu.memory_space<vmem>>, vector<4x4x16xbf16>
    tpu.vector_store %arg11[%c0_209, %c12_210, %c96_211], %130 {strides = array<i32>} : memref<16x16x144xbf16, #tpu.memory_space<vmem>>, vector<4x4x16xbf16>,
    %cst_212 = arith.constant 0.000000e+00 : bf16
    %132 = vector.broadcast %cst_212 : bf16 to vector<6x16x16xbf16>
    %c4_213 = arith.constant 4 : index
    %c0_214 = arith.constant 0 : index
    %c112_215 = arith.constant 112 : index
    %133 = vector.load %arg11[%c4_213, %c0_214, %c112_215] : memref<16x16x144xbf16, #tpu.memory_space<vmem>>, vector<6x16x16xbf16>
    tpu.vector_store %arg11[%c4_213, %c0_214, %c112_215], %132 {strides = array<i32>} : memref<16x16x144xbf16, #tpu.memory_space<vmem>>, vector<6x16x16xbf16>,
    %c0_216 = arith.constant 0 : index
    %c12_217 = arith.constant 12 : index
    %c0_218 = arith.constant 0 : index
    %c0_219 = arith.constant 0 : index
    %134 = vector.load %arg1[%c0_216, %c12_217, %c0_218, %c0_219] : memref<1x16x16x16xbf16, #tpu.memory_space<vmem>>, vector<1x4x16x16xbf16>
    %135 = vector.shape_cast %134 : vector<1x4x16x16xbf16> to vector<4x16x16xbf16>
    %c0_220 = arith.constant 0 : index
    %c0_221 = arith.constant 0 : index
    %c112_222 = arith.constant 112 : index
    %136 = vector.load %arg11[%c0_220, %c0_221, %c112_222] : memref<16x16x144xbf16, #tpu.memory_space<vmem>>, vector<4x16x16xbf16>
    tpu.vector_store %arg11[%c0_220, %c0_221, %c112_222], %135 {strides = array<i32>} : memref<16x16x144xbf16, #tpu.memory_space<vmem>>, vector<4x16x16xbf16>,
    %cst_223 = arith.constant 0.000000e+00 : bf16
    %137 = vector.broadcast %cst_223 : bf16 to vector<6x10x16xbf16>
    %c4_224 = arith.constant 4 : index
    %c0_225 = arith.constant 0 : index
    %c128_226 = arith.constant 128 : index
    %138 = vector.load %arg11[%c4_224, %c0_225, %c128_226] : memref<16x16x144xbf16, #tpu.memory_space<vmem>>, vector<6x10x16xbf16>
    tpu.vector_store %arg11[%c4_224, %c0_225, %c128_226], %137 {strides = array<i32>} : memref<16x16x144xbf16, #tpu.memory_space<vmem>>, vector<6x10x16xbf16>,
    %cst_227 = arith.constant 0.000000e+00 : bf16
    %139 = vector.broadcast %cst_227 : bf16 to vector<4x6x16xbf16>
    %c0_228 = arith.constant 0 : index
    %c4_229 = arith.constant 4 : index
    %c128_230 = arith.constant 128 : index
    %140 = vector.load %arg11[%c0_228, %c4_229, %c128_230] : memref<16x16x144xbf16, #tpu.memory_space<vmem>>, vector<4x6x16xbf16>
    tpu.vector_store %arg11[%c0_228, %c4_229, %c128_230], %139 {strides = array<i32>} : memref<16x16x144xbf16, #tpu.memory_space<vmem>>, vector<4x6x16xbf16>,
    %c0_231 = arith.constant 0 : index
    %c12_232 = arith.constant 12 : index
    %c12_233 = arith.constant 12 : index
    %c0_234 = arith.constant 0 : index
    %141 = vector.load %arg1[%c0_231, %c12_232, %c12_233, %c0_234] : memref<1x16x16x16xbf16, #tpu.memory_space<vmem>>, vector<1x4x4x16xbf16>
    %142 = vector.shape_cast %141 : vector<1x4x4x16xbf16> to vector<4x4x16xbf16>
    %c0_235 = arith.constant 0 : index
    %c0_236 = arith.constant 0 : index
    %c128_237 = arith.constant 128 : index
    %143 = vector.load %arg11[%c0_235, %c0_236, %c128_237] : memref<16x16x144xbf16, #tpu.memory_space<vmem>>, vector<4x4x16xbf16>
    tpu.vector_store %arg11[%c0_235, %c0_236, %c128_237], %142 {strides = array<i32>} : memref<16x16x144xbf16, #tpu.memory_space<vmem>>, vector<4x4x16xbf16>,
    %c0_238 = arith.constant 0 : index
    %c0_239 = arith.constant 0 : index
    %c0_240 = arith.constant 0 : index
    %144 = vector.load %arg11[%c0_238, %c0_239, %c0_240] : memref<16x16x144xbf16, #tpu.memory_space<vmem>>, vector<16x16x144xbf16>
    %145 = vector.shape_cast %144 : vector<16x16x144xbf16> to vector<256x144xbf16>
    %c0_241 = arith.constant 0 : index
    %c0_242 = arith.constant 0 : index
    %146 = vector.load %arg4[%c0_241, %c0_242] : memref<144x128xbf16, #tpu.memory_space<vmem>>, vector<144x128xbf16>
    %cst_243 = arith.constant dense<0.000000e+00> : vector<256x128xf32>
    %147 = tpu.matmul %145, %146, %cst_243 {dimension_numbers = #tpu.dot_dimension_numbers<[1], [0], [0], [1], [0, 0, 1, 1], [], []>} : vector<256x144xbf16>, vector<144x128xbf16>, vector<256x128xf32> -> vector<256x128xf32>
    %c2 = arith.constant 2 : index
    %c0_244 = arith.constant 0 : index
    %148 = vector.load %arg8[%c2, %c0_244] : memref<6x128xf32, #tpu.memory_space<vmem>>, vector<1x128xf32>
    %149 = vector.shape_cast %148 : vector<1x128xf32> to vector<128xf32>
    %150 = vector.shape_cast %149 : vector<128xf32> to vector<1x128xf32>
    %c2_245 = arith.constant 2 : index
    %c0_246 = arith.constant 0 : index
    %151 = vector.load %arg9[%c2_245, %c0_246] : memref<6x128xf32, #tpu.memory_space<vmem>>, vector<1x128xf32>
    %152 = vector.shape_cast %151 : vector<1x128xf32> to vector<128xf32>
    %153 = vector.shape_cast %152 : vector<128xf32> to vector<1x128xf32>
    %154 = vector.broadcast %150 : vector<1x128xf32> to vector<256x128xf32>
    %155 = arith.mulf %147, %154 : vector<256x128xf32>
    %156 = vector.broadcast %153 : vector<1x128xf32> to vector<256x128xf32>
    %157 = arith.addf %155, %156 : vector<256x128xf32>
    %cst_247 = arith.constant 0.000000e+00 : f32
    %158 = vector.broadcast %cst_247 : f32 to vector<256x128xf32>
    %159 = arith.maximumf %157, %158 : vector<256x128xf32>
    %160 = arith.truncf %159 : vector<256x128xf32> to vector<256x128xbf16>
    %c2_248 = arith.constant 2 : index
    %c0_249 = arith.constant 0 : index
    %c0_250 = arith.constant 0 : index
    %161 = vector.load %arg7[%c2_248, %c0_249, %c0_250] : memref<5x128x128xbf16, #tpu.memory_space<vmem>>, vector<1x128x128xbf16>
    %162 = vector.shape_cast %161 : vector<1x128x128xbf16> to vector<128x128xbf16>
    %cst_251 = arith.constant dense<0.000000e+00> : vector<256x128xf32>
    %163 = tpu.matmul %160, %162, %cst_251 {dimension_numbers = #tpu.dot_dimension_numbers<[1], [0], [0], [1], [0, 0, 1, 1], [], []>} : vector<256x128xbf16>, vector<128x128xbf16>, vector<256x128xf32> -> vector<256x128xf32>
    %164 = arith.addf %92, %163 : vector<256x128xf32>
    %cst_252 = arith.constant 0.000000e+00 : bf16
    %165 = vector.broadcast %cst_252 : bf16 to vector<4x4x16xbf16>
    %c12_253 = arith.constant 12 : index
    %c12_254 = arith.constant 12 : index
    %c0_255 = arith.constant 0 : index
    %166 = vector.load %arg11[%c12_253, %c12_254, %c0_255] : memref<16x16x144xbf16, #tpu.memory_space<vmem>>, vector<4x4x16xbf16>
    tpu.vector_store %arg11[%c12_253, %c12_254, %c0_255], %165 {strides = array<i32>} : memref<16x16x144xbf16, #tpu.memory_space<vmem>>, vector<4x4x16xbf16>,
    %cst_256 = arith.constant 0.000000e+00 : bf16
    %167 = vector.broadcast %cst_256 : bf16 to vector<4x16x16xbf16>
    %c12_257 = arith.constant 12 : index
    %c0_258 = arith.constant 0 : index
    %c16_259 = arith.constant 16 : index
    %168 = vector.load %arg11[%c12_257, %c0_258, %c16_259] : memref<16x16x144xbf16, #tpu.memory_space<vmem>>, vector<4x16x16xbf16>
    tpu.vector_store %arg11[%c12_257, %c0_258, %c16_259], %167 {strides = array<i32>} : memref<16x16x144xbf16, #tpu.memory_space<vmem>>, vector<4x16x16xbf16>,
    %cst_260 = arith.constant 0.000000e+00 : bf16
    %169 = vector.broadcast %cst_260 : bf16 to vector<4x4x16xbf16>
    %c12_261 = arith.constant 12 : index
    %c0_262 = arith.constant 0 : index
    %c32_263 = arith.constant 32 : index
    %170 = vector.load %arg11[%c12_261, %c0_262, %c32_263] : memref<16x16x144xbf16, #tpu.memory_space<vmem>>, vector<4x4x16xbf16>
    tpu.vector_store %arg11[%c12_261, %c0_262, %c32_263], %169 {strides = array<i32>} : memref<16x16x144xbf16, #tpu.memory_space<vmem>>, vector<4x4x16xbf16>,
    %cst_264 = arith.constant 0.000000e+00 : bf16
    %171 = vector.broadcast %cst_264 : bf16 to vector<16x4x16xbf16>
    %c0_265 = arith.constant 0 : index
    %c12_266 = arith.constant 12 : index
    %c48_267 = arith.constant 48 : index
    %172 = vector.load %arg11[%c0_265, %c12_266, %c48_267] : memref<16x16x144xbf16, #tpu.memory_space<vmem>>, vector<16x4x16xbf16>
    tpu.vector_store %arg11[%c0_265, %c12_266, %c48_267], %171 {strides = array<i32>} : memref<16x16x144xbf16, #tpu.memory_space<vmem>>, vector<16x4x16xbf16>,
    %c0_268 = arith.constant 0 : index
    %c0_269 = arith.constant 0 : index
    %c0_270 = arith.constant 0 : index
    %c0_271 = arith.constant 0 : index
    %173 = vector.load %arg1[%c0_268, %c0_269, %c0_270, %c0_271] : memref<1x16x16x16xbf16, #tpu.memory_space<vmem>>, vector<1x16x16x16xbf16>
    %174 = vector.shape_cast %173 : vector<1x16x16x16xbf16> to vector<16x16x16xbf16>
    %c0_272 = arith.constant 0 : index
    %c0_273 = arith.constant 0 : index
    %c64_274 = arith.constant 64 : index
    %175 = vector.load %arg11[%c0_272, %c0_273, %c64_274] : memref<16x16x144xbf16, #tpu.memory_space<vmem>>, vector<16x16x16xbf16>
    tpu.vector_store %arg11[%c0_272, %c0_273, %c64_274], %174 {strides = array<i32>} : memref<16x16x144xbf16, #tpu.memory_space<vmem>>, vector<16x16x16xbf16>,
    %cst_275 = arith.constant 0.000000e+00 : bf16
    %176 = vector.broadcast %cst_275 : bf16 to vector<16x4x16xbf16>
    %c0_276 = arith.constant 0 : index
    %c0_277 = arith.constant 0 : index
    %c80_278 = arith.constant 80 : index
    %177 = vector.load %arg11[%c0_276, %c0_277, %c80_278] : memref<16x16x144xbf16, #tpu.memory_space<vmem>>, vector<16x4x16xbf16>
    tpu.vector_store %arg11[%c0_276, %c0_277, %c80_278], %176 {strides = array<i32>} : memref<16x16x144xbf16, #tpu.memory_space<vmem>>, vector<16x4x16xbf16>,
    %cst_279 = arith.constant 0.000000e+00 : bf16
    %178 = vector.broadcast %cst_279 : bf16 to vector<4x4x16xbf16>
    %c0_280 = arith.constant 0 : index
    %c12_281 = arith.constant 12 : index
    %c96_282 = arith.constant 96 : index
    %179 = vector.load %arg11[%c0_280, %c12_281, %c96_282] : memref<16x16x144xbf16, #tpu.memory_space<vmem>>, vector<4x4x16xbf16>
    tpu.vector_store %arg11[%c0_280, %c12_281, %c96_282], %178 {strides = array<i32>} : memref<16x16x144xbf16, #tpu.memory_space<vmem>>, vector<4x4x16xbf16>,
    %cst_283 = arith.constant 0.000000e+00 : bf16
    %180 = vector.broadcast %cst_283 : bf16 to vector<4x16x16xbf16>
    %c0_284 = arith.constant 0 : index
    %c0_285 = arith.constant 0 : index
    %c112_286 = arith.constant 112 : index
    %181 = vector.load %arg11[%c0_284, %c0_285, %c112_286] : memref<16x16x144xbf16, #tpu.memory_space<vmem>>, vector<4x16x16xbf16>
    tpu.vector_store %arg11[%c0_284, %c0_285, %c112_286], %180 {strides = array<i32>} : memref<16x16x144xbf16, #tpu.memory_space<vmem>>, vector<4x16x16xbf16>,
    %cst_287 = arith.constant 0.000000e+00 : bf16
    %182 = vector.broadcast %cst_287 : bf16 to vector<4x4x16xbf16>
    %c0_288 = arith.constant 0 : index
    %c0_289 = arith.constant 0 : index
    %c128_290 = arith.constant 128 : index
    %183 = vector.load %arg11[%c0_288, %c0_289, %c128_290] : memref<16x16x144xbf16, #tpu.memory_space<vmem>>, vector<4x4x16xbf16>
    tpu.vector_store %arg11[%c0_288, %c0_289, %c128_290], %182 {strides = array<i32>} : memref<16x16x144xbf16, #tpu.memory_space<vmem>>, vector<4x4x16xbf16>,
    %c0_291 = arith.constant 0 : index
    %c0_292 = arith.constant 0 : index
    %c0_293 = arith.constant 0 : index
    %184 = vector.load %arg11[%c0_291, %c0_292, %c0_293] : memref<16x16x144xbf16, #tpu.memory_space<vmem>>, vector<16x16x144xbf16>
    %185 = vector.shape_cast %184 : vector<16x16x144xbf16> to vector<256x144xbf16>
    %c0_294 = arith.constant 0 : index
    %c0_295 = arith.constant 0 : index
    %186 = vector.load %arg5[%c0_294, %c0_295] : memref<144x128xbf16, #tpu.memory_space<vmem>>, vector<144x128xbf16>
    %cst_296 = arith.constant dense<0.000000e+00> : vector<256x128xf32>
    %187 = tpu.matmul %185, %186, %cst_296 {dimension_numbers = #tpu.dot_dimension_numbers<[1], [0], [0], [1], [0, 0, 1, 1], [], []>} : vector<256x144xbf16>, vector<144x128xbf16>, vector<256x128xf32> -> vector<256x128xf32>
    %c3 = arith.constant 3 : index
    %c0_297 = arith.constant 0 : index
    %188 = vector.load %arg8[%c3, %c0_297] : memref<6x128xf32, #tpu.memory_space<vmem>>, vector<1x128xf32>
    %189 = vector.shape_cast %188 : vector<1x128xf32> to vector<128xf32>
    %190 = vector.shape_cast %189 : vector<128xf32> to vector<1x128xf32>
    %c3_298 = arith.constant 3 : index
    %c0_299 = arith.constant 0 : index
    %191 = vector.load %arg9[%c3_298, %c0_299] : memref<6x128xf32, #tpu.memory_space<vmem>>, vector<1x128xf32>
    %192 = vector.shape_cast %191 : vector<1x128xf32> to vector<128xf32>
    %193 = vector.shape_cast %192 : vector<128xf32> to vector<1x128xf32>
    %194 = vector.broadcast %190 : vector<1x128xf32> to vector<256x128xf32>
    %195 = arith.mulf %187, %194 : vector<256x128xf32>
    %196 = vector.broadcast %193 : vector<1x128xf32> to vector<256x128xf32>
    %197 = arith.addf %195, %196 : vector<256x128xf32>
    %cst_300 = arith.constant 0.000000e+00 : f32
    %198 = vector.broadcast %cst_300 : f32 to vector<256x128xf32>
    %199 = arith.maximumf %197, %198 : vector<256x128xf32>
    %200 = arith.truncf %199 : vector<256x128xf32> to vector<256x128xbf16>
    %c3_301 = arith.constant 3 : index
    %c0_302 = arith.constant 0 : index
    %c0_303 = arith.constant 0 : index
    %201 = vector.load %arg7[%c3_301, %c0_302, %c0_303] : memref<5x128x128xbf16, #tpu.memory_space<vmem>>, vector<1x128x128xbf16>
    %202 = vector.shape_cast %201 : vector<1x128x128xbf16> to vector<128x128xbf16>
    %cst_304 = arith.constant dense<0.000000e+00> : vector<256x128xf32>
    %203 = tpu.matmul %200, %202, %cst_304 {dimension_numbers = #tpu.dot_dimension_numbers<[1], [0], [0], [1], [0, 0, 1, 1], [], []>} : vector<256x128xbf16>, vector<128x128xbf16>, vector<256x128xf32> -> vector<256x128xf32>
    %204 = arith.addf %164, %203 : vector<256x128xf32>
    %205 = arith.extf %2 : vector<256x16xbf16> to vector<256x16xf32>
    %cst_305 = arith.constant dense<0.000000e+00> : vector<16xf32>
    %206 = vector.multi_reduction <add>, %205, %cst_305 [0] : vector<256x16xf32> to vector<16xf32>
    %207 = vector.shape_cast %206 : vector<16xf32> to vector<1x16xf32>
    %cst_306 = arith.constant 2.560000e+02 : f32
    %208 = vector.broadcast %cst_306 : f32 to vector<1x16xf32>
    %209 = arith.divf %207, %208 : vector<1x16xf32>
    %210 = arith.truncf %209 : vector<1x16xf32> to vector<1x16xbf16>
    %c0_307 = arith.constant 0 : index
    %c0_308 = arith.constant 0 : index
    %211 = vector.load %arg6[%c0_307, %c0_308] : memref<16x128xbf16, #tpu.memory_space<vmem>>, vector<16x128xbf16>
    %cst_309 = arith.constant dense<0.000000e+00> : vector<1x128xf32>
    %212 = tpu.matmul %210, %211, %cst_309 {dimension_numbers = #tpu.dot_dimension_numbers<[1], [0], [0], [1], [0, 0, 1, 1], [], []>} : vector<1x16xbf16>, vector<16x128xbf16>, vector<1x128xf32> -> vector<1x128xf32>
    %c4_310 = arith.constant 4 : index
    %c0_311 = arith.constant 0 : index
    %213 = vector.load %arg8[%c4_310, %c0_311] : memref<6x128xf32, #tpu.memory_space<vmem>>, vector<1x128xf32>
    %214 = vector.shape_cast %213 : vector<1x128xf32> to vector<128xf32>
    %215 = vector.shape_cast %214 : vector<128xf32> to vector<1x128xf32>
    %c4_312 = arith.constant 4 : index
    %c0_313 = arith.constant 0 : index
    %216 = vector.load %arg9[%c4_312, %c0_313] : memref<6x128xf32, #tpu.memory_space<vmem>>, vector<1x128xf32>
    %217 = vector.shape_cast %216 : vector<1x128xf32> to vector<128xf32>
    %218 = vector.shape_cast %217 : vector<128xf32> to vector<1x128xf32>
    %219 = arith.mulf %212, %215 : vector<1x128xf32>
    %220 = arith.addf %219, %218 : vector<1x128xf32>
    %cst_314 = arith.constant 0.000000e+00 : f32
    %221 = vector.broadcast %cst_314 : f32 to vector<1x128xf32>
    %222 = arith.maximumf %220, %221 : vector<1x128xf32>
    %223 = arith.truncf %222 : vector<1x128xf32> to vector<1x128xbf16>
    %c4_315 = arith.constant 4 : index
    %c0_316 = arith.constant 0 : index
    %c0_317 = arith.constant 0 : index
    %224 = vector.load %arg7[%c4_315, %c0_316, %c0_317] : memref<5x128x128xbf16, #tpu.memory_space<vmem>>, vector<1x128x128xbf16>
    %225 = vector.shape_cast %224 : vector<1x128x128xbf16> to vector<128x128xbf16>
    %cst_318 = arith.constant dense<0.000000e+00> : vector<1x128xf32>
    %226 = tpu.matmul %223, %225, %cst_318 {dimension_numbers = #tpu.dot_dimension_numbers<[1], [0], [0], [1], [0, 0, 1, 1], [], []>} : vector<1x128xbf16>, vector<128x128xbf16>, vector<1x128xf32> -> vector<1x128xf32>
    %227 = vector.broadcast %226 : vector<1x128xf32> to vector<256x128xf32>
    %228 = arith.addf %204, %227 : vector<256x128xf32>
    %c5 = arith.constant 5 : index
    %c0_319 = arith.constant 0 : index
    %229 = vector.load %arg8[%c5, %c0_319] : memref<6x128xf32, #tpu.memory_space<vmem>>, vector<1x128xf32>
    %230 = vector.shape_cast %229 : vector<1x128xf32> to vector<128xf32>
    %231 = vector.shape_cast %230 : vector<128xf32> to vector<1x128xf32>
    %c5_320 = arith.constant 5 : index
    %c0_321 = arith.constant 0 : index
    %232 = vector.load %arg9[%c5_320, %c0_321] : memref<6x128xf32, #tpu.memory_space<vmem>>, vector<1x128xf32>
    %233 = vector.shape_cast %232 : vector<1x128xf32> to vector<128xf32>
    %234 = vector.shape_cast %233 : vector<128xf32> to vector<1x128xf32>
    %235 = vector.broadcast %231 : vector<1x128xf32> to vector<256x128xf32>
    %236 = arith.mulf %228, %235 : vector<256x128xf32>
    %237 = vector.broadcast %234 : vector<1x128xf32> to vector<256x128xf32>
    %238 = arith.addf %236, %237 : vector<256x128xf32>
    %cst_322 = arith.constant 0.000000e+00 : f32
    %239 = vector.broadcast %cst_322 : f32 to vector<256x128xf32>
    %240 = arith.maximumf %238, %239 : vector<256x128xf32>
    %241 = vector.shape_cast %240 : vector<256x128xf32> to vector<16x16x128xf32>
    %c0_323 = arith.constant 0 : index
    %c0_324 = arith.constant 0 : index
    %c0_325 = arith.constant 0 : index
    %c0_326 = arith.constant 0 : index
    %242 = vector.load %arg10[%c0_323, %c0_324, %c0_325, %c0_326] : memref<1x16x16x128xf32, #tpu.memory_space<vmem>>, vector<1x16x16x128xf32>
    %243 = vector.shape_cast %242 : vector<1x16x16x128xf32> to vector<16x16x128xf32>
    %244 = vector.shape_cast %241 : vector<16x16x128xf32> to vector<1x16x16x128xf32>
    tpu.vector_store %arg10[%c0_323, %c0_324, %c0_325, %c0_326], %244 {strides = array<i32>} : memref<1x16x16x128xf32, #tpu.memory_space<vmem>>, vector<1x16x16x128xf32>,
    return
  }
  func.func @transform_0(%arg0: i32) -> (i32, i32, i32, i32) {
    %c0_i32 = arith.constant 0 : i32
    %c0_i32_0 = arith.constant 0 : i32
    %c0_i32_1 = arith.constant 0 : i32
    %c0_i32_2 = arith.constant 0 : i32
    return %arg0, %c0_i32, %c0_i32_0, %c0_i32_1 : i32, i32, i32, i32
  }
  func.func @transform_1(%arg0: i32) -> (i32, i32) {
    %c0_i32 = arith.constant 0 : i32
    %c0_i32_0 = arith.constant 0 : i32
    %c0_i32_1 = arith.constant 0 : i32
    return %c0_i32, %c0_i32_0 : i32, i32
  }
  func.func @transform_2(%arg0: i32) -> (i32, i32) {
    %c0_i32 = arith.constant 0 : i32
    %c0_i32_0 = arith.constant 0 : i32
    %c0_i32_1 = arith.constant 0 : i32
    return %c0_i32, %c0_i32_0 : i32, i32
  }
  func.func @transform_3(%arg0: i32) -> (i32, i32) {
    %c0_i32 = arith.constant 0 : i32
    %c0_i32_0 = arith.constant 0 : i32
    %c0_i32_1 = arith.constant 0 : i32
    return %c0_i32, %c0_i32_0 : i32, i32
  }
  func.func @transform_4(%arg0: i32) -> (i32, i32) {
    %c0_i32 = arith.constant 0 : i32
    %c0_i32_0 = arith.constant 0 : i32
    %c0_i32_1 = arith.constant 0 : i32
    return %c0_i32, %c0_i32_0 : i32, i32
  }
  func.func @transform_5(%arg0: i32) -> (i32, i32) {
    %c0_i32 = arith.constant 0 : i32
    %c0_i32_0 = arith.constant 0 : i32
    %c0_i32_1 = arith.constant 0 : i32
    return %c0_i32, %c0_i32_0 : i32, i32
  }
  func.func @transform_6(%arg0: i32) -> (i32, i32, i32) {
    %c0_i32 = arith.constant 0 : i32
    %c0_i32_0 = arith.constant 0 : i32
    %c0_i32_1 = arith.constant 0 : i32
    %c0_i32_2 = arith.constant 0 : i32
    return %c0_i32, %c0_i32_0, %c0_i32_1 : i32, i32, i32
  }
  func.func @transform_7(%arg0: i32) -> (i32, i32) {
    %c0_i32 = arith.constant 0 : i32
    %c0_i32_0 = arith.constant 0 : i32
    %c0_i32_1 = arith.constant 0 : i32
    return %c0_i32, %c0_i32_0 : i32, i32
  }
  func.func @transform_8(%arg0: i32) -> (i32, i32) {
    %c0_i32 = arith.constant 0 : i32
    %c0_i32_0 = arith.constant 0 : i32
    %c0_i32_1 = arith.constant 0 : i32
    return %c0_i32, %c0_i32_0 : i32, i32
  }
  func.func @transform_9(%arg0: i32) -> (i32, i32, i32, i32) {
    %c0_i32 = arith.constant 0 : i32
    %c0_i32_0 = arith.constant 0 : i32
    %c0_i32_1 = arith.constant 0 : i32
    %c0_i32_2 = arith.constant 0 : i32
    return %arg0, %c0_i32, %c0_i32_0, %c0_i32_1 : i32, i32, i32, i32
  }
}

</mosaic_0001>

<bundles_post_ra>
// kernel: tpu_custom_call.1
= control target key start
LH: loop header
LB: loop body
LE: loop exit
PB: predicated region body
PF: predicated region fallthrough
CT: control target
= control target key end

     0   :  { %s9925_s0 = inlined_call_operand.hbm [shape: bf16[2,16,16,16], index: 0, kind: input, shape index: {}]   ;;  %s9926_s1 = inlined_call_operand.hbm [shape: bf16[16,128], index: 1, kind: input, shape index: {}]   ;;  %s9927_s2 = inlined_call_operand.hbm [shape: bf16[144,128], index: 2, kind: input, shape index: {}]   ;;  %s9928_s3 = inlined_call_operand.hbm [shape: bf16[144,128], index: 3, kind: input, shape index: {}]   ;;  %s9929_s4 = inlined_call_operand.hbm [shape: bf16[144,128], index: 4, kind: input, shape index: {}]   ;;  %s9930_s5 = inlined_call_operand.vmem [shape: bf16[16,128], index: 5, kind: input, shape index: {}]   ;;  %s9931_s6 = inlined_call_operand.hbm [shape: bf16[5,128,128], index: 6, kind: input, shape index: {}]   ;;  %s9932_s7 = inlined_call_operand.vmem [shape: f32[6,128], index: 7, kind: input, shape index: {}]   ;;  %s9933_s8 = inlined_call_operand.vmem [shape: f32[6,128], index: 8, kind: input, shape index: {}]   ;;  %s9934_s9 = inlined_call_operand.hbm [shape: f32[2,16,16,128], index: 9, kind: output, shape index: {}]  }
   0x1   :  { %9940 = sst [smem:[#allocation20_spill]] %s9926_s1 }
   0x2   :  { %9941 = sst [smem:[#allocation21_spill]] %s9934_s9 }
   0x3   :  { %14 = vsyncpa [#allocation4], 0 }
   0x4   :  { %16 = vsyncpa [#allocation4 + $0x1], 0 }
   0x5   :  { %17 = vsyncpa [#allocation7], 0 }
   0x6   :  { %18 = vsyncpa [#allocation10], 0 }
   0x7   :  { %19 = vsyncpa [#allocation13], 0 }
   0x8   :  { %20 = vsyncpa [#allocation5], 0 }
   0x9   :  { %22 = vsyncpa [#allocation5 + $0x1], 0  ;;  %s7744_s30 = smov 0   ;;  %s7746_s10 = smov 0  }
   0xa   :  { %s7748_s11 = smov 0   ;;  %s7750_s12 = smov 0  }
   0xb LB: > { %s7673_s13 = smov [#allocation6]   ;;  %s7765_s15 = sadd.s32 4294967295, %s7671_s12   ;;  %s7671_s12 = sphi %s7750_s12, %s9966_s12   ;;  %s7667_s11 = sphi %s7748_s11, %s9965_s11   ;;  %s7663_s10 = sphi %s7746_s10, %s9964_s10   ;;  %s7659_s30 = sphi %s7744_s30, %s9963_s30  }
   0xc   : > { %s265_s14 = sshll.u32 %s7673_s13, 4  ;;  %p6084_p0 = scmp.ge.s32.totalorder %s7671_s12, 1  ;;  %s7770_s14 = int_to_ptr.vmem [resolvable:$true] %s265_s14 }
   0xd   : > { %p9936_p1 = scmp.eq.s32.totalorder %s7765_s15, 0  ;;  %p253_p2 = scmp.lt.s32.totalorder %s7671_s12, 3 }
   0xe   : > { %s7674_s17 = smov [#allocation9]   ;;  %s7675_s20 = smov [#allocation8]  }
   0xf   : > { %p7772_p3 = pnand %p6084_p0, %p253_p2  ;;  %s291_s18 = sshll.u32 %s7674_s17, 4  ;;  %s7785_s18 = int_to_ptr.vmem [resolvable:$true] %s291_s18 }
  0x10   : > { %s278_s21 = sshll.u32 %s7675_s20, 4  ;;  %s9944_s1 = sld [smem:[#allocation20_spill]]  ;;  %s7787_s21 = int_to_ptr.vmem [resolvable:$true] %s278_s21 }
  0x11   : > { %s9942_s16 = scalar_select %p7772_p3, 1, 0 }
  0x12   : > { %p7037_p5 = pneg %p7772_p3 }
  0x14   : > { %p7781_p6 = pnand %p7037_p5, %p9936_p1 }
  0x16   : > { %s7423_s24 = scalar_lea.hbm %s9944_s1, 128  ;;  %p7797_p8 = pneg %p7781_p6 }
  0x17   : > { %p7424_p7 = scmp.ne.s32.totalorder %s9944_s1, %s7423_s24  ;;  %p7430_p11 = scmp.lt.u32.totalorder %s7423_s24, %s9944_s1 }
  0x19   : > { %p7426_p9 = pnand %p7797_p8, %p7424_p7 }
  0x1b   : > { %p7427_p10 = pneg %p7426_p9 }
  0x1d   : > { %p7432_p12 = pnand %p7430_p11, %p7427_p10 }
  0x1f   : > { %7435 = shalt.err (!%p7432_p12)
}
  0x20   : > { %s7436_s13 = scalar_lea.vmem %s7770_s14, 128  ;;  %p7444_p5 = scmp.lt.s32.totalorder %s7770_s14, %s7770_s14 }
  0x21   : > { %p7437_p13 = scmp.ne.s32.totalorder %s7770_s14, %s7436_s13  ;;  %p7445_p4 = scmp.lt.s32.totalorder %s7436_s13, %s7436_s13 }
  0x23   : > { %p7439_p0 = pnand %p7437_p13, %p7797_p8  ;;  %p7446_p7 = por %p7445_p4, %p7444_p5 }
  0x25   : > { %p7440_p2 = pneg %p7439_p0 }
  0x27   : > { %p7447_p9 = pnand %p7446_p7, %p7440_p2 }
  0x29   : > { %7450 = shalt.err (!%p7447_p9)
}
  0x2a   : > { %s9938_s17 = smov 64   ;;  %s7677_s20 = smov 4  }
  0x2b   : > { %7040 = dma.hbm_to_vmem [thread:$0]  (!%p7781_p6), %s9944_s1, 128, %s7770_s14, [#allocation7], %s9938_s17, %s9938_s17, %s7677_s20  }
  0x2c   : > { %s7451_s26 = scalar_lea.hbm %s9928_s3, 1152 }
  0x2d   : > { %p7452_p4 = scmp.ne.s32.totalorder %s9928_s3, %s7451_s26  ;;  %p7458_p12 = scmp.lt.u32.totalorder %s7451_s26, %s9928_s3 }
  0x2f   : > { %p7454_p10 = pnand %p7452_p4, %p7797_p8 }
  0x31   : > { %p7455_p11 = pneg %p7454_p10 }
  0x33   : > { %p7460_p13 = pnand %p7458_p12, %p7455_p11 }
  0x35   : > { %7463 = shalt.err (!%p7460_p13)
}
  0x36   : > { %s7464_s14 = scalar_lea.vmem %s7785_s18, 1152  ;;  %p7472_p7 = scmp.lt.s32.totalorder %s7785_s18, %s7785_s18 }
  0x37   : > { %p7465_p0 = scmp.ne.s32.totalorder %s7785_s18, %s7464_s14  ;;  %p7473_p9 = scmp.lt.s32.totalorder %s7464_s14, %s7464_s14 }
  0x39   : > { %p7467_p2 = pnand %p7465_p0, %p7797_p8  ;;  %p7474_p4 = por %p7473_p9, %p7472_p7 }
  0x3b   : > { %p7468_p5 = pneg %p7467_p2 }
  0x3d   : > { %p7475_p10 = pnand %p7474_p4, %p7468_p5 }
  0x3f   : > { %7478 = shalt.err (!%p7475_p10)
}
  0x40   : > { %7046 = dma.hbm_to_vmem [thread:$0]  (!%p7781_p6), %s9928_s3, 1152, %s7785_s18, [#allocation10], %s9938_s17, %s9938_s17, %s7677_s20  }
  0x41   : > { %s7479_s25 = scalar_lea.hbm %s9927_s2, 1152 }
  0x42   : > { %p7480_p11 = scmp.ne.s32.totalorder %s9927_s2, %s7479_s25  ;;  %p7486_p0 = scmp.lt.u32.totalorder %s7479_s25, %s9927_s2 }
  0x44   : > { %p7482_p12 = pnand %p7480_p11, %p7797_p8 }
  0x46   : > { %p7483_p13 = pneg %p7482_p12 }
  0x48   : > { %p7488_p2 = pnand %p7486_p0, %p7483_p13 }
  0x4a   : > { %7491 = shalt.err (!%p7488_p2)
}
  0x4b   : > { %s7492_s18 = scalar_lea.vmem %s7787_s21, 1152  ;;  %p7500_p4 = scmp.lt.s32.totalorder %s7787_s21, %s7787_s21 }
  0x4c   : > { %p7493_p5 = scmp.ne.s32.totalorder %s7787_s21, %s7492_s18  ;;  %p7501_p10 = scmp.lt.s32.totalorder %s7492_s18, %s7492_s18 }
  0x4e   : > { %p7495_p7 = pnand %p7493_p5, %p7797_p8  ;;  %p7502_p11 = por %p7501_p10, %p7500_p4 }
  0x50   : > { %p7496_p9 = pneg %p7495_p7 }
  0x52   : > { %p7503_p12 = pnand %p7502_p11, %p7496_p9 }
  0x54   : > { %7506 = shalt.err (!%p7503_p12)
}
  0x55   : > { %7043 = dma.hbm_to_vmem [thread:$0]  (!%p7781_p6), %s9927_s2, 1152, %s7787_s21, [#allocation7], %s9938_s17, %s9938_s17, %s7677_s20  }
  0x56   : > { %s7678_s22 = smov [#allocation11]   ;;  %s7679_s24 = smov [#allocation12]  }
  0x57   : > { %s304_s23 = sshll.u32 %s7678_s22, 4  ;;  %s320_s25 = sshll.u32 %s7679_s24, 4  ;;  %s305_s23 = int_to_ptr.vmem [resolvable:$true] %s304_s23  ;;  %s321_s25 = int_to_ptr.vmem [resolvable:$true] %s320_s25 }
  0x58   : > { %s7507_s29 = scalar_lea.hbm %s9929_s4, 1152 }
  0x59   : > { %p7508_p13 = scmp.ne.s32.totalorder %s9929_s4, %s7507_s29  ;;  %p7514_p5 = scmp.lt.u32.totalorder %s7507_s29, %s9929_s4 }
  0x5b   : > { %p7510_p0 = pnand %p7508_p13, %p7797_p8 }
  0x5d   : > { %p7511_p2 = pneg %p7510_p0 }
  0x5f   : > { %p7516_p7 = pnand %p7514_p5, %p7511_p2 }
  0x61   : > { %7519 = shalt.err (!%p7516_p7)
}
  0x62   : > { %s7520_s21 = scalar_lea.vmem %s305_s23, 1152  ;;  %p7528_p11 = scmp.lt.s32.totalorder %s305_s23, %s305_s23 }
  0x63   : > { %p7521_p9 = scmp.ne.s32.totalorder %s305_s23, %s7520_s21  ;;  %p7529_p12 = scmp.lt.s32.totalorder %s7520_s21, %s7520_s21 }
  0x65   : > { %p7523_p4 = pnand %p7521_p9, %p7797_p8  ;;  %p7530_p1 = por %p7529_p12, %p7528_p11 }
  0x67   : > { %p7524_p10 = pneg %p7523_p4 }
  0x69   : > { %p7531_p3 = pnand %p7530_p1, %p7524_p10 }
  0x6b   : > { %7534 = shalt.err (!%p7531_p3)
}
  0x6c   : > { %7049 = dma.hbm_to_vmem [thread:$0]  (!%p7781_p6), %s9929_s4, 1152, %s305_s23, [#allocation10], %s9938_s17, %s9938_s17, %s7677_s20  }
  0x6d   : > { %s7535_s26 = scalar_lea.hbm %s9931_s6, 5120 }
  0x6e   : > { %p7536_p1 = scmp.ne.s32.totalorder %s9931_s6, %s7535_s26  ;;  %p7542_p0 = scmp.lt.u32.totalorder %s7535_s26, %s9931_s6 }
  0x70   : > { %p7538_p3 = pnand %p7536_p1, %p7797_p8 }
  0x72   : > { %p7539_p13 = pneg %p7538_p3 }
  0x74   : > { %p7544_p2 = pnand %p7542_p0, %p7539_p13 }
  0x76   : > { %7547 = shalt.err (!%p7544_p2)
}
  0x77   : > { %s7548_s14 = scalar_lea.vmem %s321_s25, 5120  ;;  %p7556_p4 = scmp.lt.s32.totalorder %s321_s25, %s321_s25 }
  0x78   : > { %p7549_p5 = scmp.ne.s32.totalorder %s321_s25, %s7548_s14  ;;  %p7557_p10 = scmp.lt.s32.totalorder %s7548_s14, %s7548_s14 }
  0x7a   : > { %p7551_p7 = pnand %p7549_p5, %p7797_p8  ;;  %p7558_p11 = por %p7557_p10, %p7556_p4 }
  0x7c   : > { %p7552_p9 = pneg %p7551_p7 }
  0x7e   : > { %p7559_p12 = pnand %p7558_p11, %p7552_p9 }
  0x80   : > { %7562 = shalt.err (!%p7559_p12)
}
  0x81   : > { %7052 = dma.hbm_to_vmem [thread:$0]  (!%p7781_p6), %s9931_s6, 5120, %s321_s25, [#allocation13], %s9938_s17, %s9938_s17, %s7677_s20  }
  0x82   : > { %s6083_s19 = sadd.s32 4294967294, %s7671_s12   ;;  %s7917_s27 = sadd.s32 1, %s7671_s12  }
  0x83   : > { %s35_s1 = sadd.s32 1, %s7667_s11  ;;  %s32_s9 = ssub.s32 %s7671_s12, %s7917_s27 }
  0x84   : > { %p42_p8 = scmp.ne.s32.totalorder %s7667_s11, %s7663_s10  ;;  %p33_p1 = scmp.eq.s32.totalorder %s32_s9, 0 }
  0x85   : > { %p43_p3 = scmp.eq.s32.totalorder %s7671_s12, 0  ;;  %p48_p13 = scmp.ne.s32.totalorder %s7663_s10, %s7659_s30 }
  0x86   : > { %p240_p0 = scmp.eq.s32.totalorder %s7765_s15, 1  ;;  %p9946_p5 = scmp.eq.s32.totalorder %s7765_s15, 0 }
  0x87   : > { %s7929_s22 = scalar_select %p33_p1, %s7667_s11, %s35_s1  }
  0x88   : > { %p44_p2 = por %p43_p3, %p42_p8  ;;  %p7933_p7 = por %p9946_p5, %p48_p13 }
  0x89   : > { %p7937_p6 = por %p240_p0, %p42_p8  ;;  %p246_p9 = scmp.eq.s32.totalorder %s6083_s19, 1 }
  0x8a   : > { %p7066_p4 = scmp.lt.s32.totalorder %s7671_s12, 2  ;;  %s340_s26 = sand.u32 1, %s7667_s11  }
  0x8b   : > { %s9948_s25 = scalar_select %p7937_p6, 1, 0 }
  0x8c   : > { %p7943_p10 = por %p246_p9, %p48_p13  ;;  %s6091_s29 = sshll.u32 %s340_s26, 7 }
  0x8d   : > { %s6539_s13 = sshll.u32 %s7671_s12, 11  ;;  %s344_s21 = scalar_lea.vmem [#allocation3], %s6091_s29 }
  0x8e   : > { %s9949_s28 = scalar_select %p7943_p10, 1, 0 }
  0x8f   : > { %s7951_s23 = scalar_lea.hbm %s9925_s0, %s6539_s13  ;;  %s351_s1 = sshll.u32 %s344_s21, 4  ;;  %s7957_s1 = int_to_ptr.vmem [resolvable:$true] %s351_s1 }
  0x90   : > { %p7953_p11 = pnand %p7066_p4, %p44_p2  ;;  %s7959_s9 = scalar_lea.sflag [#allocation4], %s340_s26 }
  0x91   : > { %s7563_s17 = scalar_lea.hbm %s7951_s23, 2048  ;;  %s7568_s18 = scalar_lea.hbm %s9925_s0, 4096 }
  0x92   : > { %p7564_p12 = scmp.ne.s32.totalorder %s7951_s23, %s7563_s17  ;;  %p7565_p8 = pneg %p7953_p11 }
  0x93   : > { %p7569_p13 = scmp.lt.u32.totalorder %s7951_s23, %s9925_s0  ;;  %p7570_p0 = scmp.lt.u32.totalorder %s7568_s18, %s7563_s17 }
  0x94   : > { %p7566_p1 = pnand %p7565_p8, %p7564_p12  ;;  %p7572_p5 = scmp.lt.u32.totalorder %s7563_s17, %s7951_s23 }
  0x95   : > { %p7571_p2 = por %p7570_p0, %p7569_p13 }
  0x96   : > { %p7567_p3 = pneg %p7566_p1 }
  0x97   : > { %p7573_p9 = por %p7572_p5, %p7571_p2 }
  0x99   : > { %p7574_p4 = pnand %p7573_p9, %p7567_p3 }
  0x9b   : > { %7577 = shalt.err (!%p7574_p4)
}
  0x9c   : > { %s7578_s26 = scalar_lea.vmem %s7957_s1, 2048  ;;  %s7680_s29 = smov [#allocation3]  }
  0x9d   : > { %p7579_p12 = scmp.ne.s32.totalorder %s7957_s1, %s7578_s26  ;;  %s7583_s13 = sshll.u32 %s7680_s29, 4  ;;  %s7584_s13 = int_to_ptr.vmem [resolvable:$false] %s7583_s13 }
  0x9e   : > { %s7585_s14 = scalar_lea.vmem %s7584_s13, 4096  ;;  %p7586_p6 = scmp.lt.s32.totalorder %s7957_s1, %s7584_s13 }
  0x9f   : > { %p7581_p1 = pnand %p7579_p12, %p7565_p8  ;;  %p7587_p13 = scmp.lt.s32.totalorder %s7585_s14, %s7578_s26 }
  0xa1   : > { %p7582_p10 = pneg %p7581_p1  ;;  %p7588_p0 = por %p7587_p13, %p7586_p6 }
  0xa3   : > { %p7589_p2 = pnand %p7588_p0, %p7582_p10 }
  0xa5   : > { %7592 = shalt.err (!%p7589_p2)
}
  0xa6   : > { %s9951_s17 = smov 64   ;;  %p9952_p8 = scmp.ne.s32.totalorder %s9942_s16, 0 }
  0xa7   : > { %7056 = dma.hbm_to_vmem [thread:$0]  (!%p7953_p11), %s7951_s23, 2048, %s7957_s1, %s7959_s9, %s9951_s17, %s9951_s17, %s7677_s20  }
  0xa8   : > { %363 = sbr.rel (%p9952_p8) target bundleno = 1660 (0x67c), region = 56  ;;  %s7993_s18 = sand.u32 (!%p9952_p8), 1, %s7663_s10  }
  0xa9   : > { %s6095_s21 = sshll.u32 (!%p9952_p8), %s7993_s18, 7  ;;  %s366_s26 = scalar_lea.sflag (!%p9952_p8), [#allocation4], %s7993_s18 }
  0xaa   : > { %s7997_s29 = scalar_lea.vmem (!%p9952_p8), [#allocation3], %s6095_s21 }
  0xaf   : > { %7638 = dma.done.wait (%p7933_p7), %s366_s26, 2048  }
  0xb0   : > { %7640 = vsyncadd (%p7933_p7), %s366_s26, 4294965248  ;;  %p9953_p6 = scmp.eq.s32.totalorder %s7765_s15, 0 }
  0xb2   : > { %7642 = dma.done.wait (%p9953_p6), [#allocation7], 1280   ;;  %p9954_p10 = pmov %p9953_p6 }
  0xb3   : > { %p9955_p11 = pmov %p9953_p6 }
  0xb4   : > { %7644 = vsyncadd (%p9954_p10), [#allocation7], 4294966016 }
  0xb5   : > { %7646 = dma.done.wait (%p9955_p11), [#allocation10], 2304   ;;  %p9956_p3 = pmov %p9953_p6 }
  0xb7   : > { %7648 = vsyncadd (%p9956_p3), [#allocation10], 4294964992  ;;  %p9957_p5 = pmov %p9956_p3 }
  0xb8   : > { %p9958_p9 = pmov %p9956_p3 }
  0xb9   : > { %7650 = dma.done.wait (%p9957_p5), [#allocation13], 5120  }
  0xba   : > { %7652 = vsyncadd (%p9958_p9), [#allocation13], 4294962176  ;;  %v7681_v0 = vmov 0   ;;  %vm545_vm0 = vcmask 130048   ;;  %vm1012_vm1 = vcmask 261248   ;;  %vm1129_vm2 = vcmask 392448  }
  0xbb   : > { %2393 = vmatprep.subr.bf16.mxu1 %v7681_v0  ;;  %vm1268_vm3 = vcmask 518528   ;;  %894 = vst.msk [vmem:[#allocation2 + $0x10] sm:$0xff] %vm545_vm0, %v7681_v0  ;;  %893 = vst.msk [vmem:[#allocation2] sm:$0xff] %vm545_vm0, %v7681_v0  ;;  %v7124_v1 = vld [vmem:[%s7997_s29] sm:$0xff]   ;;  %s7682_s16 = smov 64   ;;  %v7126_v3 = vld [vmem:[%s7997_s29 + $0x30] sm:$0xff]  }
  0xbc   : > { %895 = vst.msk [vmem:[#allocation2 + $0x20] sm:$0xff] %vm545_vm0, %v7681_v0  ;;  %896 = vst.msk [vmem:[#allocation2 + $0x30] sm:$0xff] %vm545_vm0, %v7681_v0  ;;  %v7125_v2 = vld [vmem:[%s7997_s29] sm:$0xf8]   ;;  %1590 = vrot.lane.b32.xlu0 %v7124_v1, %s7682_s16  ;;  %v7127_v5 = vld [vmem:[%s7997_s29 + $0x30] sm:$0x1f]  }
  0xbd   : > { %897 = vst.msk [vmem:[#allocation2 + $0x40] sm:$0xff] %vm545_vm0, %v7681_v0  ;;  %898 = vst.msk [vmem:[#allocation2 + $0x50] sm:$0xff] %vm545_vm0, %v7681_v0  ;;  %v1784_v4 = vrot.slane %v7125_v2, 3  ;;  %s7683_s20 = smov 80   ;;  %v7129_v6 = vld [vmem:[%s7997_s29 + $0x8] sm:$0x1f]  }
  0xbe   : > { %2123 = vst.msk [vmem:[#allocation2 + $0xa8] sm:$0xff] %vm545_vm0, %v7681_v0  ;;  %2124 = vst.msk [vmem:[#allocation2 + $0xb8] sm:$0xff] %vm545_vm0, %v7681_v0  ;;  %s7684_s24 = smov 112   ;;  %v1955_v7 = vrot.slane %v7127_v5, 5  ;;  %v7128_v8 = vld [vmem:[%s7997_s29 + $0x8] sm:$0xff]   ;;  %s7685_s23 = smov 96  }
  0xbf   : > { %2125 = vst.msk [vmem:[#allocation2 + $0xc8] sm:$0xff] %vm545_vm0, %v7681_v0  ;;  %2126 = vst.msk [vmem:[#allocation2 + $0xd8] sm:$0xff] %vm545_vm0, %v7681_v0  ;;  %1800 = vrot.lane.b32.xlu1 %v1784_v4, %s7683_s20  ;;  %v7130_v9 = vld [vmem:[%s7997_s29] sm:$0x1f]   ;;  %v7131_v10 = vld [vmem:[%s7997_s29 + $0x8] sm:$0xf8]  }
  0xc0   : > { %2127 = vst.msk [vmem:[#allocation2 + $0xe8] sm:$0xff] %vm545_vm0, %v7681_v0  ;;  %2128 = vst.msk [vmem:[#allocation2 + $0xf8] sm:$0xff] %vm545_vm0, %v7681_v0  ;;  %2083 = vrot.lane.b32.xlu0 %v7126_v3, %s7684_s24  ;;  %v1398_v11 = vrot.slane %v7129_v6, 5  ;;  %v1397_v12 = vrot.slane %v7130_v9, 5  ;;  %v7132_v13 = vld [vmem:[%s7997_s29 + $0x38] sm:$0x1f]  }
  0xc1   : > { %1014 = vst.msk [vmem:[#allocation2 + $0x10] sm:$0xff] %vm1012_vm1, %v7681_v0  ;;  %1013 = vst.msk [vmem:[#allocation2] sm:$0xff] %vm1012_vm1, %v7681_v0  ;;  %v1785_v14 = vrot.slane %v7131_v10, 3  ;;  %s7686_s1 = smov 48   ;;  %v7134_v15 = vld [vmem:[%s7997_s29 + $0x10] sm:$0x1f]  }
  0xc2   : > { %1015 = vst.msk [vmem:[#allocation2 + $0x20] sm:$0xff] %vm1012_vm1, %v7681_v0  ;;  %1016 = vst.msk [vmem:[#allocation2 + $0x30] sm:$0xff] %vm1012_vm1, %v7681_v0  ;;  %v1956_v16 = vrot.slane %v7132_v13, 5  ;;  %v7133_v17 = vld [vmem:[%s7997_s29 + $0x38] sm:$0xff]   ;;  %v1399_v18 = vrot.slane %v7134_v15, 5  ;;  %v7135_v21 = vld [vmem:[%s7997_s29 + $0x10] sm:$0xff]  }
  0xc3   : > { %1017 = vst.msk [vmem:[#allocation2 + $0x40] sm:$0xff] %vm1012_vm1, %v7681_v0  ;;  %1018 = vst.msk [vmem:[#allocation2 + $0x50] sm:$0xff] %vm1012_vm1, %v7681_v0  ;;  %1965 = vrot.lane.b32.xlu1 %v1955_v7, %s7685_s23  ;;  %v7136_v19 = vld [vmem:[%s7997_s29 + $0x10] sm:$0xf8]   ;;  %v7137_v20 = vld [vmem:[%s7997_s29 + $0x40] sm:$0x1f]  }
  0xc4   : > { %1131 = vst.msk [vmem:[#allocation2 + $0x10] sm:$0xff] %vm1129_vm2, %v7681_v0  ;;  %1130 = vst.msk [vmem:[#allocation2] sm:$0xff] %vm1129_vm2, %v7681_v0  ;;  %1592 = vrot.lane.b32.xlu0 %v7128_v8, %s7682_s16  ;;  %v1786_v22 = vrot.slane %v7136_v19, 3  ;;  %v1957_v23 = vrot.slane %v7137_v20, 5  ;;  %v7139_v24 = vld [vmem:[%s7997_s29 + $0x18] sm:$0x1f]  }
  0xc5   : > { %1132 = vst.msk [vmem:[#allocation2 + $0x20] sm:$0xff] %vm1129_vm2, %v7681_v0  ;;  %1133 = vst.msk [vmem:[#allocation2 + $0x30] sm:$0xff] %vm1129_vm2, %v7681_v0  ;;  %v7138_v25 = vld [vmem:[%s7997_s29 + $0x40] sm:$0xff]   ;;  %v7141_v26 = vld [vmem:[%s7997_s29 + $0x18] sm:$0xf8]   ;;  %v1400_v27 = vrot.slane %v7139_v24, 5 }
  0xc6   : > { %1134 = vst.msk [vmem:[#allocation2 + $0x40] sm:$0xff] %vm1129_vm2, %v7681_v0  ;;  %1135 = vst.msk [vmem:[#allocation2 + $0x50] sm:$0xff] %vm1129_vm2, %v7681_v0  ;;  %v7140_v28 = vld [vmem:[%s7997_s29 + $0x18] sm:$0xff]   ;;  %v7142_v29 = vld [vmem:[%s7997_s29 + $0x48] sm:$0x1f]   ;;  %v1787_v30 = vrot.slane %v7141_v26, 3 }
  0xc7   : > { %1270 = vst.msk [vmem:[#allocation2 + $0x10] sm:$0x7] %vm1268_vm3, %v7681_v0  ;;  %1269 = vst.msk [vmem:[#allocation2] sm:$0x7] %vm1268_vm3, %v7681_v0  ;;  %1415 = vrot.lane.b32.xlu1 %v1398_v11, %s7686_s1  ;;  %v7144_v31 = vld [vmem:[%s7997_s29 + $0x20] sm:$0x1f]  }
  0xc8   : > { %1271 = vst.msk [vmem:[#allocation2 + $0x20] sm:$0x7] %vm1268_vm3, %v7681_v0  ;;  %1272 = vst.msk [vmem:[#allocation2 + $0x30] sm:$0x7] %vm1268_vm3, %v7681_v0  ;;  %1413 = vrot.lane.b32.xlu0 %v1397_v12, %s7686_s1  ;;  %v1958_v32 = vrot.slane %v7142_v29, 5  ;;  %v7143_v33 = vld [vmem:[%s7997_s29 + $0x48] sm:$0xff]  }
  0xc9   : > { %1273 = vst.msk [vmem:[#allocation2 + $0x40] sm:$0x7] %vm1268_vm3, %v7681_v0  ;;  %1274 = vst.msk [vmem:[#allocation2 + $0x50] sm:$0x7] %vm1268_vm3, %v7681_v0  ;;  %v1401_v34 = vrot.slane %v7144_v31, 5  ;;  %v7145_v36 = vld [vmem:[%s7997_s29 + $0x20] sm:$0xff]  }
  0xca   : > { %v7146_v35 = vld [vmem:[%s7997_s29 + $0x20] sm:$0xf8]   ;;  %v7176_v37 = vld [vmem:[#allocation8] sm:$0xff]   ;;  %v7147_v38 = vld [vmem:[%s7997_s29 + $0x50] sm:$0x1f]   ;;  %s7687_s19 = smov 16  }
  0xcb   : > { %1802 = vrot.lane.b32.xlu1 %v1785_v14, %s7683_s20  ;;  %2394 = vmatpush1.bf16.msra.mxu1 %v7176_v37  ;;  %v7179_v39 = vld [vmem:[#allocation8 + $0x8] sm:$0xff]   ;;  %v1788_v40 = vrot.slane %v7146_v35, 3  ;;  %v7149_v41 = vld [vmem:[%s7997_s29 + $0x28] sm:$0x1f]   ;;  %v1959_v42 = vrot.slane %v7147_v38, 5  ;;  %v7182_v43 = vld [vmem:[#allocation8 + $0x10] sm:$0xff]  }
  0xcc   : > { %1967 = vrot.lane.b32.xlu0 %v1956_v16, %s7685_s23  ;;  %2395 = vmatprep.subr.bf16.mxu1 %v7681_v0  ;;  %v7148_v44 = vld [vmem:[%s7997_s29 + $0x50] sm:$0xff]   ;;  %v7150_v45 = vld [vmem:[%s7997_s29 + $0x28] sm:$0xff]   ;;  %v1402_v47 = vrot.slane %v7149_v41, 5  ;;  %v7185_v48 = vld [vmem:[#allocation8 + $0x18] sm:$0xff]   ;;  %s7688_s9 = smov 32   ;;  %vm2129_vm4 = vcmask 130053  }
  0xcd   : > { %v7151_v46 = vld [vmem:[%s7997_s29 + $0x28] sm:$0xf8]   ;;  %v7152_v49 = vld [vmem:[%s7997_s29 + $0x58] sm:$0x1f]   ;;  %v7154_v54 = vld [vmem:[%s7997_s29] sm:$0xff]   ;;  %vm2230_vm5 = vcmask 126976  }
  0xce   : > { %v1789_v50 = vrot.slane %v7151_v46, 3  ;;  %v7188_v51 = vld [vmem:[#allocation8 + $0x20] sm:$0xff]   ;;  %v1960_v52 = vrot.slane %v7152_v49, 5  ;;  %v7153_v53 = vld [vmem:[%s7997_s29 + $0x58] sm:$0xff]   ;;  %v7155_v55 = vld [vmem:[%s7997_s29] sm:$0xf8]  }
  0xcf   : > { %2085 = vrot.lane.b32.xlu1 %v7133_v17, %s7684_s24  ;;  %2396 = vmatpush1.bf16.msra.mxu1 %v7179_v39  ;;  %v7191_v56 = vld [vmem:[#allocation8 + $0x28] sm:$0xff]   ;;  %v1217_v58 = vrot.slane %v7155_v55, 3  ;;  %v7159_v62 = vld [vmem:[%s7997_s29 + $0x60] sm:$0x1f]   ;;  %v7194_v3 = vld [vmem:[#allocation8 + $0x30] sm:$0xff]   ;;  %vm3856_vm6 = vcmask 126978  }
  0xd0   : > { %1417 = vrot.lane.b32.xlu0 %v1399_v18, %s7686_s1  ;;  %2397 = vmatprep.subr.bf16.mxu1 %v7681_v0  ;;  %v7156_v57 = vld [vmem:[%s7997_s29 + $0x30] sm:$0x1f]   ;;  %v1961_v1 = vrot.slane %v7159_v62, 5  ;;  %v7160_v2 = vld [vmem:[%s7997_s29 + $0x60] sm:$0xff]   ;;  %v7162_v4 = vld [vmem:[%s7997_s29 + $0x8] sm:$0xf8]  }
  0xd1   : > { %v1403_v59 = vrot.slane %v7156_v57, 5  ;;  %v7158_v60 = vld [vmem:[%s7997_s29 + $0x30] sm:$0xf8]   ;;  %v7197_v5 = vld [vmem:[#allocation8 + $0x38] sm:$0xff]   ;;  %v7163_v6 = vld [vmem:[%s7997_s29 + $0x38] sm:$0x1f]  }
  0xd2   : > { %v7157_v61 = vld [vmem:[%s7997_s29 + $0x30] sm:$0xff]   ;;  %v1790_v63 = vrot.slane %v7158_v60, 3  ;;  %v7161_v7 = vld [vmem:[%s7997_s29 + $0x8] sm:$0xff]   ;;  %v1218_v8 = vrot.slane %v7162_v4, 3  ;;  %v7165_v9 = vld [vmem:[%s7997_s29 + $0x38] sm:$0xf8]  }
  0xd3   : > { %1594 = vrot.lane.b32.xlu1 %v7135_v21, %s7682_s16  ;;  %2398 = vmatpush1.bf16.msra.mxu1 %v7182_v43  ;;  %v1404_v10 = vrot.slane %v7163_v6, 5  ;;  %v7164_v11 = vld [vmem:[%s7997_s29 + $0x38] sm:$0xff]   ;;  %v7200_v12 = vld [vmem:[#allocation8 + $0x40] sm:$0xff]   ;;  %2130 = vst.msk [vmem:[#allocation2 + $0x8] sm:$0xe0] %vm2129_vm4, %v7681_v0  ;;  %v1791_v15 = vrot.slane %v7165_v9, 3 }
  0xd4   : > { %1804 = vrot.lane.b32.xlu0 %v1786_v22, %s7683_s20  ;;  %2399 = vmatprep.subr.bf16.mxu1 %v7681_v0  ;;  %v7166_v13 = vld [vmem:[%s7997_s29 + $0x68] sm:$0x1f]   ;;  %v7202_v14 = vld [vmem:[%s7997_s29 + $0x30] sm:$0xf8]   ;;  %2131 = vst.msk [vmem:[#allocation2 + $0x18] sm:$0xe0] %vm2129_vm4, %v7681_v0 }
  0xd5   : > { %2132 = vst.msk [vmem:[#allocation2 + $0x28] sm:$0xe0] %vm2129_vm4, %v7681_v0  ;;  %2133 = vst.msk [vmem:[#allocation2 + $0x38] sm:$0xe0] %vm2129_vm4, %v7681_v0  ;;  %v1962_v16 = vrot.slane %v7166_v13, 5  ;;  %v2210_v17 = vrot.slane %v7202_v14, 3 }
  0xd6   : > { %2134 = vst.msk [vmem:[#allocation2 + $0x48] sm:$0xe0] %vm2129_vm4, %v7681_v0  ;;  %2135 = vst.msk [vmem:[#allocation2 + $0x58] sm:$0xe0] %vm2129_vm4, %v7681_v0  ;;  %v7169_v19 = vld [vmem:[%s7997_s29 + $0x10] sm:$0xf8]  }
  0xd7   : > { %1969 = vrot.lane.b32.xlu1 %v1957_v23, %s7685_s23  ;;  %2400 = vmatpush1.bf16.msra.mxu1 %v7185_v48  ;;  %2136 = vst.msk [vmem:[#allocation2 + $0x68] sm:$0xe0] %vm2129_vm4, %v7681_v0  ;;  %2137 = vst.msk [vmem:[#allocation2 + $0x78] sm:$0xe0] %vm2129_vm4, %v7681_v0  ;;  %v7167_v20 = vld [vmem:[%s7997_s29 + $0x68] sm:$0xff]   ;;  %v7168_v21 = vld [vmem:[%s7997_s29 + $0x10] sm:$0xff]  }
  0xd8   : > { %2087 = vrot.lane.b32.xlu0 %v7138_v25, %s7684_s24  ;;  %2401 = vmatprep.subr.bf16.mxu1 %v7681_v0  ;;  %2138 = vst.msk [vmem:[#allocation2 + $0x88] sm:$0xe0] %vm2129_vm4, %v7681_v0  ;;  %2139 = vst.msk [vmem:[#allocation2 + $0x98] sm:$0xe0] %vm2129_vm4, %v7681_v0  ;;  %v7170_v22 = vld [vmem:[%s7997_s29 + $0x40] sm:$0x1f]  }
  0xd9   : > { %v7203_v18 = vld [vmem:[%s7997_s29 + $0x64] ss:$0 sps:$4 sm:$0xcc]   ;;  %2231 = vst.msk [vmem:[#allocation2 + $0x8] sm:$0x1f] %vm2230_vm5, %v2210_v17  ;;  %v1219_v23 = vrot.slane %v7169_v19, 3 }
  0xda   : > { %v3877_v24 = vrot.slane %v7203_v18, 2  ;;  %v7209_v25 = vld [vmem:[%s7997_s29 + $0x38] sm:$0xf8]   ;;  %v7172_v26 = vld [vmem:[%s7997_s29 + $0x40] sm:$0xf8]   ;;  %vm3885_vm7 = vcmask 123904  }
  0xdb   : > { %1419 = vrot.lane.b32.xlu1 %v1400_v27, %s7686_s1  ;;  %2402 = vmatpush1.bf16.msra.mxu1 %v7188_v51  ;;  %v1405_v27 = vrot.slane %v7170_v22, 5  ;;  %v7173_v31 = vld [vmem:[%s7997_s29 + $0x70] sm:$0x1f]   ;;  %vm900_vm8 = vcmask 124928   ;;  %v7177_v39 = vld [vmem:[%s7997_s29 + $0x18] sm:$0xf8]  }
  0xdc   : > { %1596 = vrot.lane.b32.xlu0 %v7140_v28, %s7682_s16  ;;  %2403 = vmatprep.subr.bf16.mxu1 %v7681_v0  ;;  %v2211_v28 = vrot.slane %v7209_v25, 3  ;;  %901 = vst.msk [vmem:[#allocation2 + $0x60] sm:$0x7] %vm900_vm8, %v7681_v0  ;;  %902 = vst.msk [vmem:[#allocation2 + $0x70] sm:$0x7] %vm900_vm8, %v7681_v0  ;;  %v7174_v35 = vld [vmem:[%s7997_s29 + $0x70] sm:$0xff]  }
  0xdd   : > { %903 = vst.msk [vmem:[#allocation2 + $0x80] sm:$0x7] %vm900_vm8, %v7681_v0  ;;  %904 = vst.msk [vmem:[#allocation2 + $0x90] sm:$0x7] %vm900_vm8, %v7681_v0  ;;  %v1963_v37 = vrot.slane %v7173_v31, 5  ;;  %v7180_v48 = vld [vmem:[%s7997_s29 + $0x48] sm:$0xff]  }
  0xde   : > { %2232 = vst.msk [vmem:[#allocation2 + $0x18] sm:$0x1f] %vm2230_vm5, %v2211_v28  ;;  %v7216_v41 = vld [vmem:[%s7997_s29 + $0x74] ss:$0 sps:$4 sm:$0xcc]   ;;  %vm1001_vm9 = vcmask 130051  }
  0xdf   : > { %1806 = vrot.lane.b32.xlu1 %v1787_v30, %s7683_s20  ;;  %2404 = vmatpush1.bf16.msra.mxu1 %v7191_v56  ;;  %v7210_v30 = vld [vmem:[%s7997_s29 + $0x6c] ss:$0 sps:$4 sm:$0xcc]   ;;  %905 = vst.msk [vmem:[#allocation2 + $0xa0] sm:$0x7] %vm900_vm8, %v7681_v0  ;;  %vm1461_vm10 = vcmask 523651  }
  0xe0   : > { %1971 = vrot.lane.b32.xlu0 %v1958_v32, %s7685_s23  ;;  %2405 = vmatprep.subr.bf16.mxu1 %v7681_v0  ;;  %v2242_v29 = vld [vmem:[#allocation2 + $0x8] sm:$0xff]  ;;  %v7171_v32 = vld [vmem:[%s7997_s29 + $0x40] sm:$0xff]   ;;  %906 = vst.msk [vmem:[#allocation2 + $0xb0] sm:$0x7] %vm900_vm8, %v7681_v0  ;;  %907 = vst.msk [vmem:[#allocation2 + $0xc0] sm:$0x7] %vm900_vm8, %v7681_v0 }
  0xe1   : > { %6314 = vmatprep.mubr.msk.bf16.mxu1 %vm545_vm0, %v2242_v29  ;;  %3857 = vst.msk [vmem:[#allocation2 + $0x8] sm:$0x1c] %vm3856_vm6, %v7681_v0  ;;  %v7178_v43 = vld [vmem:[%s7997_s29 + $0x48] sm:$0x1f]   ;;  %v7183_v49 = vld [vmem:[%s7997_s29 + $0x78] sm:$0x1f]  }
  0xe2   : > { %3886 = vst.msk [vmem:[#allocation2 + $0x8] sm:$0x3] %vm3885_vm7, %v3877_v24  ;;  %v7181_v46 = vld [vmem:[%s7997_s29 + $0x48] sm:$0xf8]   ;;  %v1406_v51 = vrot.slane %v7178_v43, 5  ;;  %v1964_v55 = vrot.slane %v7183_v49, 5 }
  0xe3   : > { %2089 = vrot.lane.b32.xlu1 %v7143_v33, %s7684_s24  ;;  %2406 = vmatpush1.bf16.msra.mxu1 %v7194_v3  ;;  %v1792_v33 = vrot.slane %v7172_v26, 3  ;;  %908 = vst.msk [vmem:[#allocation2 + $0xd0] sm:$0x7] %vm900_vm8, %v7681_v0  ;;  %909 = vst.msk [vmem:[#allocation2 + $0xe0] sm:$0x7] %vm900_vm8, %v7681_v0  ;;  %vm1638_vm11 = vcmask 654848  }
  0xe4   : > { %1421 = vrot.lane.b32.xlu0 %v1401_v34, %s7686_s1  ;;  %2407 = vmatprep.subr.bf16.mxu1 %v7681_v0  ;;  %910 = vst.msk [vmem:[#allocation2 + $0xf0] sm:$0x7] %vm900_vm8, %v7681_v0  ;;  %v7215_v34 = vld [vmem:[%s7997_s29 + $0x40] sm:$0xf8]   ;;  %v7227_v57 = vld [vmem:[%s7997_s29 + $0x50] sm:$0xf8]  }
  0xe5   : > { %v2212_v38 = vrot.slane %v7215_v34, 3  ;;  %v7189_v60 = vld [vmem:[%s7997_s29 + $0x50] sm:$0x1f]   ;;  %v7231_v3 = vld [vmem:[%s7997_s29 + $0x58] sm:$0xf8]   ;;  %vm1655_vm12 = vcmask 786053  }
  0xe6   : > { %v7232_v6 = vld [vmem:[%s7997_s29 + $0x8] sm:$0x1f]   ;;  %v7233_v9 = vld [vmem:[%s7997_s29 + $0x60] sm:$0xf8]   ;;  %v7190_v13 = vld [vmem:[%s7997_s29 + $0x50] sm:$0xff]   ;;  %vm1848_vm13 = vcmask 782976  }
  0xe7   : > { %1598 = vrot.lane.b32.xlu1 %v7145_v36, %s7682_s16  ;;  %2408 = vmatpush1.bf16.msra.mxu1 %v7197_v5  ;;  %v3878_v36 = vrot.slane %v7210_v30, 2  ;;  %2233 = vst.msk [vmem:[#allocation2 + $0x28] sm:$0x1f] %vm2230_vm5, %v2212_v38  ;;  %v7192_v5 = vld [vmem:[%s7997_s29 + $0x50] sm:$0xf8]   ;;  %vm1873_vm14 = vcmask 912128  }
  0xe8   : > { %1808 = vrot.lane.b32.xlu0 %v1788_v40, %s7683_s20  ;;  %2409 = vmatprep.subr.bf16.mxu1 %v7681_v0  ;;  %v8216_v40 = vld [vmem:[#allocation2 + $0x18] sm:$0xff]  ;;  %v7195_v14 = vld [vmem:[%s7997_s29 + $0x28] sm:$0xf8]   ;;  %v1794_v22 = vrot.slane %v7192_v5, 3  ;;  %v7237_v28 = vld [vmem:[%s7997_s29 + $0x70] sm:$0xf8]  }
  0xe9   : > { %3858 = vst.msk [vmem:[#allocation2 + $0x18] sm:$0x1c] %vm3856_vm6, %v7681_v0  ;;  %v7235_v18 = vld [vmem:[%s7997_s29 + $0x68] sm:$0xf8]   ;;  %v7196_v26 = vld [vmem:[%s7997_s29 + $0x58] sm:$0x1f]  }
  0xea   : > { %3887 = vst.msk [vmem:[#allocation2 + $0x18] sm:$0x3] %vm3885_vm7, %v3878_v36  ;;  %v7193_v25 = vld [vmem:[%s7997_s29 + $0x28] sm:$0xff]   ;;  %v7238_v30 = vld [vmem:[%s7997_s29 + $0x20] sm:$0x1f]   ;;  %v1222_v31 = vrot.slane %v7195_v14, 3 }
  0xeb   : > { %1973 = vrot.lane.b32.xlu1 %v1959_v42, %s7685_s23  ;;  %2410 = vmatpush1.bf16.msra.mxu1 %v7200_v12  ;;  %v7175_v42 = vld [vmem:[%s7997_s29 + $0x18] sm:$0xff]   ;;  %v985_v36 = vrot.slane %v7238_v30, 5  ;;  %vm1995_vm15 = vcmask 917251   ;;  %vm2006_vm2 = vcmask 1048448   ;;  %vm3250_vm4 = vcmask 521603   ;;  %p9960_p4 = scmp.ne.s32.totalorder %s9948_s25, 0 }
  0xec   : > { %2091 = vrot.lane.b32.xlu0 %v7148_v44, %s7684_s24  ;;  %v1220_v44 = vrot.slane %v7177_v39, 3  ;;  %v7239_v34 = vld [vmem:[%s7997_s29 + $0x78] sm:$0xf8]   ;;  %v7240_v39 = vld [vmem:[%s7997_s29 + $0x28] sm:$0x1f]   ;;  %vm1866_vm8 = vcmask 917248  }
  0xed   : > { %v2219_v38 = vrot.slane %v7239_v34, 3  ;;  %1006 = vst.msk [vmem:[#allocation2 + $0xa0] sm:$0xf8] %vm1001_vm9, %v985_v36  ;;  %v7208_v14 = vld [vmem:[%s7997_s29 + $0x38] sm:$0xff]   ;;  %s7691_s17 = smov [#allocation14]  }
  0xee   : > { %s7597_s21 = sshll.u32 %s7691_s17, 4  ;;  %s7598_s21 = int_to_ptr.vmem [resolvable:$false] %s7597_s21 }
  0xef   : > { %1423 = vrot.lane.b32.xlu1 %v1402_v47, %s7686_s1  ;;  %v3879_v47 = vrot.slane %v7216_v41, 2  ;;  %2240 = vst.msk [vmem:[#allocation2 + $0x98] sm:$0x1f] %vm2230_vm5, %v2219_v38  ;;  %v7220_v38 = vld [vmem:[%s7997_s29 + $0x70] sm:$0xff]   ;;  %s7599_s26 = scalar_lea.vmem %s7598_s21, 8192 }
  0xf0   : > { %1600 = vrot.lane.b32.xlu0 %v7150_v45, %s7682_s16  ;;  %v7221_v45 = vld [vmem:[%s7997_s29 + $0x48] sm:$0xf8]  }
  0xf3   : > { %1810 = vrot.lane.b32.xlu1 %v1789_v50, %s7683_s20  ;;  %v2213_v50 = vrot.slane %v7221_v45, 3  ;;  %v1408_v45 = vrot.slane %v7196_v26, 5 }
  0xf4   : > { %1975 = vrot.lane.b32.xlu0 %v1960_v52, %s7685_s23  ;;  %v7222_v52 = vld [vmem:[%s7997_s29 + $0x7c] ss:$0 sps:$4 sm:$0xcc]  }
  0xf5   : > { %2234 = vst.msk [vmem:[#allocation2 + $0x38] sm:$0x1f] %vm2230_vm5, %v2213_v50  ;;  %v3880_v56 = vrot.slane %v7222_v52, 2 }
  0xf7   : > { %2093 = vrot.lane.b32.xlu1 %v7153_v53, %s7684_s24  ;;  %v8234_v53 = vld [vmem:[#allocation2 + $0x28] sm:$0xff] }
  0xf8   : > { %1089 = vrot.lane.b32.xlu0 %v7154_v54, %s7687_s19  ;;  %3859 = vst.msk [vmem:[#allocation2 + $0x28] sm:$0x1c] %vm3856_vm6, %v7681_v0  ;;  %v1793_v54 = vrot.slane %v7181_v46, 3  ;;  %v986_v46 = vrot.slane %v7240_v39, 5 }
  0xf9   : > { %3888 = vst.msk [vmem:[#allocation2 + $0x28] sm:$0x3] %vm3885_vm7, %v3879_v47  ;;  %v7198_v47 = vld [vmem:[%s7997_s29 + $0x58] sm:$0xff]  }
  0xfa   : > { %1007 = vst.msk [vmem:[#allocation2 + $0xb0] sm:$0xf8] %vm1001_vm9, %v986_v46 }
  0xfb   : > { %1227 = vrot.lane.b32.xlu1 %v1217_v58, %s7688_s9  ;;  %v7187_v58 = vld [vmem:[%s7997_s29 + $0x20] sm:$0xf8]  }
  0xfc   : > { %1425 = vrot.lane.b32.xlu0 %v1403_v59, %s7686_s1  ;;  %v7184_v59 = vld [vmem:[%s7997_s29 + $0x78] sm:$0xff]  }
  0xfd   : > { %v8247_v62 = vld [vmem:[#allocation2 + $0x38] sm:$0xff] }
  0xfe   : > { %3860 = vst.msk [vmem:[#allocation2 + $0x38] sm:$0x1c] %vm3856_vm6, %v7681_v0  ;;  %vm1257_vm6 = vcmask 389376  }
  0xff   : > { %1602 = vrot.lane.b32.xlu1 %v7157_v61, %s7682_s16  ;;  %v2214_v61 = vrot.slane %v7227_v57, 3  ;;  %3889 = vst.msk [vmem:[#allocation2 + $0x38] sm:$0x3] %vm3885_vm7, %v3880_v56  ;;  %v7201_v56 = vld [vmem:[%s7997_s29 + $0x30] sm:$0xff]  }
 0x100   : > { %1812 = vrot.lane.b32.xlu0 %v1790_v63, %s7683_s20  ;;  %v7230_v63 = vld [vmem:[%s7997_s29] sm:$0x1f]  }
 0x101   : > { %2235 = vst.msk [vmem:[#allocation2 + $0x48] sm:$0x1f] %vm2230_vm5, %v2214_v61  ;;  %v7207_v61 = vld [vmem:[%s7997_s29 + $0x60] sm:$0xf8]  }
 0x103   : > { %1977 = vrot.lane.b32.xlu1 %v1961_v1, %s7685_s23  ;;  %v7186_v1 = vld [vmem:[%s7997_s29 + $0x20] sm:$0xff]  }
 0x104   : > { %2095 = vrot.lane.b32.xlu0 %v7160_v2, %s7684_s24  ;;  %v981_v2 = vrot.slane %v7230_v63, 5 }
 0x106   : > { %1002 = vst.msk [vmem:[#allocation2 + $0x60] sm:$0xf8] %vm1001_vm9, %v981_v2  ;;  %v8352_v2 = vld [vmem:[#allocation2 + $0x98] sm:$0xff] }
 0x107   : > { %1091 = vrot.lane.b32.xlu1 %v7161_v7, %s7687_s19  ;;  %v1221_v7 = vrot.slane %v7187_v58, 3  ;;  %3855 = vst.msk [vmem:[#allocation2 + $0x98] sm:$0x1f] %vm2230_vm5, %v7681_v0 }
 0x108   : > { %1229 = vrot.lane.b32.xlu0 %v1218_v8, %s7688_s9  ;;  %v2215_v8 = vrot.slane %v7231_v3, 3  ;;  %v8276_v19 = vld [vmem:[#allocation2 + $0x48] sm:$0xff] }
 0x109   : > { %3850 = vst.msk [vmem:[#allocation2 + $0x48] sm:$0x1f] %vm2230_vm5, %v7681_v0 }
 0x10a   : > { %2236 = vst.msk [vmem:[#allocation2 + $0x58] sm:$0x1f] %vm2230_vm5, %v2215_v8  ;;  %v7211_v8 = vld [vmem:[%s7997_s29 + $0x38] sm:$0xf8]  }
 0x10b   : > { %1427 = vrot.lane.b32.xlu1 %v1404_v10, %s7686_s1  ;;  %v1407_v10 = vrot.slane %v7189_v60, 5 }
 0x10c   : > { %1604 = vrot.lane.b32.xlu0 %v7164_v11, %s7682_s16  ;;  %v982_v11 = vrot.slane %v7232_v6, 5 }
 0x10e   : > { %1003 = vst.msk [vmem:[#allocation2 + $0x70] sm:$0xf8] %vm1001_vm9, %v982_v11 }
 0x10f   : > { %1814 = vrot.lane.b32.xlu1 %v1791_v15, %s7683_s20  ;;  %v2216_v15 = vrot.slane %v7233_v9, 3  ;;  %v7212_v9 = vld [vmem:[%s7997_s29 + $0x68] sm:$0x1f]  }
 0x110   : > { %1979 = vrot.lane.b32.xlu0 %v1962_v16, %s7685_s23  ;;  %v7234_v16 = vld [vmem:[%s7997_s29 + $0x10] sm:$0x1f]  }
 0x111   : > { %2237 = vst.msk [vmem:[#allocation2 + $0x68] sm:$0x1f] %vm2230_vm5, %v2216_v15 }
 0x113   : > { %2097 = vrot.lane.b32.xlu1 %v7167_v20, %s7684_s24  ;;  %v983_v20 = vrot.slane %v7234_v16, 5  ;;  %v1410_v16 = vrot.slane %v7212_v9, 5 }
 0x114   : > { %1093 = vrot.lane.b32.xlu0 %v7168_v21, %s7687_s19  ;;  %v7236_v21 = vld [vmem:[%s7997_s29 + $0x18] sm:$0x1f]  }
 0x115   : > { %1004 = vst.msk [vmem:[#allocation2 + $0x80] sm:$0xf8] %vm1001_vm9, %v983_v20  ;;  %v7213_v20 = vld [vmem:[%s7997_s29 + $0x68] sm:$0xff]  }
 0x117   : > { %1231 = vrot.lane.b32.xlu1 %v1219_v23, %s7688_s9  ;;  %v2217_v23 = vrot.slane %v7235_v18, 3 }
 0x118   : > { %1429 = vrot.lane.b32.xlu0 %v1405_v27, %s7686_s1  ;;  %v984_v27 = vrot.slane %v7236_v21, 5  ;;  %v8304_v43 = vld [vmem:[#allocation2 + $0x68] sm:$0xff] }
 0x119   : > { %2238 = vst.msk [vmem:[#allocation2 + $0x78] sm:$0x1f] %vm2230_vm5, %v2217_v23  ;;  %3852 = vst.msk [vmem:[#allocation2 + $0x68] sm:$0x1f] %vm2230_vm5, %v7681_v0  ;;  %v7214_v21 = vld [vmem:[%s7997_s29 + $0x68] sm:$0xf8]  }
 0x11a   : > { %1005 = vst.msk [vmem:[#allocation2 + $0x90] sm:$0xf8] %vm1001_vm9, %v984_v27  ;;  %v1797_v30 = vrot.slane %v7214_v21, 3 }
 0x11b   : > { %1606 = vrot.lane.b32.xlu1 %v7171_v32, %s7682_s16  ;;  %v8291_v32 = vld [vmem:[%s7997_s29 + $0x58] sm:$0xf8]  }
 0x11c   : > { %1816 = vrot.lane.b32.xlu0 %v1792_v33, %s7683_s20  ;;  %v2218_v33 = vrot.slane %v7237_v28, 3  ;;  %v7217_v28 = vld [vmem:[%s7997_s29 + $0x40] sm:$0xff]  }
 0x11e   : > { %2239 = vst.msk [vmem:[#allocation2 + $0x88] sm:$0x1f] %vm2230_vm5, %v2218_v33 }
 0x11f   : > { %1981 = vrot.lane.b32.xlu1 %v1963_v37, %s7685_s23 }
 0x120   : > { %2099 = vrot.lane.b32.xlu0 %v7174_v35, %s7684_s24  ;;  %v8296_v35 = vld [vmem:[#allocation2 + $0x58] sm:$0xff] }
 0x121   : > { %3851 = vst.msk [vmem:[#allocation2 + $0x58] sm:$0x1f] %vm2230_vm5, %v7681_v0  ;;  %v8326_v52 = vld [vmem:[#allocation2 + $0x78] sm:$0xff] }
 0x122   : > { %3853 = vst.msk [vmem:[#allocation2 + $0x78] sm:$0x1f] %vm2230_vm5, %v7681_v0 }
 0x123   : > { %1095 = vrot.lane.b32.xlu1 %v7175_v42, %s7687_s19  ;;  %v7204_v42 = vld [vmem:[%s7997_s29 + $0x30] sm:$0xf8]  }
 0x124   : > { %1233 = vrot.lane.b32.xlu0 %v1220_v44, %s7688_s9  ;;  %v7241_v44 = vld [vmem:[%s7997_s29 + $0x30] sm:$0x1f]   ;;  %v1223_v58 = vrot.slane %v7204_v42, 3  ;;  %v7226_v42 = vld [vmem:[%s7997_s29 + $0x78] sm:$0x1f]  }
 0x125   : > { %v987_v49 = vrot.slane %v7241_v44, 5 }
 0x127   : > { %1431 = vrot.lane.b32.xlu1 %v1406_v51, %s7686_s1  ;;  %v1795_v51 = vrot.slane %v8291_v32, 3  ;;  %1008 = vst.msk [vmem:[#allocation2 + $0xc0] sm:$0xf8] %vm1001_vm9, %v987_v49 }
 0x128   : > { %1608 = vrot.lane.b32.xlu0 %v7180_v48, %s7682_s16  ;;  %v7205_v48 = vld [vmem:[%s7997_s29 + $0x60] sm:$0x1f]  }
 0x12b   : > { %1818 = vrot.lane.b32.xlu1 %v1793_v54, %s7683_s20  ;;  %v7242_v54 = vld [vmem:[%s7997_s29 + $0x38] sm:$0x1f]  }
 0x12c   : > { %1983 = vrot.lane.b32.xlu0 %v1964_v55, %s7685_s23  ;;  %v988_v57 = vrot.slane %v7242_v54, 5  ;;  %v7229_v54 = vld [vmem:[%s7997_s29 + $0x78] sm:$0xf8]  }
 0x12e   : > { %v8257_v4 = vpop.permute.xlu0 %1590  ;;  %1009 = vst.msk [vmem:[#allocation2 + $0xd0] sm:$0xf8] %vm1001_vm9, %v988_v57  ;;  %v1799_v57 = vrot.slane %v7229_v54, 3 }
 0x12f   : > { %2101 = vrot.lane.b32.xlu1 %v7184_v59, %s7684_s24  ;;  %v8345_v59 = vld [vmem:[#allocation2 + $0x88] sm:$0xff] }
 0x130   : > { %1097 = vrot.lane.b32.xlu0 %v7186_v1, %s7687_s19  ;;  %3854 = vst.msk [vmem:[#allocation2 + $0x88] sm:$0x1f] %vm2230_vm5, %v7681_v0  ;;  %v1409_v1 = vrot.slane %v7205_v48, 5  ;;  %v1412_v48 = vrot.slane %v7226_v42, 5  ;;  %vm1136_vm5 = vcmask 392453  }
 0x131   : > { %v8265_v12 = vpop.permute.xlu1 %1800 }
 0x132   : > { %v8271_v17 = vpop.permute.xlu0 %2083 }
 0x133   : > { %1235 = vrot.lane.b32.xlu1 %v1221_v7, %s7688_s9  ;;  %v1796_v7 = vrot.slane %v7207_v61, 3 }
 0x134   : > { %1433 = vrot.lane.b32.xlu0 %v1407_v10, %s7686_s1  ;;  %v7243_v10 = vld [vmem:[%s7997_s29 + $0x40] sm:$0x1f]  }
 0x135   : > { %v1966_v24 = vpop.permute.xlu1 %1965  ;;  %v989_v15 = vrot.slane %v7243_v10, 5 }
 0x136   : > { %v1593_v29 = vpop.permute.xlu0 %1592 }
 0x137   : > { %1610 = vrot.lane.b32.xlu1 %v7190_v13, %s7682_s16  ;;  %1010 = vst.msk [vmem:[#allocation2 + $0xe0] sm:$0xf8] %vm1001_vm9, %v989_v15 }
 0x138   : > { %1820 = vrot.lane.b32.xlu0 %v1794_v22, %s7683_s20  ;;  %v7218_v22 = vld [vmem:[%s7997_s29 + $0x40] sm:$0xf8]  }
 0x139   : > { %v1416_v37 = vpop.permute.xlu1 %1415  ;;  %v1225_v32 = vrot.slane %v7218_v22, 3 }
 0x13a   : > { %1463 = vst.msk [vmem:[#allocation2 + $0x10] sm:$0xf8] %vm1461_vm10, %v1416_v37  ;;  %v1414_v41 = vpop.permute.xlu0 %1413 }
 0x13b   : > { %1462 = vst.msk [vmem:[#allocation2] sm:$0xf8] %vm1461_vm10, %v1414_v41  ;;  %1099 = vrot.lane.b32.xlu1 %v7193_v25, %s7687_s19  ;;  %v7246_v25 = vld [vmem:[%s7997_s29 + $0x48] sm:$0x1f]  }
 0x13c   : > { %1640 = vst.msk [vmem:[#allocation2 + $0x10] sm:$0xff] %vm1638_vm11, %v1593_v29  ;;  %1639 = vst.msk [vmem:[#allocation2] sm:$0xff] %vm1638_vm11, %v8257_v4  ;;  %1237 = vrot.lane.b32.xlu0 %v1222_v31, %s7688_s9  ;;  %v7206_v4 = vld [vmem:[%s7997_s29 + $0x60] sm:$0xff]   ;;  %v7223_v29 = vld [vmem:[%s7997_s29 + $0x70] sm:$0xf8]  }
 0x13d   : > { %1657 = vst.msk [vmem:[#allocation2 + $0x10] sm:$0xe0] %vm1655_vm12, %v7681_v0  ;;  %1656 = vst.msk [vmem:[#allocation2] sm:$0xe0] %vm1655_vm12, %v7681_v0  ;;  %v1803_v50 = vpop.permute.xlu1 %1802  ;;  %v1798_v36 = vrot.slane %v7223_v29, 3 }
 0x13e   : > { %1849 = vst.msk [vmem:[#allocation2] sm:$0x1f] %vm1848_vm13, %v8265_v12  ;;  %1850 = vst.msk [vmem:[#allocation2 + $0x10] sm:$0x1f] %vm1848_vm13, %v1803_v50  ;;  %v1968_v55 = vpop.permute.xlu0 %1967  ;;  %v7225_v41 = vld [vmem:[%s7997_s29 + $0x48] sm:$0xf8]  }
 0x13f   : > { %1874 = vst.msk [vmem:[#allocation2] sm:$0x7] %vm1873_vm14, %v7681_v0  ;;  %1875 = vst.msk [vmem:[#allocation2 + $0x10] sm:$0x7] %vm1873_vm14, %v7681_v0  ;;  %1435 = vrot.lane.b32.xlu1 %v1408_v45, %s7686_s1  ;;  %v7224_v45 = vld [vmem:[%s7997_s29 + $0x48] sm:$0xff]  }
 0x140   : > { %1996 = vst.msk [vmem:[#allocation2] sm:$0xf8] %vm1995_vm15, %v1966_v24  ;;  %1997 = vst.msk [vmem:[#allocation2 + $0x10] sm:$0xf8] %vm1995_vm15, %v1968_v55  ;;  %1612 = vrot.lane.b32.xlu0 %v7198_v47, %s7682_s16  ;;  %v7219_v24 = vld [vmem:[%s7997_s29 + $0x70] sm:$0x1f]  }
 0x141   : > { %2113 = vst.msk [vmem:[#allocation2] sm:$0xff] %vm2006_vm2, %v8271_v17  ;;  %v2086_v60 = vpop.permute.xlu1 %2085  ;;  %v1411_v34 = vrot.slane %v7219_v24, 5  ;;  %v1226_v47 = vrot.slane %v7225_v41, 3 }
 0x142   : > { %2114 = vst.msk [vmem:[#allocation2 + $0x10] sm:$0xff] %vm2006_vm2, %v2086_v60  ;;  %v1418_v63 = vpop.permute.xlu0 %1417  ;;  %v7250_v60 = vld [vmem:[#allocation12 + $0x48] sm:$0xff]  }
 0x143   : > { %1464 = vst.msk [vmem:[#allocation2 + $0x20] sm:$0xf8] %vm1461_vm10, %v1418_v63  ;;  %1822 = vrot.lane.b32.xlu1 %v1795_v51, %s7683_s20  ;;  %v7228_v51 = vld [vmem:[%s7997_s29 + $0x78] sm:$0xff]  }
 0x144   : > { %1101 = vrot.lane.b32.xlu0 %v7201_v56, %s7687_s19 }
 0x145   : > { %v1595_v3 = vpop.permute.xlu1 %1594 }
 0x146   : > { %1641 = vst.msk [vmem:[#allocation2 + $0x20] sm:$0xff] %vm1638_vm11, %v1595_v3  ;;  %v1805_v5 = vpop.permute.xlu0 %1804 }
 0x147   : > { %1658 = vst.msk [vmem:[#allocation2 + $0x20] sm:$0xe0] %vm1655_vm12, %v7681_v0  ;;  %1239 = vrot.lane.b32.xlu1 %v1223_v58, %s7688_s9  ;;  %v7249_v58 = vld [vmem:[#allocation12 + $0x40] sm:$0xff]  }
 0x148   : > { %v2241_v6 = vld [vmem:[#allocation2] sm:$0xff]  ;;  %1851 = vst.msk [vmem:[#allocation2 + $0x20] sm:$0x1f] %vm1848_vm13, %v1805_v5  ;;  %1437 = vrot.lane.b32.xlu0 %v1409_v1, %s7686_s1  ;;  %6699 = vmatprep.subr.bf16.mxu1 %v7249_v58  ;;  %v7251_v1 = vld [vmem:[#allocation12 + $0x50] sm:$0xff]  }
 0x149   : > { %2426 = vmatmul.mubr.bf16.vlgmr.msra.gmra.mrb[0].mxu1 %v2241_v6  ;;  %3251 = vst.msk [vmem:[#allocation2] sm:$0x38] %vm3250_vm4, %v7681_v0  ;;  %v1970_v11 = vpop.permute.xlu1 %1969  ;;  %v2243_v12 = vld [vmem:[#allocation2 + $0x10] sm:$0xff] }
 0x14a   : > { %1876 = vst.msk [vmem:[#allocation2 + $0x20] sm:$0x7] %vm1873_vm14, %v7681_v0  ;;  %6315 = vmatprep.mubr.msk.bf16.mxu1 %vm545_vm0, %v8216_v40  ;;  %v2088_v13 = vpop.permute.xlu0 %2087  ;;  %v1224_v40 = vrot.slane %v7211_v8, 3  ;;  %6700 = vmatpush3.bf16.msra.mxu1 %v7249_v58  ;;  %v7244_v58 = vld [vmem:[%s7997_s29] ss:$0 sps:$4 sm:$0x33]  }
 0x14b   : > { %1998 = vst.msk [vmem:[#allocation2 + $0x20] sm:$0xf8] %vm1995_vm15, %v1970_v11  ;;  %1614 = vrot.lane.b32.xlu1 %v7206_v4, %s7682_s16  ;;  %6701 = vmatprep.subr.bf16.mxu1 %v7250_v60  ;;  %v7252_v4 = vld [vmem:[#allocation12 + $0x58] sm:$0xff]  }
 0x14c   : > { %3252 = vst.msk [vmem:[#allocation2 + $0x10] sm:$0x38] %vm3250_vm4, %v7681_v0  ;;  %1824 = vrot.lane.b32.xlu0 %v1796_v7, %s7683_s20 }
 0x14d   : > { %2115 = vst.msk [vmem:[#allocation2 + $0x20] sm:$0xff] %vm2006_vm2, %v2088_v13  ;;  %v1420_v17 = vpop.permute.xlu1 %1419 }
 0x14e   : > { %1465 = vst.msk [vmem:[#allocation2 + $0x30] sm:$0xf8] %vm1461_vm10, %v1420_v17  ;;  %v1597_v18 = vpop.permute.xlu0 %1596  ;;  %6702 = vmatpush3.bf16.msra.mxu1 %v7250_v60 }
 0x14f   : > { %1642 = vst.msk [vmem:[#allocation2 + $0x30] sm:$0xff] %vm1638_vm11, %v1597_v18  ;;  %1103 = vrot.lane.b32.xlu1 %v7208_v14, %s7687_s19  ;;  %6703 = vmatprep.subr.bf16.mxu1 %v7251_v1 }
 0x150   : > { %1659 = vst.msk [vmem:[#allocation2 + $0x30] sm:$0xe0] %vm1655_vm12, %v7681_v0  ;;  %1241 = vrot.lane.b32.xlu0 %v1224_v40, %s7688_s9 }
 0x151   : > { %2434 = vmatmul.mubr.bf16.gmra.mrb[4].mxu1 %v2243_v12  ;;  %v1807_v23 = vpop.permute.xlu1 %1806 }
 0x152   : > { %6316 = vmatprep.mubr.msk.bf16.mxu1 %vm545_vm0, %v8234_v53  ;;  %1852 = vst.msk [vmem:[#allocation2 + $0x30] sm:$0x1f] %vm1848_vm13, %v1807_v23  ;;  %v1972_v26 = vpop.permute.xlu0 %1971  ;;  %v990_v53 = vrot.slane %v7246_v25, 5  ;;  %6704 = vmatpush3.bf16.msra.mxu1 %v7251_v1 }
 0x153   : > { %1877 = vst.msk [vmem:[#allocation2 + $0x30] sm:$0x7] %vm1873_vm14, %v7681_v0  ;;  %1439 = vrot.lane.b32.xlu1 %v1410_v16, %s7686_s1  ;;  %6705 = vmatprep.subr.bf16.mxu1 %v7252_v4 }
 0x154   : > { %v2245_v27 = vld [vmem:[#allocation2 + $0x20] sm:$0xff]  ;;  %1999 = vst.msk [vmem:[#allocation2 + $0x30] sm:$0xf8] %vm1995_vm15, %v1972_v26  ;;  %1616 = vrot.lane.b32.xlu0 %v7213_v20, %s7682_s16 }
 0x155   : > { %3253 = vst.msk [vmem:[#allocation2 + $0x20] sm:$0x38] %vm3250_vm4, %v7681_v0  ;;  %v2090_v31 = vpop.permute.xlu1 %2089 }
 0x156   : > { %1011 = vst.msk [vmem:[#allocation2 + $0xf0] sm:$0xf8] %vm1001_vm9, %v990_v53  ;;  %v1422_v33 = vpop.permute.xlu0 %1421  ;;  %6706 = vmatpush3.bf16.msra.mxu1 %v7252_v4  ;;  %v7254_v53 = vld [vmem:[#allocation12 + $0x68] sm:$0xff]  }
 0x157   : > { %2116 = vst.msk [vmem:[#allocation2 + $0x30] sm:$0xff] %vm2006_vm2, %v2090_v31  ;;  %1826 = vrot.lane.b32.xlu1 %v1797_v30, %s7683_s20 }
 0x158   : > { %1466 = vst.msk [vmem:[#allocation2 + $0x40] sm:$0xf8] %vm1461_vm10, %v1422_v33  ;;  %1105 = vrot.lane.b32.xlu0 %v7217_v28, %s7687_s19  ;;  %v7253_v28 = vld [vmem:[#allocation12 + $0x60] sm:$0xff]  }
 0x159   : > { %2442 = vmatmul.mubr.bf16.gmra.mrb[8].mxu1 %v2245_v27  ;;  %v1599_v37 = vpop.permute.xlu1 %1598  ;;  %6707 = vmatprep.subr.bf16.mxu1 %v7253_v28 }
 0x15a   : > { %6317 = vmatprep.mubr.msk.bf16.mxu1 %vm545_vm0, %v8247_v62  ;;  %1643 = vst.msk [vmem:[#allocation2 + $0x40] sm:$0xff] %vm1638_vm11, %v1599_v37  ;;  %v1809_v39 = vpop.permute.xlu0 %1808  ;;  %6708 = vmatpush3.bf16.msra.mxu1 %v7253_v28  ;;  %v7256_v37 = vld [vmem:[#allocation12 + $0x78] sm:$0xff]   ;;  %v7266_v28 = vld [vmem:[%s7997_s29 + $0x68] sm:$0xff]  }
 0x15b   : > { %1660 = vst.msk [vmem:[#allocation2 + $0x40] sm:$0xe0] %vm1655_vm12, %v7681_v0  ;;  %1243 = vrot.lane.b32.xlu1 %v1225_v32, %s7688_s9  ;;  %6709 = vmatprep.subr.bf16.mxu1 %v7254_v53  ;;  %v7255_v32 = vld [vmem:[#allocation12 + $0x70] sm:$0xff]  }
 0x15c   : > { %1853 = vst.msk [vmem:[#allocation2 + $0x40] sm:$0x1f] %vm1848_vm13, %v1809_v39  ;;  %1441 = vrot.lane.b32.xlu0 %v1411_v34, %s7686_s1 }
 0x15d   : > { %1878 = vst.msk [vmem:[#allocation2 + $0x40] sm:$0x7] %vm1873_vm14, %v7681_v0  ;;  %v1974_v62 = vpop.permute.xlu1 %1973 }
 0x15e   : > { %v2247_v44 = vld [vmem:[#allocation2 + $0x30] sm:$0xff]  ;;  %2000 = vst.msk [vmem:[#allocation2 + $0x40] sm:$0xf8] %vm1995_vm15, %v1974_v62  ;;  %v2092_v46 = vpop.permute.xlu0 %2091  ;;  %6710 = vmatpush3.bf16.msra.mxu1 %v7254_v53 }
 0x15f   : > { %3254 = vst.msk [vmem:[#allocation2 + $0x30] sm:$0x38] %vm3250_vm4, %v7681_v0  ;;  %1618 = vrot.lane.b32.xlu1 %v7220_v38, %s7682_s16  ;;  %6711 = vmatprep.subr.bf16.mxu1 %v7255_v32 }
 0x160   : > { %2117 = vst.msk [vmem:[#allocation2 + $0x40] sm:$0xff] %vm2006_vm2, %v2092_v46  ;;  %1828 = vrot.lane.b32.xlu0 %v1798_v36, %s7683_s20  ;;  %v2262_v36 = vld [vmem:[#allocation2 + $0xa8] sm:$0xff]  ;;  %v2264_v46 = vld [vmem:[#allocation2 + $0xb8] sm:$0xff] }
 0x161   : > { %2450 = vmatmul.mubr.bf16.gmra.mrb[12].mxu1 %v2247_v44  ;;  %v1424_v49 = vpop.permute.xlu1 %1423 }
 0x162   : > { %6318 = vmatprep.mubr.msk.bf16.mxu1 %vm545_vm0, %v8276_v19  ;;  %1467 = vst.msk [vmem:[#allocation2 + $0x50] sm:$0xf8] %vm1461_vm10, %v1424_v49  ;;  %v1601_v50 = vpop.permute.xlu0 %1600  ;;  %6712 = vmatpush3.bf16.msra.mxu1 %v7255_v32  ;;  %v7268_v32 = vld [vmem:[%s7997_s29 + $0x10] sm:$0xff]  }
 0x163   : > { %1644 = vst.msk [vmem:[#allocation2 + $0x50] sm:$0xff] %vm1638_vm11, %v1601_v50  ;;  %1107 = vrot.lane.b32.xlu1 %v7224_v45, %s7687_s19  ;;  %6713 = vmatprep.subr.bf16.mxu1 %v7256_v37 }
 0x164   : > { %1661 = vst.msk [vmem:[#allocation2 + $0x50] sm:$0xe0] %vm1655_vm12, %v7681_v0  ;;  %1245 = vrot.lane.b32.xlu0 %v1226_v47, %s7688_s9 }
 0x165   : > { %v1811_v55 = vpop.permute.xlu1 %1810 }
 0x166   : > { %1854 = vst.msk [vmem:[#allocation2 + $0x50] sm:$0x1f] %vm1848_vm13, %v1811_v55  ;;  %v1976_v56 = vpop.permute.xlu0 %1975  ;;  %6714 = vmatpush3.bf16.msra.mxu1 %v7256_v37 }
 0x167   : > { %v2249_v19 = vld [vmem:[#allocation2 + $0x40] sm:$0xff]  ;;  %1879 = vst.msk [vmem:[#allocation2 + $0x50] sm:$0x7] %vm1873_vm14, %v7681_v0  ;;  %1443 = vrot.lane.b32.xlu1 %v1412_v48, %s7686_s1  ;;  %4042 = vmatprep.subr.bf16.mxu1 %v7681_v0 }
 0x168   : > { %2001 = vst.msk [vmem:[#allocation2 + $0x50] sm:$0xf8] %vm1995_vm15, %v1976_v56  ;;  %1620 = vrot.lane.b32.xlu0 %v7228_v51, %s7682_s16  ;;  %v2266_v56 = vld [vmem:[#allocation2 + $0xc8] sm:$0xff] }
 0x169   : > { %2458 = vmatmul.mubr.bf16.gmra.mrb[16].mxu1 %v2249_v19  ;;  %3255 = vst.msk [vmem:[#allocation2 + $0x40] sm:$0x38] %vm3250_vm4, %v7681_v0  ;;  %v2094_v61 = vpop.permute.xlu1 %2093 }
 0x16a   : > { %6319 = vmatprep.mubr.msk.bf16.mxu1 %vm545_vm0, %v8296_v35  ;;  %2118 = vst.msk [vmem:[#allocation2 + $0x50] sm:$0xff] %vm2006_vm2, %v2094_v61  ;;  %v1090_v63 = vpop.permute.xlu0 %1089  ;;  %v7257_v61 = vld [vmem:[%s7997_s29] ss:$0 sps:$4 sm:$0x33]  }
 0x16b   : > { %1830 = vrot.lane.b32.xlu1 %v1799_v57, %s7683_s20  ;;  %1119 = vst.msk [vmem:[#allocation2 + $0x60] sm:$0xff] %vm1012_vm1, %v1090_v63  ;;  %v3331_v63 = vrot.slane %v7257_v61, 2 }
 0x16c   : > { %1137 = vst.msk [vmem:[#allocation2 + $0x60] sm:$0xe0] %vm1136_vm5, %v7681_v0 }
 0x16d   : > { %v1228_v35 = vpop.permute.xlu1 %1227  ;;  %3347 = vrot.lane.b32.xlu0 %v3331_v63, %s7686_s1  ;;  %v7280_v63 = vld [vmem:[%s7997_s29 + $0x28] ss:$0 sps:$4 sm:$0x33]  }
 0x16e   : > { %1258 = vst.msk [vmem:[#allocation2 + $0x60] sm:$0x1f] %vm1257_vm6, %v1228_v35  ;;  %v1426_v3 = vpop.permute.xlu0 %1425  ;;  %v3139_v35 = vrot.slane %v7244_v58, 2  ;;  %v7278_v58 = vld [vmem:[%s7997_s29 + $0x20] sm:$0xff]  }
 0x16f   : > { %1275 = vst.msk [vmem:[#allocation2 + $0x60] sm:$0x7] %vm1268_vm3, %v7681_v0 }
 0x170   : > { %1468 = vst.msk [vmem:[#allocation2 + $0x60] sm:$0xf8] %vm1461_vm10, %v1426_v3  ;;  %v7258_v3 = vld [vmem:[%s7997_s29] sm:$0xff]  }
 0x171   : > { %v1603_v5 = vpop.permute.xlu1 %1602  ;;  %v2251_v6 = vld [vmem:[#allocation2 + $0x50] sm:$0xff]  ;;  %3524 = vrot.lane.b32.xlu1 %v7258_v3, %s7682_s16  ;;  %v7282_v3 = vld [vmem:[%s7997_s29 + $0x2c] ss:$0 sps:$4 sm:$0xcc]  }
 0x172   : > { %1645 = vst.msk [vmem:[#allocation2 + $0x60] sm:$0xff] %vm1638_vm11, %v1603_v5  ;;  %2466 = vmatmul.mubr.bf16.gmra.mrb[20].mxu1 %v2251_v6  ;;  %v1813_v7 = vpop.permute.xlu0 %1812  ;;  %v7259_v5 = vld [vmem:[%s7997_s29 + $0x4] ss:$0 sps:$4 sm:$0xcc]   ;;  %v2268_v6 = vld [vmem:[#allocation2 + $0xd8] sm:$0xff] }
 0x173   : > { %3256 = vst.msk [vmem:[#allocation2 + $0x50] sm:$0x38] %vm3250_vm4, %v7681_v0  ;;  %6320 = vmatprep.mubr.msk.bf16.mxu1 %vm545_vm0, %v8304_v43 }
 0x174   : > { %1662 = vst.msk [vmem:[#allocation2 + $0x60] sm:$0xe0] %vm1655_vm12, %v7681_v0 }
 0x175   : > { %1855 = vst.msk [vmem:[#allocation2 + $0x60] sm:$0x1f] %vm1848_vm13, %v1813_v7  ;;  %v1978_v8 = vpop.permute.xlu1 %1977  ;;  %v7260_v7 = vld [vmem:[%s7997_s29 + $0x60] ss:$0 sps:$4 sm:$0x33]  }
 0x176   : > { %1880 = vst.msk [vmem:[#allocation2 + $0x60] sm:$0x7] %vm1873_vm14, %v7681_v0  ;;  %v2096_v9 = vpop.permute.xlu0 %2095 }
 0x177   : > { %2002 = vst.msk [vmem:[#allocation2 + $0x60] sm:$0xf8] %vm1995_vm15, %v1978_v8 }
 0x178   : > { %2119 = vst.msk [vmem:[#allocation2 + $0x60] sm:$0xff] %vm2006_vm2, %v2096_v9  ;;  %v3669_v9 = vrot.slane %v7259_v5, 2  ;;  %v7283_v5 = vld [vmem:[%s7997_s29 + $0x30] ss:$0 sps:$4 sm:$0x33]  }
 0x179   : > { %v1092_v10 = vpop.permute.xlu1 %1091 }
 0x17a   : > { %1120 = vst.msk [vmem:[#allocation2 + $0x70] sm:$0xff] %vm1012_vm1, %v1092_v10  ;;  %v1230_v11 = vpop.permute.xlu0 %1229  ;;  %3685 = vrot.lane.b32.xlu0 %v3669_v9, %s7683_s20 }
 0x17b   : > { %1138 = vst.msk [vmem:[#allocation2 + $0x70] sm:$0xe0] %vm1136_vm5, %v7681_v0 }
 0x17c   : > { %1259 = vst.msk [vmem:[#allocation2 + $0x70] sm:$0x1f] %vm1257_vm6, %v1230_v11  ;;  %v3779_v11 = vrot.slane %v7260_v7, 2  ;;  %v7284_v7 = vld [vmem:[%s7997_s29 + $0x30] sm:$0xff]  }
 0x17d   : > { %1276 = vst.msk [vmem:[#allocation2 + $0x70] sm:$0x7] %vm1268_vm3, %v7681_v0  ;;  %v1428_v43 = vpop.permute.xlu1 %1427 }
 0x17e   : > { %1469 = vst.msk [vmem:[#allocation2 + $0x70] sm:$0xf8] %vm1461_vm10, %v1428_v43  ;;  %v1605_v12 = vpop.permute.xlu0 %1604  ;;  %3783 = vrot.lane.b32.xlu1 %v3779_v11, %s7685_s23 }
 0x17f   : > { %v2253_v13 = vld [vmem:[#allocation2 + $0x60] sm:$0xff]  ;;  %1646 = vst.msk [vmem:[#allocation2 + $0x70] sm:$0xff] %vm1638_vm11, %v1605_v12  ;;  %v7262_v12 = vld [vmem:[%s7997_s29 + $0x8] ss:$0 sps:$4 sm:$0x33]  }
 0x180   : > { %2474 = vmatmul.mubr.bf16.gmra.mrb[24].mxu1 %v2253_v13  ;;  %3111 = vst.msk [vmem:[#allocation2 + $0x60] sm:$0xf8] %vm1001_vm9, %v7681_v0  ;;  %v7245_v13 = vld [vmem:[%s7997_s29 + $0x8] ss:$0 sps:$4 sm:$0x33]  }
 0x181   : > { %1663 = vst.msk [vmem:[#allocation2 + $0x70] sm:$0xe0] %vm1655_vm12, %v7681_v0  ;;  %6321 = vmatprep.mubr.msk.bf16.mxu1 %vm545_vm0, %v8326_v52  ;;  %v1815_v14 = vpop.permute.xlu1 %1814 }
 0x182   : > { %3152 = vst.msk [vmem:[#allocation2 + $0x60] sm:$0xff] %vm1012_vm1, %v7681_v0  ;;  %v1980_v15 = vpop.permute.xlu0 %1979 }
 0x183   : > { %3202 = vst.msk [vmem:[#allocation2 + $0x60] sm:$0x1f] %vm1257_vm6, %v7681_v0 }
 0x184   : > { %1856 = vst.msk [vmem:[#allocation2 + $0x70] sm:$0x1f] %vm1848_vm13, %v1815_v14  ;;  %v7261_v14 = vld [vmem:[%s7997_s29 + $0x60] sm:$0xff]  }
 0x185   : > { %3257 = vst.msk [vmem:[#allocation2 + $0x60] sm:$0x38] %vm3250_vm4, %v7681_v0  ;;  %v2098_v40 = vpop.permute.xlu1 %2097  ;;  %3834 = vrot.lane.b32.xlu0 %v7261_v14, %s7684_s24 }
 0x186   : > { %1881 = vst.msk [vmem:[#allocation2 + $0x70] sm:$0x7] %vm1873_vm14, %v7681_v0  ;;  %v1094_v16 = vpop.permute.xlu0 %1093 }
 0x187   : > { %2003 = vst.msk [vmem:[#allocation2 + $0x70] sm:$0xf8] %vm1995_vm15, %v1980_v15 }
 0x188   : > { %2120 = vst.msk [vmem:[#allocation2 + $0x70] sm:$0xff] %vm2006_vm2, %v2098_v40  ;;  %v3332_v40 = vrot.slane %v7262_v12, 2  ;;  %v7288_v12 = vld [vmem:[%s7997_s29 + $0x3c] ss:$0 sps:$4 sm:$0xcc]  }
 0x189   : > { %1121 = vst.msk [vmem:[#allocation2 + $0x80] sm:$0xff] %vm1012_vm1, %v1094_v16  ;;  %v1232_v52 = vpop.permute.xlu1 %1231  ;;  %v3676_v14 = vrot.slane %v7288_v12, 2 }
 0x18a   : > { %1139 = vst.msk [vmem:[#allocation2 + $0x80] sm:$0xe0] %vm1136_vm5, %v7681_v0  ;;  %v1430_v17 = vpop.permute.xlu0 %1429  ;;  %3349 = vrot.lane.b32.xlu1 %v3332_v40, %s7686_s1 }
 0x18b   : > { %1260 = vst.msk [vmem:[#allocation2 + $0x80] sm:$0x1f] %vm1257_vm6, %v1232_v52  ;;  %v7264_v52 = vld [vmem:[%s7997_s29 + $0xc] ss:$0 sps:$4 sm:$0xcc]  }
 0x18c   : > { %1277 = vst.msk [vmem:[#allocation2 + $0x80] sm:$0x7] %vm1268_vm3, %v7681_v0 }
 0x18d   : > { %1470 = vst.msk [vmem:[#allocation2 + $0x80] sm:$0xf8] %vm1461_vm10, %v1430_v17  ;;  %v1607_v18 = vpop.permute.xlu1 %1606  ;;  %v3140_v17 = vrot.slane %v7245_v13, 2  ;;  %v7289_v13 = vld [vmem:[%s7997_s29 + $0x40] ss:$0 sps:$4 sm:$0x33]  }
 0x18e   : > { %1647 = vst.msk [vmem:[#allocation2 + $0x80] sm:$0xff] %vm1638_vm11, %v1607_v18  ;;  %v1817_v21 = vpop.permute.xlu0 %1816  ;;  %v7263_v18 = vld [vmem:[%s7997_s29 + $0x8] sm:$0xff]   ;;  %v3339_v40 = vrot.slane %v7289_v13, 2 }
 0x18f   : > { %v2255_v20 = vld [vmem:[#allocation2 + $0x70] sm:$0xff]  ;;  %1664 = vst.msk [vmem:[#allocation2 + $0x80] sm:$0xe0] %vm1655_vm12, %v7681_v0  ;;  %3526 = vrot.lane.b32.xlu0 %v7263_v18, %s7682_s16  ;;  %v7294_v18 = vld [vmem:[%s7997_s29 + $0x48] ss:$0 sps:$4 sm:$0x33]  }
 0x190   : > { %2482 = vmatmul.mubr.bf16.gmra.mrb[28].mxu1 %v2255_v20  ;;  %3112 = vst.msk [vmem:[#allocation2 + $0x70] sm:$0xf8] %vm1001_vm9, %v7681_v0 }
 0x191   : > { %3153 = vst.msk [vmem:[#allocation2 + $0x70] sm:$0xff] %vm1012_vm1, %v7681_v0  ;;  %6322 = vmatprep.mubr.msk.bf16.mxu1 %vm545_vm0, %v8345_v59  ;;  %v1982_v22 = vpop.permute.xlu1 %1981 }
 0x192   : > { %1857 = vst.msk [vmem:[#allocation2 + $0x80] sm:$0x1f] %vm1848_vm13, %v1817_v21  ;;  %v2100_v23 = vpop.permute.xlu0 %2099  ;;  %v3670_v21 = vrot.slane %v7264_v52, 2  ;;  %v7290_v52 = vld [vmem:[%s7997_s29 + $0x40] sm:$0xff]  }
 0x193   : > { %1882 = vst.msk [vmem:[#allocation2 + $0x80] sm:$0x7] %vm1873_vm14, %v7681_v0 }
 0x194   : > { %3203 = vst.msk [vmem:[#allocation2 + $0x70] sm:$0x1f] %vm1257_vm6, %v7681_v0  ;;  %3687 = vrot.lane.b32.xlu1 %v3670_v21, %s7683_s20  ;;  %v427_v21 = vld [vmem:[%s7997_s29 + $0x8] sm:$0xff]  }
 0x195   : > { %3258 = vst.msk [vmem:[#allocation2 + $0x70] sm:$0x38] %vm3250_vm4, %v7681_v0  ;;  %v1096_v24 = vpop.permute.xlu1 %1095 }
 0x196   : > { %2004 = vst.msk [vmem:[#allocation2 + $0x80] sm:$0xf8] %vm1995_vm15, %v1982_v22  ;;  %v1234_v25 = vpop.permute.xlu0 %1233 }
 0x197   : > { %2121 = vst.msk [vmem:[#allocation2 + $0x80] sm:$0xff] %vm2006_vm2, %v2100_v23  ;;  %v2270_v23 = vld [vmem:[#allocation2 + $0xe8] sm:$0xff] }
 0x198   : > { %1122 = vst.msk [vmem:[#allocation2 + $0x90] sm:$0xff] %vm1012_vm1, %v1096_v24  ;;  %v7265_v24 = vld [vmem:[%s7997_s29 + $0x68] ss:$0 sps:$4 sm:$0x33]   ;;  %3836 = vrot.lane.b32.xlu1 %v7266_v28, %s7684_s24 }
 0x199   : > { %1140 = vst.msk [vmem:[#allocation2 + $0x90] sm:$0xe0] %vm1136_vm5, %v7681_v0  ;;  %v1432_v59 = vpop.permute.xlu1 %1431 }
 0x19a   : > { %1261 = vst.msk [vmem:[#allocation2 + $0x90] sm:$0x1f] %vm1257_vm6, %v1234_v25  ;;  %v1609_v26 = vpop.permute.xlu0 %1608 }
 0x19b   : > { %1278 = vst.msk [vmem:[#allocation2 + $0x90] sm:$0x7] %vm1268_vm3, %v7681_v0 }
 0x19c   : > { %1471 = vst.msk [vmem:[#allocation2 + $0x90] sm:$0xf8] %vm1461_vm10, %v1432_v59  ;;  %v3780_v59 = vrot.slane %v7265_v24, 2  ;;  %3528 = vrot.lane.b32.xlu1 %v7268_v32, %s7682_s16  ;;  %v5510_v24 = vunpack.c.l.bf16 %v427_v21 }
 0x19d   : > { %1648 = vst.msk [vmem:[#allocation2 + $0x90] sm:$0xff] %vm1638_vm11, %v1609_v26  ;;  %v1819_v29 = vpop.permute.xlu1 %1818 }
 0x19e   : > { %v2257_v27 = vld [vmem:[#allocation2 + $0x80] sm:$0xff]  ;;  %1665 = vst.msk [vmem:[#allocation2 + $0x90] sm:$0xe0] %vm1655_vm12, %v7681_v0  ;;  %v1984_v30 = vpop.permute.xlu0 %1983  ;;  %3785 = vrot.lane.b32.xlu0 %v3780_v59, %s7685_s23  ;;  %v7296_v59 = vld [vmem:[%s7997_s29 + $0x48] sm:$0xff]  }
 0x19f   : > { %2490 = vmatmul.mubr.bf16.gmra.mrb[32].mxu1 %v2257_v27  ;;  %3113 = vst.msk [vmem:[#allocation2 + $0x80] sm:$0xf8] %vm1001_vm9, %v7681_v0  ;;  %v7247_v27 = vld [vmem:[%s7997_s29 + $0x10] ss:$0 sps:$4 sm:$0x33]  }
 0x1a0   : > { %3154 = vst.msk [vmem:[#allocation2 + $0x80] sm:$0xff] %vm1012_vm1, %v7681_v0  ;;  %6323 = vmatprep.mubr.msk.bf16.mxu1 %vm545_vm0, %v8352_v2 }
 0x1a1   : > { %3204 = vst.msk [vmem:[#allocation2 + $0x80] sm:$0x1f] %vm1257_vm6, %v7681_v0  ;;  %v2102_v2 = vpop.permute.xlu1 %2101 }
 0x1a2   : > { %1858 = vst.msk [vmem:[#allocation2 + $0x90] sm:$0x1f] %vm1848_vm13, %v1819_v29  ;;  %v1098_v31 = vpop.permute.xlu0 %1097 }
 0x1a3   : > { %3259 = vst.msk [vmem:[#allocation2 + $0x80] sm:$0x38] %vm3250_vm4, %v7681_v0 }
 0x1a4   : > { %1883 = vst.msk [vmem:[#allocation2 + $0x90] sm:$0x7] %vm1873_vm14, %v7681_v0  ;;  %vm3147_vm14 = vcmask 130054  }
 0x1a5   : > { %2005 = vst.msk [vmem:[#allocation2 + $0x90] sm:$0xf8] %vm1995_vm15, %v1984_v30  ;;  %v1236_v33 = vpop.permute.xlu1 %1235  ;;  %v7267_v30 = vld [vmem:[%s7997_s29 + $0x10] ss:$0 sps:$4 sm:$0x33]  }
 0x1a6   : > { %2122 = vst.msk [vmem:[#allocation2 + $0x90] sm:$0xff] %vm2006_vm2, %v2102_v2  ;;  %v1434_v34 = vpop.permute.xlu0 %1433  ;;  %v3333_v53 = vrot.slane %v7267_v30, 2  ;;  %v5543_v30 = vsel %vm545_vm0, %v5510_v24, 0.0 }
 0x1a7   : > { %1123 = vst.msk [vmem:[#allocation2 + $0xa0] sm:$0xff] %vm1012_vm1, %v1098_v31  ;;  %v3141_v31 = vrot.slane %v7247_v27, 2  ;;  %v7298_v27 = vld [vmem:[%s7997_s29 + $0x4c] ss:$0 sps:$4 sm:$0xcc]  }
 0x1a8   : > { %1141 = vst.msk [vmem:[#allocation2 + $0xa0] sm:$0xe0] %vm1136_vm5, %v7681_v0  ;;  %3351 = vrot.lane.b32.xlu0 %v3333_v53, %s7686_s1 }
 0x1a9   : > { %1262 = vst.msk [vmem:[#allocation2 + $0xa0] sm:$0x1f] %vm1257_vm6, %v1236_v33  ;;  %v1611_v38 = vpop.permute.xlu1 %1610  ;;  %v7269_v33 = vld [vmem:[%s7997_s29 + $0x14] ss:$0 sps:$4 sm:$0xcc]  }
 0x1aa   : > { %1279 = vst.msk [vmem:[#allocation2 + $0xa0] sm:$0x7] %vm1268_vm3, %v7681_v0  ;;  %v1821_v41 = vpop.permute.xlu0 %1820  ;;  %v3671_v37 = vrot.slane %v7269_v33, 2  ;;  %v7300_v33 = vld [vmem:[%s7997_s29 + $0x50] ss:$0 sps:$4 sm:$0x33]  }
 0x1ab   : > { %1472 = vst.msk [vmem:[#allocation2 + $0xa0] sm:$0xf8] %vm1461_vm10, %v1434_v34 }
 0x1ac   : > { %1649 = vst.msk [vmem:[#allocation2 + $0xa0] sm:$0xff] %vm1638_vm11, %v1611_v38  ;;  %v7270_v38 = vld [vmem:[%s7997_s29 + $0x70] ss:$0 sps:$4 sm:$0x33]   ;;  %3689 = vrot.lane.b32.xlu0 %v3671_v37, %s7683_s20 }
 0x1ad   : > { %v2259_v39 = vld [vmem:[#allocation2 + $0x90] sm:$0xff]  ;;  %1666 = vst.msk [vmem:[#allocation2 + $0xa0] sm:$0xe0] %vm1655_vm12, %v7681_v0  ;;  %v1100_v42 = vpop.permute.xlu1 %1099 }
 0x1ae   : > { %2498 = vmatmul.mubr.bf16.gmra.mrb[36].mxu1 %v2259_v39  ;;  %3114 = vst.msk [vmem:[#allocation2 + $0x90] sm:$0xf8] %vm1001_vm9, %v7681_v0  ;;  %v1238_v62 = vpop.permute.xlu0 %1237  ;;  %v429_v37 = vld [vmem:[%s7997_s29 + $0x10] sm:$0xff]  }
 0x1af   : > { %3155 = vst.msk [vmem:[#allocation2 + $0x90] sm:$0xff] %vm1012_vm1, %v7681_v0  ;;  %6324 = vmatprep.mubr.msk.bf16.mxu1 %vm545_vm0, %v2262_v36  ;;  %1124 = vst.msk [vmem:[#allocation2 + $0xb0] sm:$0xff] %vm1012_vm1, %v1100_v42  ;;  %v2272_v36 = vld [vmem:[#allocation2 + $0xf8] sm:$0xff]  ;;  %v3781_v42 = vrot.slane %v7270_v38, 2 }
 0x1b0   : > { %1859 = vst.msk [vmem:[#allocation2 + $0xa0] sm:$0x1f] %vm1848_vm13, %v1821_v41  ;;  %v7303_v38 = vld [vmem:[%s7997_s29 + $0x54] ss:$0 sps:$4 sm:$0xcc]  }
 0x1b1   : > { %1867 = vst.msk [vmem:[#allocation2 + $0xa0] sm:$0xff] %vm1866_vm8, %v7681_v0  ;;  %v1436_v44 = vpop.permute.xlu1 %1435  ;;  %3787 = vrot.lane.b32.xlu1 %v3781_v42, %s7685_s23  ;;  %v431_v42 = vld [vmem:[%s7997_s29 + $0x18] sm:$0xff]  }
 0x1b2   : > { %3205 = vst.msk [vmem:[#allocation2 + $0x90] sm:$0x1f] %vm1257_vm6, %v7681_v0  ;;  %1263 = vst.msk [vmem:[#allocation2 + $0xb0] sm:$0x1f] %vm1257_vm6, %v1238_v62  ;;  %v1613_v45 = vpop.permute.xlu0 %1612 }
 0x1b3   : > { %2007 = vst.msk [vmem:[#allocation2 + $0xa0] sm:$0xff] %vm2006_vm2, %v7681_v0  ;;  %v7272_v62 = vld [vmem:[%s7997_s29 + $0x18] ss:$0 sps:$4 sm:$0x33]  }
 0x1b4   : > { %3260 = vst.msk [vmem:[#allocation2 + $0x90] sm:$0x38] %vm3250_vm4, %v7681_v0 }
 0x1b5   : > { %1142 = vst.msk [vmem:[#allocation2 + $0xb0] sm:$0xe0] %vm1136_vm5, %v7681_v0  ;;  %v1823_v48 = vpop.permute.xlu1 %1822 }
 0x1b6   : > { %1280 = vst.msk [vmem:[#allocation2 + $0xb0] sm:$0x7] %vm1268_vm3, %v7681_v0  ;;  %v1102_v49 = vpop.permute.xlu0 %1101 }
 0x1b7   : > { %1473 = vst.msk [vmem:[#allocation2 + $0xb0] sm:$0xf8] %vm1461_vm10, %v1436_v44  ;;  %v7248_v44 = vld [vmem:[%s7997_s29 + $0x18] ss:$0 sps:$4 sm:$0x33]  }
 0x1b8   : > { %1650 = vst.msk [vmem:[#allocation2 + $0xb0] sm:$0xff] %vm1638_vm11, %v1613_v45  ;;  %v7271_v45 = vld [vmem:[%s7997_s29 + $0x70] sm:$0xff]  }
 0x1b9   : > { %1667 = vst.msk [vmem:[#allocation2 + $0xb0] sm:$0xe0] %vm1655_vm12, %v7681_v0  ;;  %v1240_v50 = vpop.permute.xlu1 %1239  ;;  %3838 = vrot.lane.b32.xlu0 %v7271_v45, %s7684_s24  ;;  %v8782_v45 = vld [vmem:[%s9933_s8 + $0x1] ss:$0 sm:$0xff] }
 0x1ba   : > { %v2261_v47 = vld [vmem:[#allocation2 + $0xa0] sm:$0xff]  ;;  %1860 = vst.msk [vmem:[#allocation2 + $0xb0] sm:$0x1f] %vm1848_vm13, %v1823_v48  ;;  %v1438_v51 = vpop.permute.xlu0 %1437  ;;  %v3142_v48 = vrot.slane %v7248_v44, 2 }
 0x1bb   : > { %2506 = vmatmul.mubr.bf16.gmra.mrb[40].mxu1 %v2261_v47  ;;  %3115 = vst.msk [vmem:[#allocation2 + $0xa0] sm:$0xf8] %vm1001_vm9, %v7681_v0  ;;  %v7274_v47 = vld [vmem:[%s7997_s29 + $0x1c] ss:$0 sps:$4 sm:$0xcc]  }
 0x1bc   : > { %3156 = vst.msk [vmem:[#allocation2 + $0xa0] sm:$0xff] %vm1012_vm1, %v7681_v0  ;;  %6325 = vmatprep.mubr.msk.bf16.mxu1 %vm545_vm0, %v2264_v46  ;;  %1125 = vst.msk [vmem:[#allocation2 + $0xc0] sm:$0xff] %vm1012_vm1, %v1102_v49  ;;  %v3334_v46 = vrot.slane %v7272_v62, 2  ;;  %v7273_v49 = vld [vmem:[%s7997_s29 + $0x18] sm:$0xff]   ;;  %v3679_v62 = vrot.slane %v7303_v38, 2 }
 0x1bd   : > { %1868 = vst.msk [vmem:[#allocation2 + $0xb0] sm:$0xff] %vm1866_vm8, %v7681_v0  ;;  %v1615_v54 = vpop.permute.xlu1 %1614  ;;  %3530 = vrot.lane.b32.xlu0 %v7273_v49, %s7682_s16  ;;  %v7306_v49 = vld [vmem:[%s7997_s29 + $0x58] ss:$0 sps:$4 sm:$0x33]  }
 0x1be   : > { %3206 = vst.msk [vmem:[#allocation2 + $0xa0] sm:$0x1f] %vm1257_vm6, %v7681_v0  ;;  %1264 = vst.msk [vmem:[#allocation2 + $0xc0] sm:$0x1f] %vm1257_vm6, %v1240_v50  ;;  %v1825_v55 = vpop.permute.xlu0 %1824  ;;  %3353 = vrot.lane.b32.xlu1 %v3334_v46, %s7686_s1  ;;  %v3672_v50 = vrot.slane %v7274_v47, 2  ;;  %v5512_v46 = vunpack.c.l.bf16 %v429_v37  ;;  %v5513_v47 = vunpack.c.h.bf16 %v429_v37  ;;  %v439_v38 = vld [vmem:[%s7997_s29 + $0x38] sm:$0xff]  }
 0x1bf   : > { %2008 = vst.msk [vmem:[#allocation2 + $0xb0] sm:$0xff] %vm2006_vm2, %v7681_v0 }
 0x1c0   : > { %1143 = vst.msk [vmem:[#allocation2 + $0xc0] sm:$0xe0] %vm1136_vm5, %v7681_v0 }
 0x1c1   : > { %3261 = vst.msk [vmem:[#allocation2 + $0xa0] sm:$0x38] %vm3250_vm4, %v7681_v0  ;;  %v1104_v57 = vpop.permute.xlu1 %1103 }
 0x1c2   : > { %1281 = vst.msk [vmem:[#allocation2 + $0xc0] sm:$0x7] %vm1268_vm3, %v7681_v0  ;;  %v1242_v60 = vpop.permute.xlu0 %1241  ;;  %3691 = vrot.lane.b32.xlu1 %v3672_v50, %s7683_s20 }
 0x1c3   : > { %1474 = vst.msk [vmem:[#allocation2 + $0xc0] sm:$0xf8] %vm1461_vm10, %v1438_v51  ;;  %v7275_v51 = vld [vmem:[%s7997_s29 + $0x78] ss:$0 sps:$4 sm:$0x33]  }
 0x1c4   : > { %1651 = vst.msk [vmem:[#allocation2 + $0xc0] sm:$0xff] %vm1638_vm11, %v1615_v54 }
 0x1c5   : > { %1668 = vst.msk [vmem:[#allocation2 + $0xc0] sm:$0xe0] %vm1655_vm12, %v7681_v0  ;;  %v1440_v1 = vpop.permute.xlu1 %1439 }
 0x1c6   : > { %1861 = vst.msk [vmem:[#allocation2 + $0xc0] sm:$0x1f] %vm1848_vm13, %v1825_v55  ;;  %v2263_v19 = vld [vmem:[#allocation2 + $0xb0] sm:$0xff]  ;;  %v1617_v4 = vpop.permute.xlu0 %1616  ;;  %v3782_v55 = vrot.slane %v7275_v51, 2 }
 0x1c7   : > { %1869 = vst.msk [vmem:[#allocation2 + $0xc0] sm:$0xff] %vm1866_vm8, %v7681_v0  ;;  %2514 = vmatmul.mubr.bf16.gmra.mrb[44].mxu1 %v2263_v19  ;;  %v7277_v19 = vld [vmem:[%s7997_s29 + $0x20] ss:$0 sps:$4 sm:$0x33]  }
 0x1c8   : > { %3116 = vst.msk [vmem:[#allocation2 + $0xb0] sm:$0xf8] %vm1001_vm9, %v7681_v0  ;;  %6326 = vmatprep.mubr.msk.bf16.mxu1 %vm545_vm0, %v2266_v56  ;;  %vm3118_vm9 = vcmask 128003   ;;  %v7276_v56 = vld [vmem:[%s7997_s29 + $0x78] sm:$0xff]   ;;  %3789 = vrot.lane.b32.xlu0 %v3782_v55, %s7685_s23 }
 0x1c9   : > { %2009 = vst.msk [vmem:[#allocation2 + $0xc0] sm:$0xff] %vm2006_vm2, %v7681_v0  ;;  %v1827_v10 = vpop.permute.xlu1 %1826  ;;  %3840 = vrot.lane.b32.xlu1 %v7276_v56, %s7684_s24  ;;  %v5547_v56 = vsel %vm545_vm0, %v5512_v46, 0.0  ;;  %v7291_v46 = vld [vmem:[#allocation9] sm:$0xff]   ;;  %s6101_s24 = sshll.u32 %s7993_s18, 8 }
 0x1ca   : > { %3157 = vst.msk [vmem:[#allocation2 + $0xb0] sm:$0xff] %vm1012_vm1, %v7681_v0  ;;  %1126 = vst.msk [vmem:[#allocation2 + $0xd0] sm:$0xff] %vm1012_vm1, %v1104_v57  ;;  %v1106_v43 = vpop.permute.xlu0 %1105  ;;  %v3335_v57 = vrot.slane %v7277_v19, 2  ;;  %v5549_v19 = vsel %vm545_vm0, %v5513_v47, 0.0 }
 0x1cb   : > { %3207 = vst.msk [vmem:[#allocation2 + $0xb0] sm:$0x1f] %vm1257_vm6, %v7681_v0  ;;  %1265 = vst.msk [vmem:[#allocation2 + $0xd0] sm:$0x1f] %vm1257_vm6, %v1242_v60 }
 0x1cc   : > { %1144 = vst.msk [vmem:[#allocation2 + $0xd0] sm:$0xe0] %vm1136_vm5, %v7681_v0  ;;  %3355 = vrot.lane.b32.xlu0 %v3335_v57, %s7686_s1  ;;  %v7279_v60 = vld [vmem:[%s7997_s29 + $0x24] ss:$0 sps:$4 sm:$0xcc]   ;;  %v5515_v57 = vunpack.c.h.bf16 %v431_v42 }
 0x1cd   : > { %3262 = vst.msk [vmem:[#allocation2 + $0xb0] sm:$0x38] %vm3250_vm4, %v7681_v0  ;;  %v1244_v15 = vpop.permute.xlu1 %1243  ;;  %3532 = vrot.lane.b32.xlu1 %v7278_v58, %s7682_s16  ;;  %v3673_v61 = vrot.slane %v7279_v60, 2 }
 0x1ce   : > { %1282 = vst.msk [vmem:[#allocation2 + $0xd0] sm:$0x7] %vm1268_vm3, %v7681_v0  ;;  %v1442_v16 = vpop.permute.xlu0 %1441 }
 0x1cf   : > { %1475 = vst.msk [vmem:[#allocation2 + $0xd0] sm:$0xf8] %vm1461_vm10, %v1440_v1  ;;  %v3336_v1 = vrot.slane %v7280_v63, 2 }
 0x1d0   : > { %1652 = vst.msk [vmem:[#allocation2 + $0xd0] sm:$0xff] %vm1638_vm11, %v1617_v4  ;;  %v2265_v8 = vld [vmem:[#allocation2 + $0xc0] sm:$0xff]  ;;  %3693 = vrot.lane.b32.xlu0 %v3673_v61, %s7683_s20  ;;  %v3674_v4 = vrot.slane %v7282_v3, 2  ;;  %v7308_v3 = vld [vmem:[%s7997_s29 + $0x5c] ss:$0 sps:$4 sm:$0xcc]  }
 0x1d1   : > { %1669 = vst.msk [vmem:[#allocation2 + $0xd0] sm:$0xe0] %vm1655_vm12, %v7681_v0  ;;  %2522 = vmatmul.mubr.bf16.gmra.mrb[48].mxu1 %v2265_v8  ;;  %v1619_v20 = vpop.permute.xlu1 %1618  ;;  %3357 = vrot.lane.b32.xlu1 %v3336_v1, %s7686_s1  ;;  %v7285_v8 = vld [vmem:[%s7997_s29 + $0x34] ss:$0 sps:$4 sm:$0xcc]   ;;  %v3342_v1 = vrot.slane %v7306_v49, 2 }
 0x1d2   : > { %3119 = vst.msk [vmem:[#allocation2 + $0xc0] sm:$0x38] %vm3118_vm9, %v7681_v0  ;;  %6327 = vmatprep.mubr.msk.bf16.mxu1 %vm545_vm0, %v2268_v6  ;;  %v1829_v22 = vpop.permute.xlu0 %1828  ;;  %v3337_v6 = vrot.slane %v7283_v5, 2  ;;  %v3675_v9 = vrot.slane %v7285_v8, 2  ;;  %v5553_v8 = vsel %vm545_vm0, %v5515_v57, 0.0 }
 0x1d3   : > { %3148 = vst.msk [vmem:[#allocation2 + $0xc0] sm:$0xc0] %vm3147_vm14, %v3139_v35  ;;  %v7281_v35 = vld [vmem:[%s7997_s29 + $0x28] sm:$0xff]  }
 0x1d4   : > { %1862 = vst.msk [vmem:[#allocation2 + $0xd0] sm:$0x1f] %vm1848_vm13, %v1827_v10  ;;  %3534 = vrot.lane.b32.xlu0 %v7281_v35, %s7682_s16  ;;  %v7286_v10 = vld [vmem:[%s7997_s29 + $0x38] ss:$0 sps:$4 sm:$0x33]  }
 0x1d5   : > { %1870 = vst.msk [vmem:[#allocation2 + $0xd0] sm:$0xff] %vm1866_vm8, %v7681_v0  ;;  %v1108_v26 = vpop.permute.xlu1 %1107  ;;  %3695 = vrot.lane.b32.xlu1 %v3674_v4, %s7683_s20  ;;  %v3338_v11 = vrot.slane %v7286_v10, 2  ;;  %v435_v10 = vld [vmem:[%s7997_s29 + $0x28] sm:$0xff]  }
 0x1d6   : > { %1127 = vst.msk [vmem:[#allocation2 + $0xe0] sm:$0xff] %vm1012_vm1, %v1106_v43  ;;  %1128 = vst.msk [vmem:[#allocation2 + $0xf0] sm:$0xff] %vm1012_vm1, %v1108_v26  ;;  %v1246_v29 = vpop.permute.xlu0 %1245  ;;  %v7287_v43 = vld [vmem:[%s7997_s29 + $0x38] sm:$0xff]   ;;  %v5511_v26 = vunpack.c.h.bf16 %v427_v21  ;;  %v5518_v24 = vunpack.c.l.bf16 %v435_v10 }
 0x1d7   : > { %2010 = vst.msk [vmem:[#allocation2 + $0xd0] sm:$0xff] %vm2006_vm2, %v7681_v0 }
 0x1d8   : > { %1145 = vst.msk [vmem:[#allocation2 + $0xe0] sm:$0xe0] %vm1136_vm5, %v7681_v0  ;;  %1146 = vst.msk [vmem:[#allocation2 + $0xf0] sm:$0xe0] %vm1136_vm5, %v7681_v0  ;;  %3359 = vrot.lane.b32.xlu0 %v3337_v6, %s7686_s1  ;;  %v433_v6 = vld [vmem:[%s7997_s29 + $0x20] sm:$0xff]   ;;  %vm3757_vm5 = vcmask 915203  }
 0x1d9   : > { %1266 = vst.msk [vmem:[#allocation2 + $0xe0] sm:$0x1f] %vm1257_vm6, %v1244_v15  ;;  %1267 = vst.msk [vmem:[#allocation2 + $0xf0] sm:$0x1f] %vm1257_vm6, %v1246_v29  ;;  %v1444_v2 = vpop.permute.xlu1 %1443  ;;  %3536 = vrot.lane.b32.xlu1 %v7284_v7, %s7682_s16  ;;  %v5516_v12 = vunpack.c.l.bf16 %v433_v6  ;;  %v5517_v13 = vunpack.c.h.bf16 %v433_v6 }
 0x1da   : > { %1283 = vst.msk [vmem:[#allocation2 + $0xe0] sm:$0x7] %vm1268_vm3, %v7681_v0  ;;  %1284 = vst.msk [vmem:[#allocation2 + $0xf0] sm:$0x7] %vm1268_vm3, %v7681_v0  ;;  %v1621_v34 = vpop.permute.xlu0 %1620  ;;  %vm3395_vm3 = vcmask 523654  }
 0x1db   : > { %1476 = vst.msk [vmem:[#allocation2 + $0xe0] sm:$0xf8] %vm1461_vm10, %v1442_v16  ;;  %1477 = vst.msk [vmem:[#allocation2 + $0xf0] sm:$0xf8] %vm1461_vm10, %v1444_v2  ;;  %v7293_v16 = vld [vmem:[#allocation6] sm:$0xff]   ;;  %v5545_v2 = vsel %vm545_vm0, %v5511_v26, 0.0 }
 0x1dc   : > { %1653 = vst.msk [vmem:[#allocation2 + $0xe0] sm:$0xff] %vm1638_vm11, %v1619_v20  ;;  %1654 = vst.msk [vmem:[#allocation2 + $0xf0] sm:$0xff] %vm1638_vm11, %v1621_v34  ;;  %3697 = vrot.lane.b32.xlu0 %v3675_v9, %s7683_s20  ;;  %v7292_v15 = vld [vmem:[%s7997_s29 + $0x44] ss:$0 sps:$4 sm:$0xcc]   ;;  %6665 = vmatprep.subr.bf16.mxu0 %v7293_v16  ;;  %v3680_v9 = vrot.slane %v7308_v3, 2 }
 0x1dd   : > { %1670 = vst.msk [vmem:[#allocation2 + $0xe0] sm:$0xe0] %vm1655_vm12, %v7681_v0  ;;  %1671 = vst.msk [vmem:[#allocation2 + $0xf0] sm:$0xe0] %vm1655_vm12, %v7681_v0  ;;  %v1831_v41 = vpop.permute.xlu1 %1830  ;;  %3361 = vrot.lane.b32.xlu1 %v3338_v11, %s7686_s1  ;;  %6666 = vmatpush3.bf16.msra.mxu0 %v7293_v16  ;;  %v425_v20 = vld [vmem:[%s7997_s29] sm:$0xff]   ;;  %vm3733_vm10 = vcmask 779904  }
 0x1de   : > { %1863 = vst.msk [vmem:[#allocation2 + $0xe0] sm:$0x1f] %vm1848_vm13, %v1829_v22  ;;  %v2267_v25 = vld [vmem:[#allocation2 + $0xd0] sm:$0xff]  ;;  %1864 = vst.msk [vmem:[#allocation2 + $0xf0] sm:$0x1f] %vm1848_vm13, %v1831_v41  ;;  %v5508_v22 = vunpack.c.l.bf16 %v425_v20  ;;  %6667 = vmatprep.mubr.msk.bf16.mxu0 %vm545_vm0, %v425_v20  ;;  %vm3588_vm12 = vcmask 782978  }
 0x1df   : > { %1871 = vst.msk [vmem:[#allocation2 + $0xe0] sm:$0xff] %vm1866_vm8, %v7681_v0  ;;  %2530 = vmatmul.mubr.bf16.gmra.mrb[52].mxu1 %v2267_v25  ;;  %1872 = vst.msk [vmem:[#allocation2 + $0xf0] sm:$0xff] %vm1866_vm8, %v7681_v0  ;;  %v3340_v25 = vrot.slane %v7294_v18, 2  ;;  %v7301_v41 = vld [vmem:[%s7997_s29 + $0x50] sm:$0xff]   ;;  %vm3795_vm13 = vcmask 917254  }
 0x1e0   : > { %3120 = vst.msk [vmem:[#allocation2 + $0xd0] sm:$0x38] %vm3118_vm9, %v7681_v0  ;;  %6328 = vmatprep.mubr.msk.bf16.mxu1 %vm545_vm0, %v2270_v23  ;;  %3538 = vrot.lane.b32.xlu0 %v7287_v43, %s7682_s16  ;;  %v5509_v23 = vunpack.c.h.bf16 %v425_v20  ;;  %v5540_v28 = vsel %vm545_vm0, %v5508_v22, 0.0  ;;  %v5555_v20 = vsel %vm545_vm0, %v5516_v12, 0.0  ;;  %v7325_v12 = vld [vmem:[%s7997_s29 + $0x68] sm:$0xff]  }
 0x1e1   : > { %3149 = vst.msk [vmem:[#allocation2 + $0xd0] sm:$0xc0] %vm3147_vm14, %v3140_v17  ;;  %3699 = vrot.lane.b32.xlu1 %v3676_v14, %s7683_s20  ;;  %v3677_v17 = vrot.slane %v7292_v15, 2  ;;  %6668 = vmatmul.mubr.msk.bf16.vlgmr.msra.gmra.mrb[0].mxu0 %vm545_vm0, %v427_v21  ;;  %v7310_v14 = vld [vmem:[%s7997_s29] sm:$0xff]  }
 0x1e2   : > { %2011 = vst.msk [vmem:[#allocation2 + $0xe0] sm:$0xff] %vm2006_vm2, %v7681_v0  ;;  %2012 = vst.msk [vmem:[#allocation2 + $0xf0] sm:$0xff] %vm2006_vm2, %v7681_v0  ;;  %v5541_v29 = vsel %vm545_vm0, %v5509_v23, 0.0  ;;  %6671 = vmatprep.mubr.msk.bf16.mxu0 %vm545_vm0, %v429_v37  ;;  %v7314_v21 = vld [vmem:[%s7997_s29 + $0x60] ss:$0 sps:$4 sm:$0x33]  }
 0x1e3   : > { %v5542_v53 = vadd.f32 %v5541_v29, %v5540_v28  ;;  %v5557_v23 = vsel %vm545_vm0, %v5517_v13, 0.0  ;;  %v7315_v37 = vld [vmem:[%s7997_s29 + $0x60] sm:$0xff]  }
 0x1e4   : > { %3363 = vrot.lane.b32.xlu0 %v3339_v40, %s7686_s1  ;;  %v7313_v40 = vld [vmem:[%s7997_s29 + $0x4] ss:$0 sps:$4 sm:$0xcc]  }
 0x1e5   : > { %3540 = vrot.lane.b32.xlu1 %v7290_v52, %s7682_s16  ;;  %v5544_v32 = vadd.f32 %v5543_v30, %v5542_v53  ;;  %v3343_v30 = vrot.slane %v7314_v21, 2  ;;  %v5559_v53 = vsel %vm545_vm0, %v5518_v24, 0.0 }
 0x1e7   : > { %v5546_v34 = vadd.f32 %v5545_v2, %v5544_v32  ;;  %v437_v32 = vld [vmem:[%s7997_s29 + $0x30] sm:$0xff]  }
 0x1e8   : > { %3701 = vrot.lane.b32.xlu0 %v3677_v17, %s7683_s20 }
 0x1e9   : > { %v2269_v39 = vld [vmem:[#allocation2 + $0xe0] sm:$0xff]  ;;  %v2271_v54 = vld [vmem:[#allocation2 + $0xf0] sm:$0xff]  ;;  %3365 = vrot.lane.b32.xlu1 %v3340_v25, %s7686_s1  ;;  %6672 = vmatmul.mubr.msk.bf16.gmra.mrb[4].mxu0 %vm545_vm0, %v431_v42  ;;  %v5548_v63 = vadd.f32 %v5547_v56, %v5546_v34  ;;  %v5519_v25 = vunpack.c.h.bf16 %v435_v10 }
 0x1ea   : > { %2538 = vmatmul.mubr.bf16.gmra.mrb[56].mxu1 %v2269_v39  ;;  %3121 = vst.msk [vmem:[#allocation2 + $0xe0] sm:$0x38] %vm3118_vm9, %v7681_v0  ;;  %3122 = vst.msk [vmem:[#allocation2 + $0xf0] sm:$0x38] %vm3118_vm9, %v7681_v0  ;;  %v8775_v39 = vld [vmem:[%s9932_s7 + $0x1] ss:$0 sm:$0xff]  ;;  %6675 = vmatprep.mubr.msk.bf16.mxu0 %vm545_vm0, %v433_v6 }
 0x1eb   : > { %3150 = vst.msk [vmem:[#allocation2 + $0xe0] sm:$0xc0] %vm3147_vm14, %v3141_v31  ;;  %6329 = vmatprep.mubr.msk.bf16.mxu1 %vm545_vm0, %v2272_v36  ;;  %3151 = vst.msk [vmem:[#allocation2 + $0xf0] sm:$0xc0] %vm3147_vm14, %v3142_v48  ;;  %v3678_v31 = vrot.slane %v7298_v27, 2  ;;  %v3341_v36 = vrot.slane %v7300_v33, 2  ;;  %v5514_v48 = vunpack.c.l.bf16 %v431_v42  ;;  %v5550_v5 = vadd.f32 %v5549_v19, %v5548_v63 }
 0x1ec   : > { %3542 = vrot.lane.b32.xlu0 %v7296_v59, %s7682_s16  ;;  %v3229_v59 = vrot.slane %v7313_v40, 2  ;;  %v7317_v33 = vld [vmem:[%s7997_s29 + $0x64] ss:$0 sps:$4 sm:$0xcc]   ;;  %v5521_v63 = vunpack.c.h.bf16 %v437_v32 }
 0x1ed   : > { %3703 = vrot.lane.b32.xlu1 %v3678_v31, %s7683_s20  ;;  %v5551_v35 = vsel %vm545_vm0, %v5514_v48, 0.0  ;;  %v7327_v40 = vld [vmem:[%s7997_s29 + $0x6c] ss:$0 sps:$4 sm:$0xcc]  }
 0x1ee   : > { %v5552_v43 = vadd.f32 %v5551_v35, %v5550_v5  ;;  %v7322_v35 = vld [vmem:[%s7997_s29 + $0x68] ss:$0 sps:$4 sm:$0x33]  }
 0x1f0   : > { %3367 = vrot.lane.b32.xlu0 %v3341_v36, %s7686_s1  ;;  %v5554_v18 = vadd.f32 %v5553_v8, %v5552_v43  ;;  %v5561_v36 = vsel %vm545_vm0, %v5519_v25, 0.0  ;;  %v5523_v8 = vunpack.c.h.bf16 %v439_v38  ;;  %v3344_v43 = vrot.slane %v7322_v35, 2 }
 0x1f1   : > { %3544 = vrot.lane.b32.xlu1 %v7301_v41, %s7682_s16  ;;  %6676 = vmatmul.mubr.msk.bf16.gmra.mrb[8].mxu0 %vm545_vm0, %v435_v10 }
 0x1f2   : > { %2546 = vmatmul.mubr.bf16.gmra.mrb[60].mxu1 %v2271_v54  ;;  %v7307_v54 = vld [vmem:[%s7997_s29 + $0x58] sm:$0xff]   ;;  %v5556_v29 = vadd.f32 %v5555_v20, %v5554_v18  ;;  %6679 = vmatprep.mubr.msk.bf16.mxu0 %vm545_vm0, %v437_v32  ;;  %v5569_v21 = vsel %vm545_vm0, %v5523_v8, 0.0 }
 0x1f4   : > { %3705 = vrot.lane.b32.xlu0 %v3679_v62, %s7683_s20  ;;  %v5558_v31 = vadd.f32 %v5557_v23, %v5556_v29  ;;  %v3681_v62 = vrot.slane %v7317_v33, 2  ;;  %v445_v33 = vld [vmem:[%s7997_s29 + $0x50] sm:$0xff]  }
 0x1f5   : > { %3369 = vrot.lane.b32.xlu1 %v3342_v1, %s7686_s1  ;;  %v5522_v1 = vunpack.c.l.bf16 %v439_v38 }
 0x1f6   : > { %v5560_v42 = vadd.f32 %v5559_v53, %v5558_v31  ;;  %v7330_v53 = vld [vmem:[%s7997_s29 + $0x14] ss:$0 sps:$4 sm:$0xcc]  }
 0x1f8   : > { %3546 = vrot.lane.b32.xlu0 %v7307_v54, %s7682_s16 }
 0x1f9   : > { %3707 = vrot.lane.b32.xlu1 %v3680_v9, %s7683_s20  ;;  %6680 = vmatmul.mubr.msk.bf16.gmra.mrb[12].mxu0 %vm545_vm0, %v439_v38  ;;  %v8842_v9 = vld [vmem:[%s7997_s29 + $0x48] sm:$0xff]  }
 0x1fa   : > { %v5527_v38 = vunpack.c.h.bf16 %v8842_v9 }
 0x1fc   : > { %3186 = vrot.lane.b32.xlu0 %v7310_v14, %s7687_s19  ;;  %v7305_v14 = vld [vmem:[#allocation9 + $0x10] sm:$0xff]  }
 0x1fd   : > { %3233 = vrot.lane.b32.xlu1 %v3229_v59, %s7688_s9 }
 0x200   : > { %3371 = vrot.lane.b32.xlu0 %v3343_v30, %s7686_s1  ;;  %v5526_v30 = vunpack.c.l.bf16 %v8842_v9 }
 0x201   : > { %3548 = vrot.lane.b32.xlu1 %v7315_v37, %s7682_s16 }
 0x204   : > { %3709 = vrot.lane.b32.xlu0 %v3681_v62, %s7683_s20 }
 0x21c   : > { %v2427_v44 = vpop.f32.mrb[0].mxu1 }
 0x21d   : > { %v2560_v50 = vmul.f32 %v8775_v39, %v2427_v44  ;;  %v2429_v51 = vpop.f32.mrb[1].mxu1 }
 0x21e   : > { %v2430_v55 = vpop.f32.mrb[2].mxu1  ;;  %v7321_v51 = vld [vmem:[%s7997_s29 + $0xc] ss:$0 sps:$4 sm:$0xcc]  }
 0x21f   : > { %v2596_v58 = vadd.f32 %v8782_v45, %v2560_v50  ;;  %v2561_v60 = vmul.f32 %v8775_v39, %v2430_v55  ;;  %v2432_v61 = vpop.f32.mrb[3].mxu1  ;;  %v5562_v50 = vadd.f32 %v5561_v36, %v5560_v42  ;;  %v7320_v55 = vld [vmem:[%s7997_s29 + $0x8] sm:$0xff]  }
 0x220   : > { %v5520_v61 = vunpack.c.l.bf16 %v437_v32  ;;  %3188 = vrot.lane.b32.xlu1 %v7320_v55, %s7687_s19 }
 0x221   : > { %v2597_v4 = vadd.f32 %v8782_v45, %v2561_v60  ;;  %v2628_v7 = vmax.f32 %v2596_v58, 0.0  ;;  %v3230_v58 = vrot.slane %v7321_v51, 2  ;;  %v7299_v60 = vld [vmem:[#allocation9 + $0x8] sm:$0xff]   ;;  %v5528_v51 = vunpack.c.l.bf16 %v445_v33 }
 0x222   : > { %v5563_v6 = vsel %vm545_vm0, %v5520_v61, 0.0  ;;  %v5577_v61 = vsel %vm545_vm0, %v5527_v38, 0.0 }
 0x223   : > { %v2629_v11 = vmax.f32 %v2597_v4, 0.0  ;;  %v441_v4 = vld [vmem:[%s7997_s29 + $0x40] sm:$0xff]   ;;  %3235 = vrot.lane.b32.xlu0 %v3230_v58, %s7688_s9  ;;  %v7335_v58 = vld [vmem:[%s7997_s29 + $0x74] ss:$0 sps:$4 sm:$0xcc]  }
 0x224   : > { %v2435_v15 = vpop.f32.mrb[4].mxu1  ;;  %3373 = vrot.lane.b32.xlu1 %v3344_v43, %s7686_s1  ;;  %6683 = vmatprep.mubr.msk.bf16.mxu0 %vm545_vm0, %v441_v4  ;;  %v5525_v29 = vunpack.c.h.bf16 %v441_v4 }
 0x225   : > { %v2562_v16 = vmul.f32 %v8775_v39, %v2435_v15  ;;  %v2437_v52 = vpop.f32.mrb[5].mxu1  ;;  %v2660_v17 = vpack.c.bf16 %v2629_v11, %v2628_v7  ;;  %v5565_v7 = vsel %vm545_vm0, %v5521_v63, 0.0  ;;  %v5564_v11 = vadd.f32 %v5563_v6, %v5562_v50  ;;  %6684 = vmatmul.mubr.msk.bf16.gmra.mrb[16].mxu0 %vm545_vm0, %v8842_v9  ;;  %v7324_v9 = vld [vmem:[#allocation9 + $0x28] sm:$0xff]  }
 0x226   : > { %v2438_v22 = vpop.f32.mrb[6].mxu1  ;;  %v5567_v15 = vsel %vm545_vm0, %v5522_v1, 0.0  ;;  %v5573_v37 = vsel %vm545_vm0, %v5525_v29, 0.0  ;;  %v5575_v50 = vsel %vm545_vm0, %v5526_v30, 0.0  ;;  %6687 = vmatprep.mubr.msk.bf16.mxu0 %vm545_vm0, %v445_v33  ;;  %v5529_v63 = vunpack.c.h.bf16 %v445_v33 }
 0x227   : > { %v2598_v26 = vadd.f32 %v8782_v45, %v2562_v16  ;;  %v2563_v27 = vmul.f32 %v8775_v39, %v2438_v22  ;;  %v2440_v28 = vpop.f32.mrb[7].mxu1  ;;  %6715 = vmatprep.mubr.bf16.mxu1 %v2660_v17  ;;  %v5566_v18 = vadd.f32 %v5565_v7, %v5564_v11  ;;  %3550 = vrot.lane.b32.xlu0 %v7325_v12, %s7682_s16  ;;  %v3682_v22 = vrot.slane %v7327_v40, 2 }
 0x228   : > { %v7312_v28 = vld [vmem:[#allocation9 + $0x18] sm:$0xff]   ;;  %v3683_v11 = vrot.slane %v7335_v58, 2 }
 0x229   : > { %v2599_v2 = vadd.f32 %v8782_v45, %v2563_v27  ;;  %v2630_v34 = vmax.f32 %v2598_v26, 0.0  ;;  %v5568_v59 = vadd.f32 %v5567_v15, %v5566_v18  ;;  %v5524_v26 = vunpack.c.l.bf16 %v441_v4  ;;  %v7328_v27 = vld [vmem:[%s7997_s29 + $0x10] sm:$0xff]   ;;  %3711 = vrot.lane.b32.xlu1 %v3682_v22, %s7683_s20  ;;  %v7340_v22 = vld [vmem:[%s7997_s29 + $0x1c] ss:$0 sps:$4 sm:$0xcc]  }
 0x22a   : > { %v5581_v15 = vsel %vm545_vm0, %v5529_v63, 0.0  ;;  %v3232_v29 = vrot.slane %v7340_v22, 2 }
 0x22b   : > { %v2631_v41 = vmax.f32 %v2599_v2, 0.0  ;;  %v5570_v31 = vadd.f32 %v5569_v21, %v5568_v59  ;;  %v5571_v32 = vsel %vm545_vm0, %v5524_v26, 0.0  ;;  %3190 = vrot.lane.b32.xlu0 %v7328_v27, %s7687_s19  ;;  %v7341_v59 = vld [vmem:[%s7997_s29 + $0x78] ss:$0 sps:$4 sm:$0x33]  }
 0x22c   : > { %v2443_v44 = vpop.f32.mrb[8].mxu1 }
 0x22d   : > { %v2661_v47 = vpack.c.bf16 %v2631_v41, %v2630_v34  ;;  %v2564_v48 = vmul.f32 %v8775_v39, %v2443_v44  ;;  %v2445_v49 = vpop.f32.mrb[9].mxu1  ;;  %v8866_v34 = vld [vmem:[%s7997_s29 + $0x58] sm:$0xff]   ;;  %v3348_v41 = vpop.permute.xlu0 %3347  ;;  %v5572_v62 = vadd.f32 %v5571_v32, %v5570_v31  ;;  %v7336_v32 = vld [vmem:[#allocation9 + $0x38] sm:$0xff]  }
 0x22e   : > { %v2446_v54 = vpop.f32.mrb[10].mxu1  ;;  %3396 = vst.msk [vmem:[#allocation2] sm:$0xc0] %vm3395_vm3, %v3348_v41  ;;  %v3525_v44 = vpop.permute.xlu1 %3524  ;;  %v7319_v49 = vld [vmem:[#allocation9 + $0x20] sm:$0xff]   ;;  %v5530_v1 = vunpack.c.l.bf16 %v8866_v34  ;;  %6688 = vmatmul.mubr.msk.bf16.gmra.mrb[20].mxu0 %vm545_vm0, %v8866_v34  ;;  %v5531_v40 = vunpack.c.h.bf16 %v8866_v34  ;;  %v3346_v34 = vrot.slane %v7341_v59, 2 }
 0x22f   : > { %v2600_v56 = vadd.f32 %v8782_v45, %v2564_v48  ;;  %v2565_v19 = vmul.f32 %v8775_v39, %v2446_v54  ;;  %v2448_v57 = vpop.f32.mrb[11].mxu1  ;;  %6716 = vmatmul.mubr.bf16.vlgmr.msra.gmra.mrb[64].mxu1 %v2661_v47  ;;  %v7332_v47 = vld [vmem:[%s7997_s29 + $0x70] ss:$0 sps:$4 sm:$0x33]   ;;  %3572 = vst.msk [vmem:[#allocation2] sm:$0xff] %vm1638_vm11, %v3525_v44 }
 0x230   : > { %4043 = vmatpush1.bf16.msra.mxu1 %v7291_v46  ;;  %v3231_v46 = vrot.slane %v7330_v53, 2  ;;  %v3345_v57 = vrot.slane %v7332_v47, 2  ;;  %3589 = vst.msk [vmem:[#allocation2] sm:$0x1c] %vm3588_vm12, %v7681_v0  ;;  %v5585_v30 = vsel %vm545_vm0, %v5531_v40, 0.0 }
 0x231   : > { %v2601_v3 = vadd.f32 %v8782_v45, %v2565_v19  ;;  %4044 = vmatprep.subr.bf16.mxu1 %v7681_v0  ;;  %v2632_v5 = vmax.f32 %v2600_v56, 0.0  ;;  %v5574_v19 = vadd.f32 %v5573_v37, %v5572_v62  ;;  %v3686_v35 = vpop.permute.xlu0 %3685  ;;  %3758 = vst.msk [vmem:[#allocation2] sm:$0x38] %vm3757_vm5, %v7681_v0  ;;  %v7344_v62 = vld [vmem:[%s7997_s29 + $0x7c] ss:$0 sps:$4 sm:$0xcc]  }
 0x232   : > { %3237 = vrot.lane.b32.xlu1 %v3231_v46, %s7688_s9  ;;  %3375 = vrot.lane.b32.xlu0 %v3345_v57, %s7686_s1  ;;  %v3784_v8 = vpop.permute.xlu1 %3783  ;;  %3734 = vst.msk [vmem:[#allocation2] sm:$0x3] %vm3733_vm10, %v3686_v35  ;;  %v3684_v57 = vrot.slane %v7344_v62, 2  ;;  %v7342_v35 = vld [vmem:[#allocation9 + $0x40] sm:$0xff]  }
 0x233   : > { %v2633_v10 = vmax.f32 %v2601_v3, 0.0  ;;  %v7334_v3 = vld [vmem:[%s7997_s29 + $0x70] sm:$0xff]   ;;  %v5576_v7 = vadd.f32 %v5575_v50, %v5574_v19  ;;  %3796 = vst.msk [vmem:[#allocation2] sm:$0xc0] %vm3795_vm13, %v3784_v8  ;;  %v455_v50 = vld [vmem:[%s7997_s29 + $0x78] sm:$0xff]  }
 0x234   : > { %v2451_v13 = vpop.f32.mrb[12].mxu1  ;;  %4045 = vmatpush1.bf16.msra.mxu1 %v7299_v60 }
 0x235   : > { %v2566_v16 = vmul.f32 %v8775_v39, %v2451_v13  ;;  %v2453_v52 = vpop.f32.mrb[13].mxu1  ;;  %v2662_v17 = vpack.c.bf16 %v2633_v10, %v2632_v5  ;;  %4046 = vmatprep.subr.bf16.mxu1 %v7681_v0  ;;  %v5579_v10 = vsel %vm545_vm0, %v5528_v51, 0.0  ;;  %v5578_v13 = vadd.f32 %v5577_v61, %v5576_v7  ;;  %v8935_v51 = vld [vmem:[#allocation2 + $0x8] sm:$0xff] }
 0x236   : > { %v2454_v20 = vpop.f32.mrb[14].mxu1  ;;  %3552 = vrot.lane.b32.xlu1 %v7334_v3, %s7682_s16  ;;  %v7337_v52 = vld [vmem:[%s7997_s29 + $0x18] sm:$0xff]   ;;  %3713 = vrot.lane.b32.xlu0 %v3683_v11, %s7683_s20  ;;  %v3350_v21 = vpop.permute.xlu1 %3349  ;;  %4811 = vst.msk [vmem:[#allocation2 + $0x8] sm:$0x3] %vm3885_vm7, %v7681_v0 }
 0x237   : > { %v2602_v23 = vadd.f32 %v8782_v45, %v2566_v16  ;;  %v2567_v24 = vmul.f32 %v8775_v39, %v2454_v20  ;;  %v2456_v25 = vpop.f32.mrb[15].mxu1  ;;  %6719 = vmatprep.mubr.bf16.mxu1 %v2662_v17  ;;  %v3835_v16 = vpop.permute.xlu0 %3834  ;;  %v8903_v17 = vld [vmem:[%s7997_s29 + $0x68] sm:$0xff]   ;;  %v5580_v20 = vadd.f32 %v5579_v10, %v5578_v13  ;;  %3397 = vst.msk [vmem:[#allocation2 + $0x10] sm:$0xc0] %vm3395_vm3, %v3350_v21  ;;  %v5538_v13 = vunpack.c.l.bf16 %v455_v50 }
 0x238   : > { %4047 = vmatpush1.bf16.msra.mxu1 %v7305_v14  ;;  %v449_v14 = vld [vmem:[%s7997_s29 + $0x60] sm:$0xff]   ;;  %3846 = vst.msk [vmem:[#allocation2] sm:$0xff] %vm2006_vm2, %v3835_v16  ;;  %v5534_v41 = vunpack.c.l.bf16 %v8903_v17  ;;  %v5539_v16 = vunpack.c.h.bf16 %v455_v50 }
 0x239   : > { %v2603_v2 = vadd.f32 %v8782_v45, %v2567_v24  ;;  %4048 = vmatprep.subr.bf16.mxu1 %v7681_v0  ;;  %v2634_v36 = vmax.f32 %v2602_v23, 0.0  ;;  %v7329_v23 = vld [vmem:[#allocation9 + $0x30] sm:$0xff]   ;;  %v5583_v24 = vsel %vm545_vm0, %v5530_v1, 0.0  ;;  %6691 = vmatprep.mubr.msk.bf16.mxu0 %vm545_vm0, %v449_v14  ;;  %v5532_v25 = vunpack.c.l.bf16 %v449_v14 }
 0x23a   : > { %v5582_v27 = vadd.f32 %v5581_v15, %v5580_v20  ;;  %3192 = vrot.lane.b32.xlu1 %v7337_v52, %s7687_s19  ;;  %v3688_v33 = vpop.permute.xlu1 %3687  ;;  %3239 = vrot.lane.b32.xlu0 %v3232_v29, %s7688_s9  ;;  %v5591_v1 = vsel %vm545_vm0, %v5534_v41, 0.0  ;;  %v5599_v22 = vsel %vm545_vm0, %v5538_v13, 0.0  ;;  %s9959_s9 = sld [smem:[#allocation21_spill]] }
 0x23b   : > { %v2635_v42 = vmax.f32 %v2603_v2, 0.0  ;;  %v3527_v53 = vpop.permute.xlu0 %3526  ;;  %v5587_v38 = vsel %vm545_vm0, %v5532_v25, 0.0  ;;  %6692 = vmatmul.mubr.msk.bf16.gmra.mrb[24].mxu0 %vm545_vm0, %v8903_v17 }
 0x23c   : > { %v2459_v48 = vpop.f32.mrb[16].mxu1  ;;  %4049 = vmatpush1.bf16.msra.mxu1 %v7312_v28  ;;  %v5533_v28 = vunpack.c.h.bf16 %v449_v14  ;;  %v5584_v31 = vadd.f32 %v5583_v24, %v5582_v27  ;;  %3573 = vst.msk [vmem:[#allocation2 + $0x10] sm:$0xff] %vm1638_vm11, %v3527_v53  ;;  %v8958_v14 = vld [vmem:[#allocation2 + $0x18] sm:$0xff] }
 0x23d   : > { %v2568_v54 = vmul.f32 %v8775_v39, %v2459_v48  ;;  %v2461_v55 = vpop.f32.mrb[17].mxu1  ;;  %v2663_v56 = vpack.c.bf16 %v2635_v42, %v2634_v36  ;;  %4050 = vmatprep.subr.bf16.mxu1 %v7681_v0  ;;  %3590 = vst.msk [vmem:[#allocation2 + $0x10] sm:$0x1c] %vm3588_vm12, %v7681_v0  ;;  %v7343_v42 = vld [vmem:[%s7997_s29 + $0x78] sm:$0xff]   ;;  %v5535_v48 = vunpack.c.h.bf16 %v8903_v17 }
 0x23e   : > { %v2462_v60 = vpop.f32.mrb[18].mxu1  ;;  %3735 = vst.msk [vmem:[#allocation2 + $0x10] sm:$0x3] %vm3733_vm10, %v3688_v33  ;;  %v5586_v46 = vadd.f32 %v5585_v30, %v5584_v31  ;;  %v5589_v47 = vsel %vm545_vm0, %v5533_v28, 0.0  ;;  %3377 = vrot.lane.b32.xlu1 %v3346_v34, %s7686_s1  ;;  %v3837_v61 = vpop.permute.xlu1 %3836  ;;  %3554 = vrot.lane.b32.xlu0 %v7343_v42, %s7682_s16  ;;  %v8980_v31 = vld [vmem:[#allocation2 + $0x28] sm:$0xff] }
 0x23f   : > { %v2604_v4 = vadd.f32 %v8782_v45, %v2568_v54  ;;  %v2569_v5 = vmul.f32 %v8775_v39, %v2462_v60  ;;  %v2464_v6 = vpop.f32.mrb[19].mxu1  ;;  %6720 = vmatmul.mubr.bf16.gmra.mrb[68].mxu1 %v2663_v56  ;;  %3759 = vst.msk [vmem:[#allocation2 + $0x10] sm:$0x38] %vm3757_vm5, %v7681_v0  ;;  %v3786_v19 = vpop.permute.xlu0 %3785  ;;  %v8941_v58 = vld [vmem:[#allocation2] sm:$0xff]  ;;  %v5593_v7 = vsel %vm545_vm0, %v5535_v48, 0.0 }
 0x240   : > { %4051 = vmatpush1.bf16.msra.mxu1 %v7319_v49  ;;  %v453_v49 = vld [vmem:[%s7997_s29 + $0x70] sm:$0xff]   ;;  %v5588_v60 = vadd.f32 %v5587_v38, %v5586_v46  ;;  %3797 = vst.msk [vmem:[#allocation2 + $0x10] sm:$0xc0] %vm3795_vm13, %v3786_v19  ;;  %v8999_v46 = vld [vmem:[#allocation2 + $0x38] sm:$0xff] }
 0x241   : > { %v2636_v43 = vmax.f32 %v2604_v4, 0.0  ;;  %v2605_v12 = vadd.f32 %v8782_v45, %v2569_v5  ;;  %4052 = vmatprep.subr.bf16.mxu1 %v7681_v0  ;;  %4595 = vst.msk [vmem:[#allocation2] sm:$0xc0] %vm3395_vm3, %v7681_v0  ;;  %6695 = vmatprep.mubr.msk.bf16.mxu0 %vm545_vm0, %v453_v49  ;;  %v5536_v3 = vunpack.c.l.bf16 %v453_v49  ;;  %v5537_v8 = vunpack.c.h.bf16 %v453_v49 }
 0x242   : > { %3847 = vst.msk [vmem:[#allocation2 + $0x10] sm:$0xff] %vm2006_vm2, %v3837_v61  ;;  %v5590_v4 = vadd.f32 %v5589_v47, %v5588_v60  ;;  %3715 = vrot.lane.b32.xlu1 %v3684_v57, %s7683_s20  ;;  %v3529_v11 = vpop.permute.xlu1 %3528 }
 0x243   : > { %v2637_v18 = vmax.f32 %v2605_v12, 0.0  ;;  %v5595_v12 = vsel %vm545_vm0, %v5536_v3, 0.0  ;;  %6696 = vmatmul.mubr.msk.bf16.gmra.mrb[28].mxu0 %vm545_vm0, %v455_v50  ;;  %4812 = vst.msk [vmem:[#allocation2 + $0x18] sm:$0x3] %vm3885_vm7, %v7681_v0  ;;  %v5597_v40 = vsel %vm545_vm0, %v5537_v8, 0.0 }
 0x244   : > { %4053 = vmatpush1.bf16.msra.mxu1 %v7324_v9  ;;  %v3352_v9 = vpop.permute.xlu0 %3351  ;;  %v5592_v10 = vadd.f32 %v5591_v1, %v5590_v4  ;;  %4813 = vst.msk [vmem:[#allocation2 + $0x28] sm:$0x3] %vm3885_vm7, %v7681_v0  ;;  %4814 = vst.msk [vmem:[#allocation2 + $0x38] sm:$0x3] %vm3885_vm7, %v7681_v0  ;;  %vm3208_vm7 = vcmask 389378  }
 0x245   : > { %v2664_v26 = vpack.c.bf16 %v2637_v18, %v2636_v43  ;;  %4054 = vmatprep.subr.bf16.mxu1 %v7681_v0  ;;  %v2467_v2 = vpop.f32.mrb[20].mxu1  ;;  %3398 = vst.msk [vmem:[#allocation2 + $0x20] sm:$0xc0] %vm3395_vm3, %v3352_v9 }
 0x246   : > { %v2570_v36 = vmul.f32 %v8775_v39, %v2467_v2  ;;  %v2469_v37 = vpop.f32.mrb[21].mxu1  ;;  %3574 = vst.msk [vmem:[#allocation2 + $0x20] sm:$0xff] %vm1638_vm11, %v3529_v11  ;;  %v5594_v15 = vadd.f32 %v5593_v7, %v5592_v10  ;;  %v3788_v18 = vpop.permute.xlu1 %3787 }
 0x247   : > { %6723 = vmatprep.mubr.bf16.mxu1 %v2664_v26  ;;  %v2470_v44 = vpop.f32.mrb[22].mxu1  ;;  %3591 = vst.msk [vmem:[#allocation2 + $0x20] sm:$0x1c] %vm3588_vm12, %v7681_v0  ;;  %v5601_v26 = vsel %vm545_vm0, %v5539_v16, 0.0 }
 0x248   : > { %4055 = vmatpush1.bf16.msra.mxu1 %v7329_v23  ;;  %v2606_v54 = vadd.f32 %v8782_v45, %v2570_v36  ;;  %v2571_v55 = vmul.f32 %v8775_v39, %v2470_v44  ;;  %v2472_v56 = vpop.f32.mrb[23].mxu1  ;;  %3760 = vst.msk [vmem:[#allocation2 + $0x20] sm:$0x38] %vm3757_vm5, %v7681_v0  ;;  %v3690_v52 = vpop.permute.xlu0 %3689  ;;  %v5596_v17 = vadd.f32 %v5595_v12, %v5594_v15 }
 0x249   : > { %4056 = vmatprep.subr.bf16.mxu1 %v7681_v0  ;;  %3736 = vst.msk [vmem:[#allocation2 + $0x20] sm:$0x3] %vm3733_vm10, %v3690_v52  ;;  %v8968_v20 = vld [vmem:[#allocation2 + $0x10] sm:$0xff] }
 0x24a   : > { %v2607_v63 = vadd.f32 %v8782_v45, %v2571_v55  ;;  %v2638_v5 = vmax.f32 %v2606_v54, 0.0  ;;  %3798 = vst.msk [vmem:[#allocation2 + $0x20] sm:$0xc0] %vm3795_vm13, %v3788_v18  ;;  %v5598_v25 = vadd.f32 %v5597_v40, %v5596_v17  ;;  %v3354_v2 = vpop.permute.xlu1 %3353 }
 0x24b   : > { %4596 = vst.msk [vmem:[#allocation2 + $0x10] sm:$0xc0] %vm3395_vm3, %v7681_v0  ;;  %3399 = vst.msk [vmem:[#allocation2 + $0x30] sm:$0xc0] %vm3395_vm3, %v3354_v2 }
 0x24c   : > { %4057 = vmatpush1.bf16.msra.mxu1 %v7336_v32  ;;  %v2639_v6 = vmax.f32 %v2607_v63, 0.0  ;;  %v3839_v27 = vpop.permute.xlu0 %3838  ;;  %v5600_v53 = vadd.f32 %v5599_v22, %v5598_v25 }
 0x24d   : > { %4058 = vmatprep.subr.bf16.mxu1 %v7681_v0  ;;  %3848 = vst.msk [vmem:[#allocation2 + $0x20] sm:$0xff] %vm2006_vm2, %v3839_v27 }
 0x24e   : > { %v2665_v43 = vpack.c.bf16 %v2639_v6, %v2638_v5  ;;  %v8983_v34 = vadd.f32 %v5601_v26, %v5600_v53  ;;  %v3692_v38 = vpop.permute.xlu1 %3691 }
 0x250   : > { %4059 = vmatpush1.bf16.msra.mxu1 %v7342_v35  ;;  %v3531_v36 = vpop.permute.xlu0 %3530 }
 0x251   : > { %6724 = vmatmul.mubr.bf16.gmra.mrb[72].mxu1 %v2665_v43  ;;  %3575 = vst.msk [vmem:[#allocation2 + $0x30] sm:$0xff] %vm1638_vm11, %v3531_v36 }
 0x252   : > { %3592 = vst.msk [vmem:[#allocation2 + $0x30] sm:$0x1c] %vm3588_vm12, %v7681_v0  ;;  %v3841_v44 = vpop.permute.xlu1 %3840 }
 0x253   : > { %v2475_v21 = vpop.f32.mrb[24].mxu1  ;;  %3737 = vst.msk [vmem:[#allocation2 + $0x30] sm:$0x3] %vm3733_vm10, %v3692_v38 }
 0x254   : > { %v2572_v23 = vmul.f32 %v8775_v39, %v2475_v21  ;;  %v2477_v24 = vpop.f32.mrb[25].mxu1  ;;  %3761 = vst.msk [vmem:[#allocation2 + $0x30] sm:$0x38] %vm3757_vm5, %v7681_v0  ;;  %v3790_v42 = vpop.permute.xlu0 %3789  ;;  %v8993_v62 = vld [vmem:[#allocation2 + $0x20] sm:$0xff] }
 0x255   : > { %v2478_v59 = vpop.f32.mrb[26].mxu1  ;;  %3799 = vst.msk [vmem:[#allocation2 + $0x30] sm:$0xc0] %vm3795_vm13, %v3790_v42 }
 0x256   : > { %v2608_v28 = vadd.f32 %v8782_v45, %v2572_v23  ;;  %v2573_v29 = vmul.f32 %v8775_v39, %v2478_v59  ;;  %v2480_v30 = vpop.f32.mrb[27].mxu1  ;;  %4597 = vst.msk [vmem:[#allocation2 + $0x20] sm:$0xc0] %vm3395_vm3, %v7681_v0  ;;  %v3533_v54 = vpop.permute.xlu1 %3532 }
 0x257   : > { %3849 = vst.msk [vmem:[#allocation2 + $0x30] sm:$0xff] %vm2006_vm2, %v3841_v44 }
 0x258   : > { %v2640_v32 = vmax.f32 %v2608_v28, 0.0  ;;  %v2609_v33 = vadd.f32 %v8782_v45, %v2573_v29  ;;  %v3356_v47 = vpop.permute.xlu0 %3355 }
 0x259   : > { %3400 = vst.msk [vmem:[#allocation2 + $0x40] sm:$0xc0] %vm3395_vm3, %v3356_v47 }
 0x25a   : > { %v2641_v37 = vmax.f32 %v2609_v33, 0.0  ;;  %3576 = vst.msk [vmem:[#allocation2 + $0x40] sm:$0xff] %vm1638_vm11, %v3533_v54  ;;  %v3358_v3 = vpop.permute.xlu1 %3357 }
 0x25b   : > { %3593 = vst.msk [vmem:[#allocation2 + $0x40] sm:$0x1c] %vm3588_vm12, %v7681_v0 }
 0x25c   : > { %v2666_v41 = vpack.c.bf16 %v2641_v37, %v2640_v32  ;;  %v3694_v60 = vpop.permute.xlu0 %3693  ;;  %3751 = vst.msk [vmem:[#allocation2 + $0x40] sm:$0xf8] %vm1995_vm15, %v7681_v0 }
 0x25d   : > { %3738 = vst.msk [vmem:[#allocation2 + $0x40] sm:$0x3] %vm3733_vm10, %v3694_v60 }
 0x25e   : > { %6727 = vmatprep.mubr.bf16.mxu1 %v2666_v41  ;;  %v9013_v61 = vld [vmem:[#allocation2 + $0x30] sm:$0xff]  ;;  %3800 = vst.msk [vmem:[#allocation2 + $0x40] sm:$0xff] %vm2006_vm2, %v7681_v0  ;;  %v3696_v6 = vpop.permute.xlu1 %3695 }
 0x25f   : > { %4598 = vst.msk [vmem:[#allocation2 + $0x30] sm:$0xc0] %vm3395_vm3, %v7681_v0  ;;  %3401 = vst.msk [vmem:[#allocation2 + $0x50] sm:$0xc0] %vm3395_vm3, %v3358_v3 }
 0x260   : > { %v3535_v4 = vpop.permute.xlu0 %3534 }
 0x261   : > { %3577 = vst.msk [vmem:[#allocation2 + $0x50] sm:$0xff] %vm1638_vm11, %v3535_v4 }
 0x262   : > { %3594 = vst.msk [vmem:[#allocation2 + $0x50] sm:$0x1c] %vm3588_vm12, %v7681_v0  ;;  %v3537_v40 = vpop.permute.xlu1 %3536 }
 0x263   : > { %v2483_v48 = vpop.f32.mrb[28].mxu1  ;;  %3752 = vst.msk [vmem:[#allocation2 + $0x50] sm:$0xf8] %vm1995_vm15, %v7681_v0 }
 0x264   : > { %v2574_v49 = vmul.f32 %v8775_v39, %v2483_v48  ;;  %v2485_v50 = vpop.f32.mrb[29].mxu1  ;;  %3739 = vst.msk [vmem:[#allocation2 + $0x50] sm:$0x3] %vm3733_vm10, %v3696_v6  ;;  %v3360_v43 = vpop.permute.xlu0 %3359 }
 0x265   : > { %v2486_v55 = vpop.f32.mrb[30].mxu1  ;;  %v9027_v7 = vld [vmem:[#allocation2 + $0x40] sm:$0xff]  ;;  %3801 = vst.msk [vmem:[#allocation2 + $0x50] sm:$0xff] %vm2006_vm2, %v7681_v0 }
 0x266   : > { %v2610_v56 = vadd.f32 %v8782_v45, %v2574_v49  ;;  %v2575_v19 = vmul.f32 %v8775_v39, %v2486_v55  ;;  %v2488_v57 = vpop.f32.mrb[31].mxu1  ;;  %4599 = vst.msk [vmem:[#allocation2 + $0x40] sm:$0xc0] %vm3395_vm3, %v7681_v0  ;;  %3402 = vst.msk [vmem:[#allocation2 + $0x60] sm:$0xc0] %vm3395_vm3, %v3360_v43  ;;  %v3362_v23 = vpop.permute.xlu1 %3361 }
 0x267   : > { %3578 = vst.msk [vmem:[#allocation2 + $0x60] sm:$0xff] %vm1638_vm11, %v3537_v40 }
 0x268   : > { %v2611_v63 = vadd.f32 %v8782_v45, %v2575_v19  ;;  %v2642_v1 = vmax.f32 %v2610_v56, 0.0  ;;  %v3698_v17 = vpop.permute.xlu0 %3697  ;;  %3595 = vst.msk [vmem:[#allocation2 + $0x60] sm:$0x1c] %vm3588_vm12, %v7681_v0 }
 0x269   : > { %3740 = vst.msk [vmem:[#allocation2 + $0x60] sm:$0x3] %vm3733_vm10, %v3698_v17 }
 0x26a   : > { %v2643_v35 = vmax.f32 %v2611_v63, 0.0  ;;  %3753 = vst.msk [vmem:[#allocation2 + $0x60] sm:$0xf8] %vm1995_vm15, %v7681_v0  ;;  %v3700_v25 = vpop.permute.xlu1 %3699 }
 0x26b   : > { %3802 = vst.msk [vmem:[#allocation2 + $0x60] sm:$0xff] %vm2006_vm2, %v7681_v0 }
 0x26c   : > { %v2667_v5 = vpack.c.bf16 %v2643_v35, %v2642_v1  ;;  %v9044_v21 = vld [vmem:[#allocation2 + $0x50] sm:$0xff]  ;;  %v3539_v24 = vpop.permute.xlu0 %3538  ;;  %3403 = vst.msk [vmem:[#allocation2 + $0x70] sm:$0xc0] %vm3395_vm3, %v3362_v23 }
 0x26d   : > { %4600 = vst.msk [vmem:[#allocation2 + $0x50] sm:$0xc0] %vm3395_vm3, %v7681_v0 }
 0x26e   : > { %6728 = vmatmul.mubr.bf16.gmra.mrb[76].mxu1 %v2667_v5  ;;  %3579 = vst.msk [vmem:[#allocation2 + $0x70] sm:$0xff] %vm1638_vm11, %v3539_v24  ;;  %v3541_v33 = vpop.permute.xlu1 %3540 }
 0x26f   : > { %3596 = vst.msk [vmem:[#allocation2 + $0x70] sm:$0x1c] %vm3588_vm12, %v7681_v0 }
 0x270   : > { %3754 = vst.msk [vmem:[#allocation2 + $0x70] sm:$0xf8] %vm1995_vm15, %v7681_v0  ;;  %v3364_v26 = vpop.permute.xlu0 %3363 }
 0x271   : > { %3741 = vst.msk [vmem:[#allocation2 + $0x70] sm:$0x3] %vm3733_vm10, %v3700_v25 }
 0x272   : > { %v2491_v8 = vpop.f32.mrb[32].mxu1  ;;  %v9057_v27 = vld [vmem:[#allocation2 + $0x60] sm:$0xff]  ;;  %3803 = vst.msk [vmem:[#allocation2 + $0x70] sm:$0xff] %vm2006_vm2, %v7681_v0  ;;  %v3366_v42 = vpop.permute.xlu1 %3365 }
 0x273   : > { %v2576_v9 = vmul.f32 %v8775_v39, %v2491_v8  ;;  %v2493_v10 = vpop.f32.mrb[33].mxu1  ;;  %3404 = vst.msk [vmem:[#allocation2 + $0x80] sm:$0xc0] %vm3395_vm3, %v3364_v26  ;;  %4601 = vst.msk [vmem:[#allocation2 + $0x60] sm:$0xc0] %vm3395_vm3, %v7681_v0 }
 0x274   : > { %v2494_v11 = vpop.f32.mrb[34].mxu1  ;;  %3580 = vst.msk [vmem:[#allocation2 + $0x80] sm:$0xff] %vm1638_vm11, %v3541_v33  ;;  %v3702_v36 = vpop.permute.xlu0 %3701 }
 0x275   : > { %v2612_v12 = vadd.f32 %v8782_v45, %v2576_v9  ;;  %v2577_v13 = vmul.f32 %v8775_v39, %v2494_v11  ;;  %v2496_v15 = vpop.f32.mrb[35].mxu1  ;;  %3597 = vst.msk [vmem:[#allocation2 + $0x80] sm:$0x1c] %vm3588_vm12, %v7681_v0 }
 0x276   : > { %3742 = vst.msk [vmem:[#allocation2 + $0x80] sm:$0x3] %vm3733_vm10, %v3702_v36  ;;  %v3704_v50 = vpop.permute.xlu1 %3703  ;;  %v9140_v36 = vld [vmem:[%s9933_s8 + $0x1] ss:$0 sm:$0xff] }
 0x277   : > { %v2644_v16 = vmax.f32 %v2612_v12, 0.0  ;;  %v2613_v52 = vadd.f32 %v8782_v45, %v2577_v13  ;;  %3755 = vst.msk [vmem:[#allocation2 + $0x80] sm:$0xf8] %vm1995_vm15, %v7681_v0 }
 0x278   : > { %3804 = vst.msk [vmem:[#allocation2 + $0x80] sm:$0xff] %vm2006_vm2, %v7681_v0  ;;  %v3543_v44 = vpop.permute.xlu0 %3542 }
 0x279   : > { %v2645_v18 = vmax.f32 %v2613_v52, 0.0  ;;  %3405 = vst.msk [vmem:[#allocation2 + $0x90] sm:$0xc0] %vm3395_vm3, %v3366_v42  ;;  %v9077_v47 = vld [vmem:[#allocation2 + $0x70] sm:$0xff] }
 0x27a   : > { %3581 = vst.msk [vmem:[#allocation2 + $0x90] sm:$0xff] %vm1638_vm11, %v3543_v44  ;;  %v3545_v35 = vpop.permute.xlu1 %3544 }
 0x27b   : > { %v2668_v22 = vpack.c.bf16 %v2645_v18, %v2644_v16  ;;  %4602 = vst.msk [vmem:[#allocation2 + $0x70] sm:$0xc0] %vm3395_vm3, %v7681_v0 }
 0x27c   : > { %3598 = vst.msk [vmem:[#allocation2 + $0x90] sm:$0x1c] %vm3588_vm12, %v7681_v0  ;;  %v3368_v56 = vpop.permute.xlu0 %3367 }
 0x27d   : > { %6731 = vmatprep.mubr.bf16.mxu1 %v2668_v22  ;;  %3756 = vst.msk [vmem:[#allocation2 + $0x90] sm:$0xf8] %vm1995_vm15, %v7681_v0  ;;  %vm3245_vm15 = vcmask 386304  }
 0x27e   : > { %3743 = vst.msk [vmem:[#allocation2 + $0x90] sm:$0x3] %vm3733_vm10, %v3704_v50  ;;  %v3370_v9 = vpop.permute.xlu1 %3369 }
 0x27f   : > { %3805 = vst.msk [vmem:[#allocation2 + $0x90] sm:$0xff] %vm2006_vm2, %v7681_v0  ;;  %v9093_v1 = vld [vmem:[#allocation2 + $0x80] sm:$0xff] }
 0x280   : > { %3406 = vst.msk [vmem:[#allocation2 + $0xa0] sm:$0xc0] %vm3395_vm3, %v3368_v56  ;;  %4603 = vst.msk [vmem:[#allocation2 + $0x80] sm:$0xc0] %vm3395_vm3, %v7681_v0  ;;  %v3706_v5 = vpop.permute.xlu0 %3705 }
 0x281   : > { %v2499_v59 = vpop.f32.mrb[36].mxu1  ;;  %3582 = vst.msk [vmem:[#allocation2 + $0xa0] sm:$0xff] %vm1638_vm11, %v3545_v35 }
 0x282   : > { %v2578_v28 = vmul.f32 %v8775_v39, %v2499_v59  ;;  %v2501_v29 = vpop.f32.mrb[37].mxu1  ;;  %3599 = vst.msk [vmem:[#allocation2 + $0xa0] sm:$0x1c] %vm3588_vm12, %v7681_v0  ;;  %v3708_v40 = vpop.permute.xlu1 %3707 }
 0x283   : > { %v2502_v30 = vpop.f32.mrb[38].mxu1  ;;  %3744 = vst.msk [vmem:[#allocation2 + $0xa0] sm:$0x3] %vm3733_vm10, %v3706_v5  ;;  %v9129_v29 = vld [vmem:[%s9932_s7 + $0x1] ss:$0 sm:$0xff] }
 0x284   : > { %v2614_v53 = vadd.f32 %v8782_v45, %v2578_v28  ;;  %v2579_v2 = vmul.f32 %v8775_v39, %v2502_v30  ;;  %v2504_v32 = vpop.f32.mrb[39].mxu1  ;;  %v3547_v10 = vpop.permute.xlu0 %3546  ;;  %3407 = vst.msk [vmem:[#allocation2 + $0xb0] sm:$0xc0] %vm3395_vm3, %v3370_v9 }
 0x285   : > { %3583 = vst.msk [vmem:[#allocation2 + $0xb0] sm:$0xff] %vm1638_vm11, %v3547_v10 }
 0x286   : > { %v2615_v37 = vadd.f32 %v8782_v45, %v2579_v2  ;;  %v2646_v38 = vmax.f32 %v2614_v53, 0.0  ;;  %v9104_v43 = vld [vmem:[#allocation2 + $0x90] sm:$0xff]  ;;  %3600 = vst.msk [vmem:[#allocation2 + $0xb0] sm:$0x1c] %vm3588_vm12, %v7681_v0  ;;  %v3234_v25 = vpop.permute.xlu1 %3233 }
 0x287   : > { %4604 = vst.msk [vmem:[#allocation2 + $0x90] sm:$0xc0] %vm3395_vm3, %v7681_v0 }
 0x288   : > { %v2647_v41 = vmax.f32 %v2615_v37, 0.0  ;;  %3745 = vst.msk [vmem:[#allocation2 + $0xb0] sm:$0x3] %vm3733_vm10, %v3708_v40  ;;  %v3187_v22 = vpop.permute.xlu0 %3186 }
 0x289   : > { %3198 = vst.msk [vmem:[#allocation2 + $0xc0] sm:$0xff] %vm1012_vm1, %v3187_v22 }
 0x28a   : > { %v2669_v48 = vpack.c.bf16 %v2647_v41, %v2646_v38  ;;  %v9111_v16 = vld [vmem:[#allocation2 + $0xa0] sm:$0xff]  ;;  %3209 = vst.msk [vmem:[#allocation2 + $0xc0] sm:$0x1c] %vm3208_vm7, %v7681_v0  ;;  %v3549_v53 = vpop.permute.xlu1 %3548 }
 0x28b   : > { %4605 = vst.msk [vmem:[#allocation2 + $0xa0] sm:$0xc0] %vm3395_vm3, %v7681_v0 }
 0x28c   : > { %6732 = vmatmul.mubr.bf16.gmra.mrb[80].mxu1 %v2669_v48  ;;  %3263 = vst.msk [vmem:[#allocation2 + $0xc0] sm:$0x38] %vm3250_vm4, %v7681_v0  ;;  %v3372_v59 = vpop.permute.xlu0 %3371 }
 0x28d   : > { %3246 = vst.msk [vmem:[#allocation2 + $0xc0] sm:$0x3] %vm3245_vm15, %v3234_v25 }
 0x28e   : > { %v2507_v49 = vpop.f32.mrb[40].mxu1  ;;  %3408 = vst.msk [vmem:[#allocation2 + $0xc0] sm:$0xc0] %vm3395_vm3, %v3372_v59 }
 0x28f   : > { %v2580_v54 = vmul.f32 %v8775_v39, %v2507_v49  ;;  %v2509_v55 = vpop.f32.mrb[41].mxu1  ;;  %v9132_v2 = vld [vmem:[#allocation2 + $0xb0] sm:$0xff]  ;;  %3584 = vst.msk [vmem:[#allocation2 + $0xc0] sm:$0xff] %vm1638_vm11, %v3549_v53 }
 0x290   : > { %v2510_v19 = vpop.f32.mrb[42].mxu1  ;;  %v3710_v33 = vpop.permute.xlu0 %3709  ;;  %4606 = vst.msk [vmem:[#allocation2 + $0xb0] sm:$0xc0] %vm3395_vm3, %v7681_v0 }
 0x291   : > { %v2616_v57 = vadd.f32 %v8782_v45, %v2580_v54  ;;  %v2581_v60 = vmul.f32 %v8775_v39, %v2510_v19  ;;  %v2512_v63 = vpop.f32.mrb[43].mxu1  ;;  %3601 = vst.msk [vmem:[#allocation2 + $0xc0] sm:$0x1c] %vm3588_vm12, %v7681_v0 }
 0x292   : > { %3746 = vst.msk [vmem:[#allocation2 + $0xc0] sm:$0x3] %vm3733_vm10, %v3710_v33  ;;  %v3189_v48 = vpop.permute.xlu1 %3188 }
 0x293   : > { %v2648_v3 = vmax.f32 %v2616_v57, 0.0  ;;  %v2617_v4 = vadd.f32 %v8782_v45, %v2581_v60  ;;  %3199 = vst.msk [vmem:[#allocation2 + $0xd0] sm:$0xff] %vm1012_vm1, %v3189_v48 }
 0x294   : > { %3210 = vst.msk [vmem:[#allocation2 + $0xd0] sm:$0x1c] %vm3208_vm7, %v7681_v0 }
 0x295   : > { %v2649_v6 = vmax.f32 %v2617_v4, 0.0  ;;  %v3236_v49 = vpop.permute.xlu0 %3235  ;;  %3264 = vst.msk [vmem:[#allocation2 + $0xd0] sm:$0x38] %vm3250_vm4, %v7681_v0 }
 0x296   : > { %3247 = vst.msk [vmem:[#allocation2 + $0xd0] sm:$0x3] %vm3245_vm15, %v3236_v49  ;;  %v3374_v55 = vpop.permute.xlu1 %3373 }
 0x297   : > { %v2670_v8 = vpack.c.bf16 %v2649_v6, %v2648_v3  ;;  %3409 = vst.msk [vmem:[#allocation2 + $0xd0] sm:$0xc0] %vm3395_vm3, %v3374_v55 }
 0x299   : > { %6735 = vmatprep.mubr.bf16.mxu1 %v2670_v8  ;;  %v3551_v56 = vpop.permute.xlu0 %3550  ;;  %v9155_v19 = vld [vmem:[#allocation2 + $0xc0] sm:$0xff] }
 0x29a   : > { %v2515_v11 = vpop.f32.mrb[44].mxu1  ;;  %3585 = vst.msk [vmem:[#allocation2 + $0xd0] sm:$0xff] %vm1638_vm11, %v3551_v56 }
 0x29b   : > { %v2582_v12 = vmul.f32 %v8775_v39, %v2515_v11  ;;  %v2517_v13 = vpop.f32.mrb[45].mxu1  ;;  %4583 = vst.msk [vmem:[#allocation2 + $0xc0] sm:$0xc0] %vm3147_vm14, %v7681_v0  ;;  %v3712_v3 = vpop.permute.xlu1 %3711 }
 0x29c   : > { %v2518_v15 = vpop.f32.mrb[46].mxu1  ;;  %3602 = vst.msk [vmem:[#allocation2 + $0xd0] sm:$0x1c] %vm3588_vm12, %v7681_v0 }
 0x29d   : > { %v2618_v52 = vadd.f32 %v8782_v45, %v2582_v12  ;;  %v2583_v17 = vmul.f32 %v8775_v39, %v2518_v15  ;;  %v2520_v18 = vpop.f32.mrb[47].mxu1  ;;  %4587 = vst.msk [vmem:[#allocation2 + $0xc0] sm:$0xff] %vm1012_vm1, %v7681_v0  ;;  %v3191_v8 = vpop.permute.xlu0 %3190 }
 0x29e   : > { %4591 = vst.msk [vmem:[#allocation2 + $0xc0] sm:$0x3] %vm3245_vm15, %v7681_v0 }
 0x29f   : > { %v2650_v23 = vmax.f32 %v2618_v52, 0.0  ;;  %v2619_v24 = vadd.f32 %v8782_v45, %v2583_v17  ;;  %4607 = vst.msk [vmem:[#allocation2 + $0xc0] sm:$0xc0] %vm3395_vm3, %v7681_v0 }
 0x2a0   : > { %3747 = vst.msk [vmem:[#allocation2 + $0xd0] sm:$0x3] %vm3733_vm10, %v3712_v3  ;;  %v7348_v3 = vld [vmem:[#allocation12 + $0x8] sm:$0xff]  }
 0x2a1   : > { %v2651_v39 = vmax.f32 %v2619_v24, 0.0  ;;  %3200 = vst.msk [vmem:[#allocation2 + $0xe0] sm:$0xff] %vm1012_vm1, %v3191_v8 }
 0x2a2   : > { %3211 = vst.msk [vmem:[#allocation2 + $0xe0] sm:$0x1c] %vm3208_vm7, %v7681_v0 }
 0x2a3   : > { %v2671_v28 = vpack.c.bf16 %v2651_v39, %v2650_v23  ;;  %3265 = vst.msk [vmem:[#allocation2 + $0xe0] sm:$0x38] %vm3250_vm4, %v7681_v0 }
 0x2a4   : > { %v2523_v26 = vpop.f32.mrb[48].mxu1  ;;  %v3238_v11 = vpop.permute.xlu1 %3237 }
 0x2a5   : > { %v2584_v45 = vmul.f32 %v9129_v29, %v2523_v26  ;;  %v2525_v30 = vpop.f32.mrb[49].mxu1  ;;  %6736 = vmatmul.mubr.bf16.gmra.mrb[84].mxu1 %v2671_v28  ;;  %3248 = vst.msk [vmem:[#allocation2 + $0xe0] sm:$0x3] %vm3245_vm15, %v3238_v11  ;;  %v3376_v13 = vpop.permute.xlu0 %3375 }
 0x2a6   : > { %v2526_v32 = vpop.f32.mrb[50].mxu1  ;;  %3410 = vst.msk [vmem:[#allocation2 + $0xe0] sm:$0xc0] %vm3395_vm3, %v3376_v13 }
 0x2a7   : > { %v2620_v37 = vadd.f32 %v9140_v36, %v2584_v45  ;;  %v2585_v38 = vmul.f32 %v9129_v29, %v2526_v32  ;;  %v2528_v41 = vpop.f32.mrb[51].mxu1  ;;  %v9181_v22 = vld [vmem:[#allocation2 + $0xd0] sm:$0xff] }
 0x2a8   : > { %v3553_v18 = vpop.permute.xlu1 %3552  ;;  %4584 = vst.msk [vmem:[#allocation2 + $0xd0] sm:$0xc0] %vm3147_vm14, %v7681_v0 }
 0x2a9   : > { %v2652_v42 = vmax.f32 %v2620_v37, 0.0  ;;  %v2621_v44 = vadd.f32 %v9140_v36, %v2585_v38  ;;  %3586 = vst.msk [vmem:[#allocation2 + $0xe0] sm:$0xff] %vm1638_vm11, %v3553_v18  ;;  %v3714_v59 = vpop.permute.xlu0 %3713 }
 0x2aa   : > { %3603 = vst.msk [vmem:[#allocation2 + $0xe0] sm:$0x1c] %vm3588_vm12, %v7681_v0 }
 0x2ab   : > { %v2653_v50 = vmax.f32 %v2621_v44, 0.0  ;;  %4588 = vst.msk [vmem:[#allocation2 + $0xd0] sm:$0xff] %vm1012_vm1, %v7681_v0 }
 0x2ac   : > { %3748 = vst.msk [vmem:[#allocation2 + $0xe0] sm:$0x3] %vm3733_vm10, %v3714_v59  ;;  %v3193_v45 = vpop.permute.xlu1 %3192 }
 0x2ad   : > { %v2672_v54 = vpack.c.bf16 %v2653_v50, %v2652_v42  ;;  %4592 = vst.msk [vmem:[#allocation2 + $0xd0] sm:$0x3] %vm3245_vm15, %v7681_v0  ;;  %v3240_v53 = vpop.permute.xlu0 %3239 }
 0x2ae   : > { %4608 = vst.msk [vmem:[#allocation2 + $0xd0] sm:$0xc0] %vm3395_vm3, %v7681_v0 }
 0x2af   : > { %6739 = vmatprep.mubr.bf16.mxu1 %v2672_v54  ;;  %3201 = vst.msk [vmem:[#allocation2 + $0xf0] sm:$0xff] %vm1012_vm1, %v3193_v45 }
 0x2b0   : > { %3212 = vst.msk [vmem:[#allocation2 + $0xf0] sm:$0x1c] %vm3208_vm7, %v7681_v0  ;;  %v3378_v33 = vpop.permute.xlu1 %3377 }
 0x2b1   : > { %3266 = vst.msk [vmem:[#allocation2 + $0xf0] sm:$0x38] %vm3250_vm4, %v7681_v0  ;;  %v3555_v38 = vpop.permute.xlu0 %3554 }
 0x2b2   : > { %v2531_v57 = vpop.f32.mrb[52].mxu1  ;;  %3249 = vst.msk [vmem:[#allocation2 + $0xf0] sm:$0x3] %vm3245_vm15, %v3240_v53 }
 0x2b3   : > { %v2586_v60 = vmul.f32 %v9129_v29, %v2531_v57  ;;  %v2533_v63 = vpop.f32.mrb[53].mxu1  ;;  %3411 = vst.msk [vmem:[#allocation2 + $0xf0] sm:$0xc0] %vm3395_vm3, %v3378_v33  ;;  %v9205_v41 = vld [vmem:[#allocation2 + $0xe0] sm:$0xff] }
 0x2b4   : > { %v2534_v35 = vpop.f32.mrb[54].mxu1  ;;  %3587 = vst.msk [vmem:[#allocation2 + $0xf0] sm:$0xff] %vm1638_vm11, %v3555_v38  ;;  %v3716_v49 = vpop.permute.xlu1 %3715 }
 0x2b5   : > { %v2622_v4 = vadd.f32 %v9140_v36, %v2586_v60  ;;  %v2587_v5 = vmul.f32 %v9129_v29, %v2534_v35  ;;  %v2536_v6 = vpop.f32.mrb[55].mxu1  ;;  %4585 = vst.msk [vmem:[#allocation2 + $0xe0] sm:$0xc0] %vm3147_vm14, %v7681_v0 }
 0x2b6   : > { %3604 = vst.msk [vmem:[#allocation2 + $0xf0] sm:$0x1c] %vm3588_vm12, %v7681_v0  ;;  %v7353_v6 = vld [vmem:[#allocation12 + $0x30] sm:$0xff]  }
 0x2b7   : > { %v2654_v9 = vmax.f32 %v2622_v4, 0.0  ;;  %v2623_v10 = vadd.f32 %v9140_v36, %v2587_v5  ;;  %4589 = vst.msk [vmem:[#allocation2 + $0xe0] sm:$0xff] %vm1012_vm1, %v7681_v0  ;;  %v7351_v4 = vld [vmem:[#allocation12 + $0x20] sm:$0xff]  }
 0x2b8   : > { %3749 = vst.msk [vmem:[#allocation2 + $0xf0] sm:$0x3] %vm3733_vm10, %v3716_v49 }
 0x2b9   : > { %v2655_v12 = vmax.f32 %v2623_v10, 0.0  ;;  %4593 = vst.msk [vmem:[#allocation2 + $0xe0] sm:$0x3] %vm3245_vm15, %v7681_v0 }
 0x2ba   : > { %4609 = vst.msk [vmem:[#allocation2 + $0xe0] sm:$0xc0] %vm3395_vm3, %v7681_v0 }
 0x2bb   : > { %v2673_v40 = vpack.c.bf16 %v2655_v12, %v2654_v9 }
 0x2bd   : > { %v2539_v15 = vpop.f32.mrb[56].mxu1  ;;  %6740 = vmatmul.mubr.bf16.gmra.mrb[88].mxu1 %v2673_v40 }
 0x2be   : > { %v2588_v52 = vmul.f32 %v9129_v29, %v2539_v15  ;;  %v2541_v17 = vpop.f32.mrb[57].mxu1 }
 0x2bf   : > { %v2542_v23 = vpop.f32.mrb[58].mxu1  ;;  %v9223_v35 = vld [vmem:[#allocation2 + $0xf0] sm:$0xff] }
 0x2c0   : > { %v2624_v24 = vadd.f32 %v9140_v36, %v2588_v52  ;;  %v2589_v25 = vmul.f32 %v9129_v29, %v2542_v23  ;;  %v2544_v39 = vpop.f32.mrb[59].mxu1  ;;  %4586 = vst.msk [vmem:[#allocation2 + $0xf0] sm:$0xc0] %vm3147_vm14, %v7681_v0 }
 0x2c1   : > { %4590 = vst.msk [vmem:[#allocation2 + $0xf0] sm:$0xff] %vm1012_vm1, %v7681_v0  ;;  %vm7690_vm1 = vmmov 0  }
 0x2c2   : > { %v2656_v26 = vmax.f32 %v2624_v24, 0.0  ;;  %v2625_v28 = vadd.f32 %v9140_v36, %v2589_v25  ;;  %4594 = vst.msk [vmem:[#allocation2 + $0xf0] sm:$0x3] %vm3245_vm15, %v7681_v0  ;;  %v3901_v24 = vld [vmem:[#allocation2 + $0x58] sm:$0xff] }
 0x2c3   : > { %4610 = vst.msk [vmem:[#allocation2 + $0xf0] sm:$0xc0] %vm3395_vm3, %v7681_v0 }
 0x2c4   : > { %v2657_v30 = vmax.f32 %v2625_v28, 0.0 }
 0x2c5   : > { %v2547_v37 = vpop.f32.mrb[60].mxu1 }
 0x2c6   : > { %v2674_v32 = vpack.c.bf16 %v2657_v30, %v2656_v26  ;;  %v2590_v42 = vmul.f32 %v9129_v29, %v2547_v37  ;;  %v2549_v44 = vpop.f32.mrb[61].mxu1 }
 0x2c7   : > { %v2550_v48 = vpop.f32.mrb[62].mxu1 }
 0x2c8   : > { %6743 = vmatprep.mubr.bf16.mxu1 %v2674_v32  ;;  %v2626_v50 = vadd.f32 %v9140_v36, %v2590_v42  ;;  %v2591_v54 = vmul.f32 %v9129_v29, %v2550_v48  ;;  %v2552_v55 = vpop.f32.mrb[63].mxu1  ;;  %v7347_v29 = vld [vmem:[#allocation12] sm:$0xff]   ;;  %v3903_v48 = vld [vmem:[#allocation2 + $0x68] sm:$0xff] }
 0x2c9   : > { %6747 = vmatprep.subr.bf16.mxu0 %v7347_v29 }
 0x2ca   : > { %v2627_v56 = vadd.f32 %v9140_v36, %v2591_v54  ;;  %v2658_v57 = vmax.f32 %v2626_v50, 0.0  ;;  %6748 = vmatpush3.bf16.msra.mxu0 %v7347_v29  ;;  %v7350_v36 = vld [vmem:[#allocation12 + $0x18] sm:$0xff]  }
 0x2cb   : > { %6749 = vmatprep.subr.bf16.mxu0 %v7348_v3 }
 0x2cc   : > { %v2659_v60 = vmax.f32 %v2627_v56, 0.0 }
 0x2ce   : > { %v2675_v63 = vpack.c.bf16 %v2659_v60, %v2658_v57  ;;  %6750 = vmatpush3.bf16.msra.mxu0 %v7348_v3 }
 0x2d0   : > { %6744 = vmatmul.mubr.bf16.gmra.mrb[92].mxu1 %v2675_v63 }
 0x2d1   : > { %6445 = vmatprep.mubr.msk.bf16.mxu1 %vm545_vm0, %v8935_v51  ;;  %v7349_v51 = vld [vmem:[#allocation12 + $0x10] sm:$0xff]  }
 0x2d2   : > { %6751 = vmatprep.subr.bf16.mxu0 %v7349_v51 }
 0x2d3   : > { %6752 = vmatpush3.bf16.msra.mxu0 %v7349_v51 }
 0x2d4   : > { %6753 = vmatprep.subr.bf16.mxu0 %v7350_v36 }
 0x2d7   : > { %6754 = vmatpush3.bf16.msra.mxu0 %v7350_v36 }
 0x2d8   : > { %4075 = vmatmul.mubr.bf16.vlgmr.msra.gmra.mrb[96].mxu1 %v8941_v58  ;;  %6755 = vmatprep.subr.bf16.mxu0 %v7351_v4  ;;  %v7352_v58 = vld [vmem:[#allocation12 + $0x28] sm:$0xff]  }
 0x2d9   : > { %6446 = vmatprep.mubr.msk.bf16.mxu1 %vm545_vm0, %v8958_v14  ;;  %v9247_v14 = vld [vmem:[%s9932_s7] ss:$0 sm:$0xff] }
 0x2db   : > { %6756 = vmatpush3.bf16.msra.mxu0 %v7351_v4 }
 0x2dc   : > { %6757 = vmatprep.subr.bf16.mxu0 %v7352_v58 }
 0x2df   : > { %6758 = vmatpush3.bf16.msra.mxu0 %v7352_v58 }
 0x2e0   : > { %4083 = vmatmul.mubr.bf16.gmra.mrb[100].mxu1 %v8968_v20  ;;  %v3899_v20 = vld [vmem:[#allocation2 + $0x48] sm:$0xff]  ;;  %6759 = vmatprep.subr.bf16.mxu0 %v7353_v6 }
 0x2e1   : > { %6447 = vmatprep.mubr.msk.bf16.mxu1 %vm545_vm0, %v8980_v31  ;;  %v6669_v31 = vpop.f32.mrb[0].mxu0 }
 0x2e2   : > { %v763_v5 = vmul.f32 %v6669_v31, %v9247_v14  ;;  %v3905_v31 = vld [vmem:[#allocation2 + $0x78] sm:$0xff] }
 0x2e3   : > { %6760 = vmatpush3.bf16.msra.mxu0 %v7353_v6 }
 0x2e8   : > { %4091 = vmatmul.mubr.bf16.gmra.mrb[104].mxu1 %v8993_v62  ;;  %v9252_v62 = vld [vmem:[%s9933_s8] ss:$0 sm:$0xff] }
 0x2e9   : > { %6448 = vmatprep.mubr.msk.bf16.mxu1 %vm545_vm0, %v8999_v46  ;;  %v628_v46 = vpop.f32.mrb[1].mxu0  ;;  %v799_v10 = vadd.f32 %v9252_v62, %v763_v5 }
 0x2ea   : > { %v761_v8 = vmul.f32 %v9247_v14, %v628_v46  ;;  %v6670_v9 = vpop.f32.mrb[2].mxu0 }
 0x2eb   : > { %v764_v11 = vmul.f32 %v6670_v9, %v9247_v14  ;;  %v631_v12 = vpop.f32.mrb[3].mxu0  ;;  %v831_v40 = vmax.f32 %v799_v10, 0.0 }
 0x2ec   : > { %v797_v13 = vadd.f32 %v9252_v62, %v761_v8  ;;  %v762_v15 = vmul.f32 %v9247_v14, %v631_v12  ;;  %v6673_v59 = vpop.f32.mrb[4].mxu0 }
 0x2ed   : > { %v800_v52 = vadd.f32 %v9252_v62, %v764_v11  ;;  %v767_v28 = vmul.f32 %v6673_v59, %v9247_v14  ;;  %v644_v45 = vpop.f32.mrb[5].mxu0 }
 0x2ee   : > { %v829_v17 = vmax.f32 %v797_v13, 0.0  ;;  %v798_v18 = vadd.f32 %v9252_v62, %v762_v15  ;;  %v765_v30 = vmul.f32 %v9247_v14, %v644_v45  ;;  %v6674_v53 = vpop.f32.mrb[6].mxu0 }
 0x2ef   : > { %v832_v23 = vmax.f32 %v800_v52, 0.0  ;;  %v803_v32 = vadd.f32 %v9252_v62, %v767_v28  ;;  %v768_v33 = vmul.f32 %v6674_v53, %v9247_v14  ;;  %v647_v37 = vpop.f32.mrb[7].mxu0  ;;  %v3907_v28 = vld [vmem:[#allocation2 + $0x88] sm:$0xff] }
 0x2f0   : > { %4099 = vmatmul.mubr.bf16.gmra.mrb[108].mxu1 %v9013_v61  ;;  %v7354_v61 = vld [vmem:[#allocation12 + $0x38] sm:$0xff]   ;;  %v830_v25 = vmax.f32 %v798_v18, 0.0  ;;  %v801_v38 = vadd.f32 %v9252_v62, %v765_v30  ;;  %v6677_v56 = vpop.f32.mrb[8].mxu0 }
 0x2f1   : > { %6449 = vmatprep.mubr.msk.bf16.mxu1 %vm545_vm0, %v3899_v20  ;;  %v862_v39 = vpack.c.bf16 %v832_v23, %v831_v40  ;;  %6761 = vmatprep.subr.bf16.mxu0 %v7354_v61  ;;  %v835_v42 = vmax.f32 %v803_v32, 0.0  ;;  %v804_v44 = vadd.f32 %v9252_v62, %v768_v33  ;;  %v771_v60 = vmul.f32 %v6677_v56, %v9247_v14  ;;  %v660_v63 = vpop.f32.mrb[9].mxu0 }
 0x2f2   : > { %v861_v26 = vpack.c.bf16 %v830_v25, %v829_v17  ;;  %6762 = vmatpush3.bf16.msra.mxu0 %v7354_v61  ;;  %v833_v49 = vmax.f32 %v801_v38, 0.0  ;;  %v769_v3 = vmul.f32 %v9247_v14, %v660_v63  ;;  %v6678_v51 = vpop.f32.mrb[10].mxu0 }
 0x2f3   : > { %v836_v54 = vmax.f32 %v804_v44, 0.0  ;;  %v807_v36 = vadd.f32 %v9252_v62, %v771_v60  ;;  %v772_v4 = vmul.f32 %v6678_v51, %v9247_v14  ;;  %v663_v58 = vpop.f32.mrb[11].mxu0  ;;  %v7356_v44 = vld [vmem:[#allocation12 + $0x88] sm:$0xff]   ;;  %v3909_v60 = vld [vmem:[#allocation2 + $0x98] sm:$0xff] }
 0x2f4   : > { %6763 = vmatprep.mubr.bf16.mxu0 %v861_v26  ;;  %v770_v20 = vmul.f32 %v9247_v14, %v663_v58  ;;  %v6681_v11 = vpop.f32.mrb[12].mxu0 }
 0x2f5   : > { %6764 = vmatmul.mubr.bf16.vlgmr.msra.gmra.mrb[32].mxu0 %v862_v39  ;;  %v864_v57 = vpack.c.bf16 %v836_v54, %v835_v42  ;;  %v839_v5 = vmax.f32 %v807_v36, 0.0  ;;  %v808_v46 = vadd.f32 %v9252_v62, %v772_v4  ;;  %v775_v13 = vmul.f32 %v6681_v11, %v9247_v14  ;;  %v676_v15 = vpop.f32.mrb[13].mxu0  ;;  %v7355_v42 = vld [vmem:[#allocation12 + $0x80] sm:$0xff]  }
 0x2f6   : > { %v806_v8 = vadd.f32 %v9252_v62, %v770_v20  ;;  %v773_v61 = vmul.f32 %v9247_v14, %v676_v15  ;;  %v6682_v17 = vpop.f32.mrb[14].mxu0  ;;  %6795 = vmatprep.subr.bf16.mxu0 %v7355_v42  ;;  %v3911_v15 = vld [vmem:[#allocation2 + $0xa8] sm:$0xff] }
 0x2f7   : > { %v840_v9 = vmax.f32 %v808_v46, 0.0  ;;  %v679_v25 = vpop.f32.mrb[15].mxu0  ;;  %6796 = vmatpush3.bf16.msra.mxu0 %v7355_v42  ;;  %v3913_v42 = vld [vmem:[#allocation2 + $0xb8] sm:$0xff] }
 0x2f8   : > { %4107 = vmatmul.mubr.bf16.gmra.mrb[112].mxu1 %v9027_v7  ;;  %v766_v7 = vmul.f32 %v9247_v14, %v647_v37  ;;  %v838_v10 = vmax.f32 %v806_v8, 0.0  ;;  %v809_v59 = vadd.f32 %v9252_v62, %v773_v61  ;;  %v774_v26 = vmul.f32 %v9247_v14, %v679_v25  ;;  %v6685_v38 = vpop.f32.mrb[16].mxu0  ;;  %6797 = vmatprep.subr.bf16.mxu0 %v7356_v44 }
 0x2f9   : > { %6450 = vmatprep.mubr.msk.bf16.mxu1 %vm545_vm0, %v3901_v24  ;;  %v866_v40 = vpack.c.bf16 %v840_v9, %v839_v5  ;;  %v776_v24 = vmul.f32 %v6682_v17, %v9247_v14 }
 0x2fa   : > { %v802_v50 = vadd.f32 %v9252_v62, %v766_v7  ;;  %v841_v53 = vmax.f32 %v809_v59, 0.0  ;;  %v810_v32 = vadd.f32 %v9252_v62, %v774_v26 }
 0x2fb   : > { %v812_v30 = vadd.f32 %v9252_v62, %v776_v24  ;;  %6798 = vmatpush3.bf16.msra.mxu0 %v7356_v44 }
 0x2fc   : > { %v834_v55 = vmax.f32 %v802_v50, 0.0  ;;  %v842_v37 = vmax.f32 %v810_v32, 0.0 }
 0x2fd   : > { %v844_v33 = vmax.f32 %v812_v30, 0.0 }
 0x2fe   : > { %v863_v29 = vpack.c.bf16 %v834_v55, %v833_v49  ;;  %v692_v49 = vpop.f32.mrb[17].mxu0  ;;  %v867_v50 = vpack.c.bf16 %v842_v37, %v841_v53  ;;  %v7357_v37 = vld [vmem:[#allocation12 + $0x90] sm:$0xff]  }
 0x2ff   : > { %v777_v54 = vmul.f32 %v9247_v14, %v692_v49  ;;  %v6686_v55 = vpop.f32.mrb[18].mxu0  ;;  %6799 = vmatprep.subr.bf16.mxu0 %v7357_v37 }
 0x300   : > { %4115 = vmatmul.mubr.bf16.gmra.mrb[116].mxu1 %v9044_v21  ;;  %6767 = vmatprep.mubr.bf16.mxu0 %v863_v29  ;;  %v805_v21 = vadd.f32 %v9252_v62, %v769_v3 }
 0x301   : > { %6451 = vmatprep.mubr.msk.bf16.mxu1 %vm545_vm0, %v3903_v48  ;;  %6768 = vmatmul.mubr.bf16.gmra.mrb[36].mxu0 %v864_v57  ;;  %v779_v48 = vmul.f32 %v6685_v38, %v9247_v14  ;;  %v695_v57 = vpop.f32.mrb[19].mxu0  ;;  %v813_v63 = vadd.f32 %v9252_v62, %v777_v54 }
 0x302   : > { %v837_v6 = vmax.f32 %v805_v21, 0.0  ;;  %v9286_v12 = vpop.f32.mrb[64].mxu1  ;;  %v778_v29 = vmul.f32 %v9247_v14, %v695_v57  ;;  %v6689_v5 = vpop.f32.mrb[20].mxu0  ;;  %6800 = vmatpush3.bf16.msra.mxu0 %v7357_v37  ;;  %v7365_v37 = vld [vmem:[%s7997_s29 + $0x10] sm:$0xff]  }
 0x303   : > { %v9289_v52 = vpop.f32.mrb[65].mxu1  ;;  %v815_v56 = vadd.f32 %v9252_v62, %v779_v48  ;;  %v845_v36 = vmax.f32 %v813_v63, 0.0  ;;  %v783_v8 = vmul.f32 %v6689_v5, %v9247_v14  ;;  %v708_v9 = vpop.f32.mrb[21].mxu0 }
 0x304   : > { %v865_v18 = vpack.c.bf16 %v838_v10, %v837_v6  ;;  %v9292_v23 = vpop.f32.mrb[66].mxu1  ;;  %v814_v4 = vadd.f32 %v9252_v62, %v778_v29  ;;  %v781_v11 = vmul.f32 %v9247_v14, %v708_v9  ;;  %v3915_v9 = vld [vmem:[#allocation2 + $0xc8] sm:$0xff] }
 0x305   : > { %v9296_v39 = vpop.f32.mrb[67].mxu1  ;;  %v847_v3 = vmax.f32 %v815_v56, 0.0 }
 0x306   : > { %6771 = vmatprep.mubr.bf16.mxu0 %v865_v18  ;;  %v846_v20 = vmax.f32 %v814_v4, 0.0  ;;  %v817_v18 = vadd.f32 %v9252_v62, %v781_v11 }
 0x308   : > { %4123 = vmatmul.mubr.bf16.gmra.mrb[120].mxu1 %v9057_v27  ;;  %v811_v27 = vadd.f32 %v9252_v62, %v775_v13  ;;  %v6690_v13 = vpop.f32.mrb[22].mxu0  ;;  %v849_v59 = vmax.f32 %v817_v18, 0.0 }
 0x309   : > { %6452 = vmatprep.mubr.msk.bf16.mxu1 %vm545_vm0, %v3905_v31  ;;  %6772 = vmatmul.mubr.bf16.gmra.mrb[40].mxu0 %v866_v40  ;;  %v819_v40 = vadd.f32 %v9252_v62, %v783_v8  ;;  %v784_v61 = vmul.f32 %v6690_v13, %v9247_v14  ;;  %v711_v17 = vpop.f32.mrb[23].mxu0 }
 0x30a   : > { %v843_v45 = vmax.f32 %v811_v27, 0.0  ;;  %6775 = vmatprep.mubr.bf16.mxu0 %v867_v50  ;;  %v782_v27 = vmul.f32 %v9247_v14, %v711_v17  ;;  %v7358_v50 = vld [vmem:[#allocation12 + $0x98] sm:$0xff]  }
 0x30b   : > { %v851_v24 = vmax.f32 %v819_v40, 0.0  ;;  %v820_v25 = vadd.f32 %v9252_v62, %v784_v61  ;;  %6801 = vmatprep.subr.bf16.mxu0 %v7358_v50 }
 0x30c   : > { %v868_v7 = vpack.c.bf16 %v844_v33, %v843_v45  ;;  %v818_v26 = vadd.f32 %v9252_v62, %v782_v27  ;;  %6802 = vmatpush3.bf16.msra.mxu0 %v7358_v50 }
 0x30e   : > { %v850_v45 = vmax.f32 %v818_v26, 0.0  ;;  %v6693_v30 = vpop.f32.mrb[24].mxu0 }
 0x30f   : > { %v787_v53 = vmul.f32 %v6693_v30, %v9247_v14  ;;  %v724_v32 = vpop.f32.mrb[25].mxu0 }
 0x310   : > { %4131 = vmatmul.mubr.bf16.gmra.mrb[124].mxu1 %v9077_v47  ;;  %v780_v47 = vmul.f32 %v6686_v55, %v9247_v14  ;;  %v785_v38 = vmul.f32 %v9247_v14, %v724_v32  ;;  %v7363_v32 = vld [vmem:[#allocation12 + $0xb8] sm:$0xff]  }
 0x311   : > { %6453 = vmatprep.mubr.msk.bf16.mxu1 %vm545_vm0, %v3907_v28  ;;  %6776 = vmatmul.mubr.bf16.gmra.mrb[44].mxu0 %v868_v7  ;;  %v852_v28 = vmax.f32 %v820_v25, 0.0  ;;  %v6694_v7 = vpop.f32.mrb[26].mxu0  ;;  %v823_v44 = vadd.f32 %v9252_v62, %v787_v53  ;;  %v7362_v53 = vld [vmem:[%s7997_s29] sm:$0xff]  }
 0x312   : > { %v816_v51 = vadd.f32 %v9252_v62, %v780_v47  ;;  %v9314_v21 = vpop.f32.mrb[68].mxu1  ;;  %v788_v48 = vmul.f32 %v6694_v7, %v9247_v14  ;;  %v727_v49 = vpop.f32.mrb[27].mxu0  ;;  %v821_v54 = vadd.f32 %v9252_v62, %v785_v38  ;;  %4723 = vrot.lane.b32.xlu0 %v7362_v53, %s7682_s16  ;;  %v7387_v53 = vld [vmem:[%s7997_s29 + $0x78] sm:$0xff]  }
 0x313   : > { %v9316_v31 = vpop.f32.mrb[69].mxu1  ;;  %v872_v33 = vpack.c.bf16 %v852_v28, %v851_v24  ;;  %v786_v55 = vmul.f32 %v9247_v14, %v727_v49  ;;  %v855_v56 = vmax.f32 %v823_v44, 0.0  ;;  %v7360_v24 = vld [vmem:[#allocation12 + $0xa8] sm:$0xff]  }
 0x314   : > { %v848_v58 = vmax.f32 %v816_v51, 0.0  ;;  %v9318_v6 = vpop.f32.mrb[70].mxu1  ;;  %v824_v47 = vadd.f32 %v9252_v62, %v788_v48  ;;  %v853_v57 = vmax.f32 %v821_v54, 0.0  ;;  %v7368_v44 = vld [vmem:[%s7997_s29 + $0x28] sm:$0xff]   ;;  %v7369_v54 = vld [vmem:[%s7997_s29 + $0x30] sm:$0xff]  }
 0x315   : > { %v9321_v10 = vpop.f32.mrb[71].mxu1 }
 0x316   : > { %v870_v46 = vpack.c.bf16 %v848_v58, %v847_v3  ;;  %v856_v63 = vmax.f32 %v824_v47, 0.0  ;;  %v6697_v3 = vpop.f32.mrb[28].mxu0  ;;  %v7359_v58 = vld [vmem:[#allocation12 + $0xa0] sm:$0xff]   ;;  %4727 = vrot.lane.b32.xlu0 %v7365_v37, %s7682_s16 }
 0x317   : > { %v791_v51 = vmul.f32 %v6697_v3, %v9247_v14  ;;  %6803 = vmatprep.subr.bf16.mxu0 %v7359_v58  ;;  %v7376_v3 = vld [vmem:[%s7997_s29 + $0x50] sm:$0xff]  }
 0x318   : > { %4139 = vmatmul.mubr.bf16.gmra.mrb[128].mxu1 %v9093_v1  ;;  %v869_v1 = vpack.c.bf16 %v846_v20, %v845_v36  ;;  %v740_v36 = vpop.f32.mrb[29].mxu0  ;;  %v874_v4 = vpack.c.bf16 %v856_v63, %v855_v56  ;;  %6804 = vmatpush3.bf16.msra.mxu0 %v7359_v58  ;;  %v7372_v56 = vld [vmem:[%s7997_s29 + $0x40] sm:$0xff]  }
 0x319   : > { %6454 = vmatprep.mubr.msk.bf16.mxu1 %vm545_vm0, %v3909_v60  ;;  %v822_v60 = vadd.f32 %v9252_v62, %v786_v55  ;;  %v789_v20 = vmul.f32 %v9247_v14, %v740_v36  ;;  %v6698_v5 = vpop.f32.mrb[30].mxu0  ;;  %6805 = vmatprep.subr.bf16.mxu0 %v7360_v24  ;;  %v7378_v36 = vld [vmem:[%s7997_s29 + $0x58] sm:$0xff]  }
 0x31a   : > { %6779 = vmatprep.mubr.bf16.mxu0 %v869_v1  ;;  %v827_v1 = vadd.f32 %v9252_v62, %v791_v51  ;;  %v792_v11 = vmul.f32 %v6698_v5, %v9247_v14  ;;  %v743_v13 = vpop.f32.mrb[31].mxu0  ;;  %v7380_v5 = vld [vmem:[%s7997_s29 + $0x60] sm:$0xff]  }
 0x31b   : > { %6780 = vmatmul.mubr.bf16.gmra.mrb[48].mxu0 %v870_v46  ;;  %v854_v29 = vmax.f32 %v822_v60, 0.0  ;;  %v825_v40 = vadd.f32 %v9252_v62, %v789_v20  ;;  %v790_v61 = vmul.f32 %v9247_v14, %v743_v13  ;;  %v5603_v13 = vrot.slane %v8983_v34, 4 }
 0x31c   : > { %v859_v18 = vmax.f32 %v827_v1, 0.0  ;;  %v828_v27 = vadd.f32 %v9252_v62, %v792_v11  ;;  %6806 = vmatpush3.bf16.msra.mxu0 %v7360_v24 }
 0x31d   : > { %v873_v46 = vpack.c.bf16 %v854_v29, %v853_v57  ;;  %v857_v25 = vmax.f32 %v825_v40, 0.0  ;;  %v7374_v29 = vld [vmem:[%s7997_s29 + $0x48] sm:$0xff]  }
 0x31e   : > { %v860_v26 = vmax.f32 %v828_v27, 0.0  ;;  %v5604_v27 = vadd.f32 %v5603_v13, %v8983_v34 }
 0x320   : > { %4147 = vmatmul.mubr.bf16.gmra.mrb[132].mxu1 %v9104_v43  ;;  %v871_v43 = vpack.c.bf16 %v850_v45, %v849_v59  ;;  %v826_v59 = vadd.f32 %v9252_v62, %v790_v61  ;;  %v876_v28 = vpack.c.bf16 %v860_v26, %v859_v18  ;;  %v7361_v45 = vld [vmem:[#allocation12 + $0xb0] sm:$0xff]   ;;  %v3919_v62 = vld [vmem:[#allocation2 + $0xe8] sm:$0xff]  ;;  %v9441_v18 = vld [vmem:[%s9932_s7 + $0x2] ss:$0 sm:$0xff]  ;;  %v5605_v34 = vrot.slane %v5604_v27, 2 }
 0x321   : > { %6455 = vmatprep.mubr.msk.bf16.mxu1 %vm545_vm0, %v3911_v15  ;;  %6807 = vmatprep.subr.bf16.mxu0 %v7361_v45  ;;  %v7385_v61 = vld [vmem:[%s7997_s29 + $0x70] sm:$0xff]  }
 0x322   : > { %6783 = vmatprep.mubr.bf16.mxu0 %v871_v43  ;;  %v858_v14 = vmax.f32 %v826_v59, 0.0  ;;  %6808 = vmatpush3.bf16.msra.mxu0 %v7361_v45 }
 0x323   : > { %6784 = vmatmul.mubr.bf16.gmra.mrb[52].mxu0 %v872_v33  ;;  %6809 = vmatprep.subr.bf16.mxu0 %v7363_v32  ;;  %v7364_v33 = vld [vmem:[%s7997_s29 + $0x8] sm:$0xff]  }
 0x324   : > { %6787 = vmatprep.mubr.bf16.mxu0 %v873_v46  ;;  %v875_v30 = vpack.c.bf16 %v858_v14, %v857_v25  ;;  %4725 = vrot.lane.b32.xlu1 %v7364_v33, %s7682_s16  ;;  %v7382_v46 = vld [vmem:[%s7997_s29 + $0x68] sm:$0xff]   ;;  %v9448_v25 = vld [vmem:[%s9933_s8 + $0x2] ss:$0 sm:$0xff] }
 0x326   : > { %6810 = vmatpush3.bf16.msra.mxu0 %v7363_v32  ;;  %v7388_v32 = vld [vmem:[%s9930_s5] sm:$0xff]  }
 0x327   : > { %4967 = vmatprep.subr.bf16.mxu0 %v7681_v0 }
 0x328   : > { %4155 = vmatmul.mubr.bf16.gmra.mrb[136].mxu1 %v9111_v16  ;;  %v9343_v16 = vpop.f32.mrb[72].mxu1 }
 0x329   : > { %6456 = vmatprep.mubr.msk.bf16.mxu1 %vm545_vm0, %v3913_v42  ;;  %v9346_v8 = vpop.f32.mrb[73].mxu1  ;;  %v7366_v42 = vld [vmem:[%s7997_s29 + $0x18] sm:$0xff]  }
 0x32a   : > { %v9350_v15 = vpop.f32.mrb[74].mxu1  ;;  %4729 = vrot.lane.b32.xlu1 %v7366_v42, %s7682_s16 }
 0x32b   : > { %v9354_v17 = vpop.f32.mrb[75].mxu1  ;;  %6788 = vmatmul.mubr.bf16.gmra.mrb[56].mxu0 %v874_v4 }
 0x32c   : > { %6791 = vmatprep.mubr.bf16.mxu0 %v875_v30 }
 0x32e   : > { %4733 = vrot.lane.b32.xlu1 %v7368_v44, %s7682_s16 }
 0x330   : > { %4163 = vmatmul.mubr.bf16.gmra.mrb[140].mxu1 %v9132_v2  ;;  %v3917_v2 = vld [vmem:[#allocation2 + $0xd8] sm:$0xff] }
 0x331   : > { %6457 = vmatprep.mubr.msk.bf16.mxu1 %vm545_vm0, %v3915_v9 }
 0x333   : > { %6792 = vmatmul.mubr.bf16.gmra.mrb[60].mxu0 %v876_v28 }
 0x338   : > { %4171 = vmatmul.mubr.bf16.gmra.mrb[144].mxu1 %v9155_v19  ;;  %v3921_v19 = vld [vmem:[#allocation2 + $0xf8] sm:$0xff] }
 0x339   : > { %6458 = vmatprep.mubr.msk.bf16.mxu1 %vm545_vm0, %v3917_v2 }
 0x340   : > { %4179 = vmatmul.mubr.bf16.gmra.mrb[148].mxu1 %v9181_v22 }
 0x341   : > { %6459 = vmatprep.mubr.msk.bf16.mxu1 %vm545_vm0, %v3919_v62  ;;  %v9371_v38 = vpop.f32.mrb[76].mxu1  ;;  %v7689_v62 = vmov 0.0  }
 0x342   : > { %v9375_v7 = vpop.f32.mrb[77].mxu1  ;;  %6891 = vmatprep.subr.bf16.mxu1 %v7689_v62 }
 0x343   : > { %v9377_v22 = vpop.f32.mrb[78].mxu1  ;;  %6892 = vmatpush3.bf16.msra.mxu1 %v7388_v32 }
 0x344   : > { %v9379_v43 = vpop.f32.mrb[79].mxu1  ;;  %6897 = vmatprep.subr.bf16.mxu1 %v7689_v62 }
 0x348   : > { %4187 = vmatmul.mubr.bf16.gmra.mrb[152].mxu1 %v9205_v41  ;;  %v7367_v41 = vld [vmem:[%s7997_s29 + $0x20] sm:$0xff]  }
 0x349   : > { %6460 = vmatprep.mubr.msk.bf16.mxu1 %vm545_vm0, %v3921_v19  ;;  %4731 = vrot.lane.b32.xlu0 %v7367_v41, %s7682_s16  ;;  %v5606_v19 = vadd.f32 %v5605_v34, %v5604_v27 }
 0x34d   : > { %4735 = vrot.lane.b32.xlu0 %v7369_v54, %s7682_s16 }
 0x350   : > { %4195 = vmatmul.mubr.bf16.gmra.mrb[156].mxu1 %v9223_v35  ;;  %v7370_v35 = vld [vmem:[%s7997_s29 + $0x38] sm:$0xff]   ;;  %s9728_s29 = scalar_lea.vmem [#allocation14], %s6101_s24 }
 0x351   : > { %4737 = vrot.lane.b32.xlu1 %v7370_v35, %s7682_s16  ;;  %4739 = vrot.lane.b32.xlu0 %v7372_v56, %s7682_s16  ;;  %s5962_s23 = sshll.u32 %s9728_s29, 4  ;;  %s9878_s23 = int_to_ptr.vmem [resolvable:$true] %s5962_s23 }
 0x352   : > { %6893 = vmatprep.mubr.msk.bf16.mxu1 %vm7690_vm1, %v7689_v62  ;;  %s7593_s14 = scalar_lea.vmem %s9878_s23, 4096  ;;  %p7600_p13 = scmp.lt.s32.totalorder %s9878_s23, %s7598_s21 }
 0x353   : > { %p7594_p7 = scmp.ne.s32.totalorder %s9878_s23, %s7593_s14  ;;  %p7601_p0 = scmp.lt.s32.totalorder %s7599_s26, %s7593_s14 }
 0x355   : > { %4741 = vrot.lane.b32.xlu1 %v7374_v29, %s7682_s16  ;;  %4743 = vrot.lane.b32.xlu0 %v7376_v3, %s7682_s16  ;;  %v5607_v3 = vrot.slane %v5606_v19, 1  ;;  %p7595_p12 = pnand %p7594_p7, %p9960_p4  ;;  %p7602_p2 = por %p7601_p0, %p7600_p13 }
 0x357   : > { %p7596_p1 = pneg %p7595_p12 }
 0x359   : > { %4745 = vrot.lane.b32.xlu1 %v7378_v36, %s7682_s16  ;;  %4747 = vrot.lane.b32.xlu0 %v7380_v5, %s7682_s16  ;;  %p7603_p8 = pnand %p7602_p2, %p7596_p1 }
 0x35d   : > { %4749 = vrot.lane.b32.xlu1 %v7382_v46, %s7682_s16  ;;  %4751 = vrot.lane.b32.xlu0 %v7385_v61, %s7682_s16 }
 0x35f   : > { %v9388_v48 = vpop.f32.mrb[80].mxu1 }
 0x360   : > { %v9390_v49 = vpop.f32.mrb[81].mxu1 }
 0x361   : > { %v9392_v50 = vpop.f32.mrb[82].mxu1  ;;  %4753 = vrot.lane.b32.xlu1 %v7387_v53, %s7682_s16  ;;  %s6540_s16 = sshll.u32 %s7765_s15, 12  ;;  %s5949_s15 = scalar_lea.sflag [#allocation5], %s7993_s18 }
 0x362   : > { %v9395_v55 = vpop.f32.mrb[83].mxu1  ;;  %s9876_s13 = scalar_lea.hbm %s9959_s9, %s6540_s16 }
 0x378   : > { %v9402_v47 = vpop.f32.mrb[84].mxu1 }
 0x379   : > { %v9404_v57 = vpop.f32.mrb[85].mxu1 }
 0x37a   : > { %v9406_v60 = vpop.f32.mrb[86].mxu1 }
 0x37b   : > { %v9408_v63 = vpop.f32.mrb[87].mxu1 }
 0x384   : > { %v4724_v59 = vpop.permute.xlu0 %4723 }
 0x385   : > { %4771 = vst.msk [vmem:[#allocation2] sm:$0xff] %vm1638_vm11, %v4724_v59 }
 0x386   : > { %4787 = vst.msk [vmem:[#allocation2] sm:$0x3] %vm3733_vm10, %v7681_v0 }
 0x387   : > { %4803 = vst.msk [vmem:[#allocation2] sm:$0xc0] %vm3795_vm13, %v7681_v0 }
 0x388   : > { %4807 = vst.msk [vmem:[#allocation2] sm:$0xff] %vm2006_vm2, %v7681_v0 }
 0x390   : > { %v9414_v51 = vpop.f32.mrb[88].mxu1 }
 0x391   : > { %v9417_v4 = vpop.f32.mrb[89].mxu1 }
 0x392   : > { %v9419_v58 = vpop.f32.mrb[90].mxu1 }
 0x393   : > { %v9422_v20 = vpop.f32.mrb[91].mxu1 }
 0x396   : > { %v4726_v44 = vpop.permute.xlu1 %4725 }
 0x397   : > { %4772 = vst.msk [vmem:[#allocation2 + $0x10] sm:$0xff] %vm1638_vm11, %v4726_v44 }
 0x398   : > { %4788 = vst.msk [vmem:[#allocation2 + $0x10] sm:$0x3] %vm3733_vm10, %v7681_v0 }
 0x399   : > { %4804 = vst.msk [vmem:[#allocation2 + $0x10] sm:$0xc0] %vm3795_vm13, %v7681_v0 }
 0x39a   : > { %4808 = vst.msk [vmem:[#allocation2 + $0x10] sm:$0xff] %vm2006_vm2, %v7681_v0 }
 0x3a3   : > { %v9428_v9 = vpop.f32.mrb[92].mxu1 }
 0x3a4   : > { %v9430_v1 = vpop.f32.mrb[93].mxu1 }
 0x3a5   : > { %v9432_v11 = vpop.f32.mrb[94].mxu1 }
 0x3a6   : > { %v9435_v40 = vpop.f32.mrb[95].mxu1 }
 0x3ab   : > { %v4076_v24 = vpop.f32.mrb[96].mxu1 }
 0x3ac   : > { %v4209_v26 = vmul.f32 %v9441_v18, %v4076_v24  ;;  %v4078_v14 = vpop.f32.mrb[97].mxu1  ;;  %v5608_v24 = vadd.f32 %v5607_v3, %v5606_v19 }
 0x3ad   : > { %v4079_v28 = vpop.f32.mrb[98].mxu1  ;;  %v4728_v14 = vpop.permute.xlu0 %4727 }
 0x3ae   : > { %v4245_v45 = vadd.f32 %v9448_v25, %v4209_v26  ;;  %v4210_v30 = vmul.f32 %v9441_v18, %v4079_v28  ;;  %v4081_v2 = vpop.f32.mrb[99].mxu1  ;;  %v7371_v26 = vld [vmem:[#allocation11] sm:$0xff]   ;;  %4773 = vst.msk [vmem:[#allocation2 + $0x20] sm:$0xff] %vm1638_vm11, %v4728_v14 }
 0x3af   : > { %4789 = vst.msk [vmem:[#allocation2 + $0x20] sm:$0x3] %vm3733_vm10, %v7681_v0 }
 0x3b0   : > { %v4246_v33 = vadd.f32 %v9448_v25, %v4210_v30  ;;  %v4277_v37 = vmax.f32 %v4245_v45, 0.0  ;;  %v5610_v30 = vmul.f32 0.00390625, %v5608_v24  ;;  %4805 = vst.msk [vmem:[#allocation2 + $0x20] sm:$0xc0] %vm3795_vm13, %v7681_v0 }
 0x3b1   : > { %4809 = vst.msk [vmem:[#allocation2 + $0x20] sm:$0xff] %vm2006_vm2, %v7681_v0 }
 0x3b2   : > { %v4278_v42 = vmax.f32 %v4246_v33, 0.0  ;;  %v5611_v19 = vpack.c.bf16 %v5610_v30, %v5610_v30 }
 0x3b3   : > { %v4084_v41 = vpop.f32.mrb[100].mxu1 }
 0x3b4   : > { %v4211_v54 = vmul.f32 %v9441_v18, %v4084_v41  ;;  %v4086_v35 = vpop.f32.mrb[101].mxu1  ;;  %v4309_v56 = vpack.c.bf16 %v4278_v42, %v4277_v37  ;;  %v7373_v37 = vld [vmem:[#allocation11 + $0x8] sm:$0xff]   ;;  %6894 = vmatmul.mubr.msk.bf16.vlgmr.msra.gmra.mrb[160].mxu1 %vm545_vm0, %v5611_v19 }
 0x3b5   : > { %v4087_v29 = vpop.f32.mrb[102].mxu1  ;;  %6913 = vmatprep.mubr.msk.bf16.mxu1 %vm7690_vm1, %v7689_v62  ;;  %v7375_v35 = vld [vmem:[#allocation11 + $0x10] sm:$0xff]  }
 0x3b6   : > { %v4247_v36 = vadd.f32 %v9448_v25, %v4211_v54  ;;  %v4212_v5 = vmul.f32 %v9441_v18, %v4087_v29  ;;  %v4089_v46 = vpop.f32.mrb[103].mxu1  ;;  %6811 = vmatprep.mubr.bf16.mxu0 %v4309_v56  ;;  %v4730_v56 = vpop.permute.xlu1 %4729 }
 0x3b7   : > { %4774 = vst.msk [vmem:[#allocation2 + $0x30] sm:$0xff] %vm1638_vm11, %v4730_v56 }
 0x3b8   : > { %v4248_v13 = vadd.f32 %v9448_v25, %v4212_v5  ;;  %v4279_v61 = vmax.f32 %v4247_v36, 0.0  ;;  %4790 = vst.msk [vmem:[#allocation2 + $0x30] sm:$0x3] %vm3733_vm10, %v7681_v0 }
 0x3b9   : > { %4806 = vst.msk [vmem:[#allocation2 + $0x30] sm:$0xc0] %vm3795_vm13, %v7681_v0 }
 0x3ba   : > { %v4280_v27 = vmax.f32 %v4248_v13, 0.0  ;;  %4810 = vst.msk [vmem:[#allocation2 + $0x30] sm:$0xff] %vm2006_vm2, %v7681_v0  ;;  %v4734_v56 = vpop.permute.xlu1 %4733 }
 0x3bb   : > { %v4092_v59 = vpop.f32.mrb[104].mxu1  ;;  %4776 = vst.msk [vmem:[#allocation2 + $0x50] sm:$0xff] %vm1638_vm11, %v4734_v56 }
 0x3bc   : > { %v4310_v28 = vpack.c.bf16 %v4280_v27, %v4279_v61  ;;  %v4213_v34 = vmul.f32 %v9441_v18, %v4092_v59  ;;  %v4094_v45 = vpop.f32.mrb[105].mxu1  ;;  %v7377_v27 = vld [vmem:[#allocation11 + $0x18] sm:$0xff]   ;;  %4792 = vst.msk [vmem:[#allocation2 + $0x50] sm:$0x3] %vm3733_vm10, %v7681_v0 }
 0x3bd   : > { %v4095_v2 = vpop.f32.mrb[106].mxu1 }
 0x3be   : > { %v4249_v53 = vadd.f32 %v9448_v25, %v4213_v34  ;;  %v4214_v32 = vmul.f32 %v9441_v18, %v4095_v2  ;;  %v4097_v33 = vpop.f32.mrb[107].mxu1  ;;  %6812 = vmatmul.mubr.bf16.vlgmr.msra.gmra.mrb[32].mxu0 %v4310_v28  ;;  %v7379_v28 = vld [vmem:[#allocation11 + $0x20] sm:$0xff]   ;;  %v4732_v34 = vpop.permute.xlu0 %4731 }
 0x3bf   : > { %4968 = vmatpush1.bf16.msra.mxu0 %v7371_v26  ;;  %4775 = vst.msk [vmem:[#allocation2 + $0x40] sm:$0xff] %vm1638_vm11, %v4732_v34 }
 0x3c0   : > { %v4250_v42 = vadd.f32 %v9448_v25, %v4214_v32  ;;  %4969 = vmatprep.subr.bf16.mxu0 %v7681_v0  ;;  %v4281_v41 = vmax.f32 %v4249_v53, 0.0  ;;  %4791 = vst.msk [vmem:[#allocation2 + $0x40] sm:$0x3] %vm3733_vm10, %v7681_v0 }
 0x3c2   : > { %v4282_v44 = vmax.f32 %v4250_v42, 0.0  ;;  %v4736_v34 = vpop.permute.xlu0 %4735 }
 0x3c3   : > { %v4100_v54 = vpop.f32.mrb[108].mxu1  ;;  %4970 = vmatpush1.bf16.msra.mxu0 %v7373_v37  ;;  %v7381_v37 = vld [vmem:[#allocation11 + $0x28] sm:$0xff]   ;;  %4777 = vst.msk [vmem:[#allocation2 + $0x60] sm:$0xff] %vm1638_vm11, %v4736_v34 }
 0x3c4   : > { %v4215_v29 = vmul.f32 %v9441_v18, %v4100_v54  ;;  %v4102_v3 = vpop.f32.mrb[109].mxu1  ;;  %v4311_v36 = vpack.c.bf16 %v4282_v44, %v4281_v41  ;;  %4971 = vmatprep.subr.bf16.mxu0 %v7681_v0  ;;  %4793 = vst.msk [vmem:[#allocation2 + $0x60] sm:$0x3] %vm3733_vm10, %v7681_v0 }
 0x3c5   : > { %v4103_v5 = vpop.f32.mrb[110].mxu1 }
 0x3c6   : > { %v4251_v46 = vadd.f32 %v9448_v25, %v4215_v29  ;;  %v4216_v13 = vmul.f32 %v9441_v18, %v4103_v5  ;;  %v4105_v61 = vpop.f32.mrb[111].mxu1  ;;  %6815 = vmatprep.mubr.bf16.mxu0 %v4311_v36 }
 0x3c7   : > { %4972 = vmatpush1.bf16.msra.mxu0 %v7375_v35  ;;  %v7383_v35 = vld [vmem:[#allocation11 + $0x30] sm:$0xff]  }
 0x3c8   : > { %v4252_v24 = vadd.f32 %v9448_v25, %v4216_v13  ;;  %4973 = vmatprep.subr.bf16.mxu0 %v7681_v0  ;;  %v4283_v59 = vmax.f32 %v4251_v46, 0.0 }
 0x3ca   : > { %v4284_v26 = vmax.f32 %v4252_v24, 0.0 }
 0x3cb   : > { %v4108_v14 = vpop.f32.mrb[112].mxu1  ;;  %4974 = vmatpush1.bf16.msra.mxu0 %v7377_v27  ;;  %v7384_v27 = vld [vmem:[#allocation11 + $0x38] sm:$0xff]  }
 0x3cc   : > { %v4217_v45 = vmul.f32 %v9441_v18, %v4108_v14  ;;  %v4110_v30 = vpop.f32.mrb[113].mxu1  ;;  %v4312_v2 = vpack.c.bf16 %v4284_v26, %v4283_v59  ;;  %4975 = vmatprep.subr.bf16.mxu0 %v7681_v0 }
 0x3cd   : > { %v4111_v53 = vpop.f32.mrb[114].mxu1 }
 0x3ce   : > { %v4253_v32 = vadd.f32 %v9448_v25, %v4217_v45  ;;  %v4218_v33 = vmul.f32 %v9441_v18, %v4111_v53  ;;  %v4113_v19 = vpop.f32.mrb[115].mxu1  ;;  %6816 = vmatmul.mubr.bf16.gmra.mrb[36].mxu0 %v4312_v2 }
 0x3cf   : > { %4976 = vmatpush1.bf16.msra.mxu0 %v7379_v28  ;;  %v7386_v28 = vld [vmem:[#allocation11 + $0x40] sm:$0xff]  }
 0x3d0   : > { %v4254_v42 = vadd.f32 %v9448_v25, %v4218_v33  ;;  %4977 = vmatprep.subr.bf16.mxu0 %v7681_v0  ;;  %v4285_v41 = vmax.f32 %v4253_v32, 0.0 }
 0x3d2   : > { %v4286_v44 = vmax.f32 %v4254_v42, 0.0 }
 0x3d3   : > { %v4116_v54 = vpop.f32.mrb[116].mxu1  ;;  %4978 = vmatpush1.bf16.msra.mxu0 %v7381_v37 }
 0x3d4   : > { %v4219_v29 = vmul.f32 %v9441_v18, %v4116_v54  ;;  %v4118_v3 = vpop.f32.mrb[117].mxu1  ;;  %v4313_v36 = vpack.c.bf16 %v4286_v44, %v4285_v41  ;;  %4979 = vmatprep.subr.bf16.mxu0 %v7681_v0  ;;  %v4738_v54 = vpop.permute.xlu1 %4737 }
 0x3d5   : > { %v4119_v5 = vpop.f32.mrb[118].mxu1  ;;  %4778 = vst.msk [vmem:[#allocation2 + $0x70] sm:$0xff] %vm1638_vm11, %v4738_v54 }
 0x3d6   : > { %v4255_v46 = vadd.f32 %v9448_v25, %v4219_v29  ;;  %v4220_v13 = vmul.f32 %v9441_v18, %v4119_v5  ;;  %v4121_v61 = vpop.f32.mrb[119].mxu1  ;;  %6819 = vmatprep.mubr.bf16.mxu0 %v4313_v36  ;;  %4794 = vst.msk [vmem:[#allocation2 + $0x70] sm:$0x3] %vm3733_vm10, %v7681_v0 }
 0x3d7   : > { %4980 = vmatpush1.bf16.msra.mxu0 %v7383_v35 }
 0x3d8   : > { %v4256_v24 = vadd.f32 %v9448_v25, %v4220_v13  ;;  %4981 = vmatprep.subr.bf16.mxu0 %v7681_v0  ;;  %v4287_v59 = vmax.f32 %v4255_v46, 0.0 }
 0x3da   : > { %v4288_v26 = vmax.f32 %v4256_v24, 0.0 }
 0x3db   : > { %v4124_v14 = vpop.f32.mrb[120].mxu1  ;;  %4982 = vmatpush1.bf16.msra.mxu0 %v7384_v27 }
 0x3dc   : > { %v4221_v45 = vmul.f32 %v9441_v18, %v4124_v14  ;;  %v4126_v30 = vpop.f32.mrb[121].mxu1  ;;  %v4314_v2 = vpack.c.bf16 %v4288_v26, %v4287_v59  ;;  %4983 = vmatprep.subr.bf16.mxu0 %v7681_v0  ;;  %v4740_v59 = vpop.permute.xlu0 %4739 }
 0x3dd   : > { %v4127_v53 = vpop.f32.mrb[122].mxu1  ;;  %4779 = vst.msk [vmem:[#allocation2 + $0x80] sm:$0xff] %vm1638_vm11, %v4740_v59 }
 0x3de   : > { %v4257_v32 = vadd.f32 %v9448_v25, %v4221_v45  ;;  %v4222_v33 = vmul.f32 %v9441_v18, %v4127_v53  ;;  %v4129_v19 = vpop.f32.mrb[123].mxu1  ;;  %6820 = vmatmul.mubr.bf16.gmra.mrb[40].mxu0 %v4314_v2  ;;  %4795 = vst.msk [vmem:[#allocation2 + $0x80] sm:$0x3] %vm3733_vm10, %v7681_v0 }
 0x3df   : > { %4984 = vmatpush1.bf16.msra.mxu0 %v7386_v28 }
 0x3e0   : > { %v4258_v37 = vadd.f32 %v9448_v25, %v4222_v33  ;;  %v4289_v42 = vmax.f32 %v4257_v32, 0.0 }
 0x3e2   : > { %v4290_v41 = vmax.f32 %v4258_v37, 0.0  ;;  %v4742_v37 = vpop.permute.xlu1 %4741 }
 0x3e3   : > { %v4132_v44 = vpop.f32.mrb[124].mxu1  ;;  %4780 = vst.msk [vmem:[#allocation2 + $0x90] sm:$0xff] %vm1638_vm11, %v4742_v37 }
 0x3e4   : > { %v4223_v35 = vmul.f32 %v9441_v18, %v4132_v44  ;;  %v4134_v56 = vpop.f32.mrb[125].mxu1  ;;  %v4315_v29 = vpack.c.bf16 %v4290_v41, %v4289_v42  ;;  %4796 = vst.msk [vmem:[#allocation2 + $0x90] sm:$0x3] %vm3733_vm10, %v7681_v0 }
 0x3e5   : > { %v4135_v3 = vpop.f32.mrb[126].mxu1 }
 0x3e6   : > { %v4259_v36 = vadd.f32 %v9448_v25, %v4223_v35  ;;  %v4224_v5 = vmul.f32 %v9441_v18, %v4135_v3  ;;  %v4137_v46 = vpop.f32.mrb[127].mxu1  ;;  %6823 = vmatprep.mubr.bf16.mxu0 %v4315_v29 }
 0x3e8   : > { %v4260_v13 = vadd.f32 %v9448_v25, %v4224_v5  ;;  %v4291_v61 = vmax.f32 %v4259_v36, 0.0 }
 0x3ea   : > { %v4292_v27 = vmax.f32 %v4260_v13, 0.0  ;;  %v4744_v13 = vpop.permute.xlu0 %4743 }
 0x3eb   : > { %v4140_v24 = vpop.f32.mrb[128].mxu1  ;;  %4781 = vst.msk [vmem:[#allocation2 + $0xa0] sm:$0xff] %vm1638_vm11, %v4744_v13 }
 0x3ec   : > { %v4225_v26 = vmul.f32 %v9441_v18, %v4140_v24  ;;  %v4142_v14 = vpop.f32.mrb[129].mxu1  ;;  %v4316_v28 = vpack.c.bf16 %v4292_v27, %v4291_v61  ;;  %4797 = vst.msk [vmem:[#allocation2 + $0xa0] sm:$0x3] %vm3733_vm10, %v7681_v0 }
 0x3ed   : > { %v4143_v34 = vpop.f32.mrb[130].mxu1 }
 0x3ee   : > { %v4261_v45 = vadd.f32 %v9448_v25, %v4225_v26  ;;  %v4226_v30 = vmul.f32 %v9441_v18, %v4143_v34  ;;  %v4145_v2 = vpop.f32.mrb[131].mxu1  ;;  %6824 = vmatmul.mubr.bf16.gmra.mrb[44].mxu0 %v4316_v28 }
 0x3f0   : > { %v4262_v53 = vadd.f32 %v9448_v25, %v4226_v30  ;;  %v4293_v32 = vmax.f32 %v4261_v45, 0.0 }
 0x3f2   : > { %v4294_v33 = vmax.f32 %v4262_v53, 0.0  ;;  %v4746_v53 = vpop.permute.xlu1 %4745 }
 0x3f3   : > { %v4148_v19 = vpop.f32.mrb[132].mxu1  ;;  %4782 = vst.msk [vmem:[#allocation2 + $0xb0] sm:$0xff] %vm1638_vm11, %v4746_v53 }
 0x3f4   : > { %v4227_v42 = vmul.f32 %v9441_v18, %v4148_v19  ;;  %v4150_v41 = vpop.f32.mrb[133].mxu1  ;;  %v4317_v44 = vpack.c.bf16 %v4294_v33, %v4293_v32  ;;  %4798 = vst.msk [vmem:[#allocation2 + $0xb0] sm:$0x3] %vm3733_vm10, %v7681_v0 }
 0x3f5   : > { %v4151_v54 = vpop.f32.mrb[134].mxu1 }
 0x3f6   : > { %v4263_v35 = vadd.f32 %v9448_v25, %v4227_v42  ;;  %v4228_v56 = vmul.f32 %v9441_v18, %v4151_v54  ;;  %v4153_v29 = vpop.f32.mrb[135].mxu1  ;;  %6827 = vmatprep.mubr.bf16.mxu0 %v4317_v44 }
 0x3f8   : > { %v4264_v3 = vadd.f32 %v9448_v25, %v4228_v56  ;;  %v4295_v36 = vmax.f32 %v4263_v35, 0.0 }
 0x3fa   : > { %v4296_v5 = vmax.f32 %v4264_v3, 0.0  ;;  %v4748_v3 = vpop.permute.xlu0 %4747 }
 0x3fb   : > { %v4156_v46 = vpop.f32.mrb[136].mxu1  ;;  %4783 = vst.msk [vmem:[#allocation2 + $0xc0] sm:$0xff] %vm1638_vm11, %v4748_v3 }
 0x3fc   : > { %v4229_v61 = vmul.f32 %v9441_v18, %v4156_v46  ;;  %v4158_v27 = vpop.f32.mrb[137].mxu1  ;;  %v4318_v24 = vpack.c.bf16 %v4296_v5, %v4295_v36  ;;  %4799 = vst.msk [vmem:[#allocation2 + $0xc0] sm:$0x3] %vm3733_vm10, %v7681_v0 }
 0x3fd   : > { %v4159_v59 = vpop.f32.mrb[138].mxu1 }
 0x3fe   : > { %v4265_v26 = vadd.f32 %v9448_v25, %v4229_v61  ;;  %v4230_v14 = vmul.f32 %v9441_v18, %v4159_v59  ;;  %v4161_v28 = vpop.f32.mrb[139].mxu1  ;;  %6828 = vmatmul.mubr.bf16.gmra.mrb[48].mxu0 %v4318_v24 }
 0x400   : > { %v4266_v34 = vadd.f32 %v9448_v25, %v4230_v14  ;;  %v4297_v45 = vmax.f32 %v4265_v26, 0.0 }
 0x402   : > { %v4298_v30 = vmax.f32 %v4266_v34, 0.0  ;;  %v4750_v34 = vpop.permute.xlu1 %4749 }
 0x403   : > { %v4164_v2 = vpop.f32.mrb[140].mxu1  ;;  %4784 = vst.msk [vmem:[#allocation2 + $0xd0] sm:$0xff] %vm1638_vm11, %v4750_v34 }
 0x404   : > { %v4231_v32 = vmul.f32 %v9441_v18, %v4164_v2  ;;  %v4166_v33 = vpop.f32.mrb[141].mxu1  ;;  %v4319_v19 = vpack.c.bf16 %v4298_v30, %v4297_v45  ;;  %4800 = vst.msk [vmem:[#allocation2 + $0xd0] sm:$0x3] %vm3733_vm10, %v7681_v0 }
 0x405   : > { %v4167_v37 = vpop.f32.mrb[142].mxu1 }
 0x406   : > { %v4267_v42 = vadd.f32 %v9448_v25, %v4231_v32  ;;  %v4232_v41 = vmul.f32 %v9441_v18, %v4167_v37  ;;  %v4169_v44 = vpop.f32.mrb[143].mxu1  ;;  %6831 = vmatprep.mubr.bf16.mxu0 %v4319_v19 }
 0x408   : > { %v4268_v54 = vadd.f32 %v9448_v25, %v4232_v41  ;;  %v4299_v35 = vmax.f32 %v4267_v42, 0.0 }
 0x40a   : > { %v4300_v56 = vmax.f32 %v4268_v54, 0.0  ;;  %v4752_v54 = vpop.permute.xlu0 %4751 }
 0x40b   : > { %v4172_v29 = vpop.f32.mrb[144].mxu1  ;;  %4785 = vst.msk [vmem:[#allocation2 + $0xe0] sm:$0xff] %vm1638_vm11, %v4752_v54  ;;  %v7390_v54 = vld [vmem:[#allocation12 + $0xc8] sm:$0xff]  }
 0x40c   : > { %v4233_v36 = vmul.f32 %v9441_v18, %v4172_v29  ;;  %v4174_v5 = vpop.f32.mrb[145].mxu1  ;;  %v4320_v46 = vpack.c.bf16 %v4300_v56, %v4299_v35  ;;  %4801 = vst.msk [vmem:[#allocation2 + $0xe0] sm:$0x3] %vm3733_vm10, %v7681_v0 }
 0x40d   : > { %v4175_v13 = vpop.f32.mrb[146].mxu1 }
 0x40e   : > { %v4269_v61 = vadd.f32 %v9448_v25, %v4233_v36  ;;  %v4234_v27 = vmul.f32 %v9441_v18, %v4175_v13  ;;  %v4177_v24 = vpop.f32.mrb[147].mxu1  ;;  %6832 = vmatmul.mubr.bf16.gmra.mrb[52].mxu0 %v4320_v46 }
 0x40f   : > { %v4754_v24 = vpop.permute.xlu1 %4753 }
 0x410   : > { %v4270_v59 = vadd.f32 %v9448_v25, %v4234_v27  ;;  %v4301_v26 = vmax.f32 %v4269_v61, 0.0  ;;  %4786 = vst.msk [vmem:[#allocation2 + $0xf0] sm:$0xff] %vm1638_vm11, %v4754_v24  ;;  %v4825_v24 = vld [vmem:[#allocation2 + $0x50] sm:$0xff] }
 0x411   : > { %4802 = vst.msk [vmem:[#allocation2 + $0xf0] sm:$0x3] %vm3733_vm10, %v7681_v0  ;;  %v7393_v0 = vld [vmem:[#allocation12 + $0x108] sm:$0xff]  }
 0x412   : > { %v4302_v14 = vmax.f32 %v4270_v59, 0.0 }
 0x413   : > { %v4180_v28 = vpop.f32.mrb[148].mxu1 }
 0x414   : > { %v4235_v45 = vmul.f32 %v9441_v18, %v4180_v28  ;;  %v4182_v30 = vpop.f32.mrb[149].mxu1  ;;  %v4321_v2 = vpack.c.bf16 %v4302_v14, %v4301_v26 }
 0x415   : > { %v4183_v53 = vpop.f32.mrb[150].mxu1 }
 0x416   : > { %v4271_v32 = vadd.f32 %v9448_v25, %v4235_v45  ;;  %v4236_v33 = vmul.f32 %v9441_v18, %v4183_v53  ;;  %v4185_v19 = vpop.f32.mrb[151].mxu1  ;;  %6835 = vmatprep.mubr.bf16.mxu0 %v4321_v2 }
 0x418   : > { %v4272_v37 = vadd.f32 %v9448_v25, %v4236_v33  ;;  %v4303_v42 = vmax.f32 %v4271_v32, 0.0 }
 0x41a   : > { %v4304_v41 = vmax.f32 %v4272_v37, 0.0  ;;  %v4816_v37 = vld [vmem:[#allocation2 + $0x8] sm:$0xff] }
 0x41b   : > { %v4188_v44 = vpop.f32.mrb[152].mxu1 }
 0x41c   : > { %v4237_v35 = vmul.f32 %v9441_v18, %v4188_v44  ;;  %v4190_v56 = vpop.f32.mrb[153].mxu1  ;;  %v4322_v29 = vpack.c.bf16 %v4304_v41, %v4303_v42  ;;  %v7389_v42 = vld [vmem:[#allocation12 + $0xc0] sm:$0xff]  }
 0x41d   : > { %v4191_v3 = vpop.f32.mrb[154].mxu1  ;;  %v7392_v41 = vld [vmem:[#allocation12 + $0x100] sm:$0xff]   ;;  %6843 = vmatprep.subr.bf16.mxu0 %v7389_v42  ;;  %v4817_v56 = vld [vmem:[#allocation2 + $0x10] sm:$0xff] }
 0x41e   : > { %v4273_v36 = vadd.f32 %v9448_v25, %v4237_v35  ;;  %v4238_v5 = vmul.f32 %v9441_v18, %v4191_v3  ;;  %v4193_v46 = vpop.f32.mrb[155].mxu1  ;;  %6836 = vmatmul.mubr.bf16.gmra.mrb[56].mxu0 %v4322_v29  ;;  %6898 = vmatpush3.bf16.msra.mxu1 %v7392_v41  ;;  %v4815_v44 = vld [vmem:[#allocation2] sm:$0xff]  ;;  %v7395_v35 = vld [vmem:[#allocation12 + $0x110] sm:$0xff]   ;;  %v4820_v29 = vld [vmem:[#allocation2 + $0x28] sm:$0xff] }
 0x41f   : > { %6899 = vmatprep.subr.bf16.mxu1 %v7689_v62  ;;  %v7394_v3 = vld [vmem:[#allocation12 + $0xd8] sm:$0xff]   ;;  %v4821_v46 = vld [vmem:[#allocation2 + $0x30] sm:$0xff]  ;;  %v7398_v41 = vld [vmem:[#allocation12 + $0x120] sm:$0xff]  }
 0x420   : > { %v4274_v13 = vadd.f32 %v9448_v25, %v4238_v5  ;;  %v4305_v61 = vmax.f32 %v4273_v36, 0.0  ;;  %v4819_v36 = vld [vmem:[#allocation2 + $0x20] sm:$0xff]  ;;  %v4822_v5 = vld [vmem:[#allocation2 + $0x38] sm:$0xff] }
 0x422   : > { %v4306_v27 = vmax.f32 %v4274_v13, 0.0  ;;  %6900 = vmatpush3.bf16.msra.mxu1 %v7393_v0  ;;  %v4824_v13 = vld [vmem:[#allocation2 + $0x48] sm:$0xff] }
 0x423   : > { %v4196_v59 = vpop.f32.mrb[156].mxu1  ;;  %6901 = vmatprep.subr.bf16.mxu1 %v7689_v62  ;;  %v4840_v0 = vld [vmem:[#allocation2 + $0xc8] sm:$0xff] }
 0x424   : > { %v4239_v26 = vmul.f32 %v9441_v18, %v4196_v59  ;;  %v4198_v14 = vpop.f32.mrb[157].mxu1  ;;  %v4323_v28 = vpack.c.bf16 %v4306_v27, %v4305_v61  ;;  %v4823_v61 = vld [vmem:[#allocation2 + $0x40] sm:$0xff]  ;;  %v4826_v27 = vld [vmem:[#allocation2 + $0x58] sm:$0xff]  ;;  %v4828_v59 = vld [vmem:[#allocation2 + $0x68] sm:$0xff] }
 0x425   : > { %v4199_v34 = vpop.f32.mrb[158].mxu1  ;;  %v4830_v14 = vld [vmem:[#allocation2 + $0x78] sm:$0xff] }
 0x426   : > { %v4275_v45 = vadd.f32 %v9448_v25, %v4239_v26  ;;  %v4240_v30 = vmul.f32 %v9441_v18, %v4199_v34  ;;  %v4201_v2 = vpop.f32.mrb[159].mxu1  ;;  %6839 = vmatprep.mubr.bf16.mxu0 %v4323_v28  ;;  %v4818_v18 = vld [vmem:[#allocation2 + $0x18] sm:$0xff]  ;;  %6902 = vmatpush3.bf16.msra.mxu1 %v7395_v35  ;;  %v4827_v26 = vld [vmem:[#allocation2 + $0x60] sm:$0xff]  ;;  %v4829_v28 = vld [vmem:[#allocation2 + $0x70] sm:$0xff] }
 0x427   : > { %6903 = vmatprep.subr.bf16.mxu1 %v7689_v62  ;;  %v4832_v34 = vld [vmem:[#allocation2 + $0x88] sm:$0xff]  ;;  %v4833_v2 = vld [vmem:[#allocation2 + $0x90] sm:$0xff]  ;;  %v4839_v35 = vld [vmem:[#allocation2 + $0xc0] sm:$0xff] }
 0x428   : > { %v4276_v53 = vadd.f32 %v9448_v25, %v4240_v30  ;;  %v4307_v32 = vmax.f32 %v4275_v45, 0.0  ;;  %v7391_v25 = vld [vmem:[#allocation12 + $0xd0] sm:$0xff]   ;;  %v4831_v45 = vld [vmem:[#allocation2 + $0x80] sm:$0xff]  ;;  %v4834_v30 = vld [vmem:[#allocation2 + $0x98] sm:$0xff] }
 0x42a   : > { %v4308_v33 = vmax.f32 %v4276_v53, 0.0  ;;  %v4836_v53 = vld [vmem:[#allocation2 + $0xa8] sm:$0xff] }
 0x42c   : > { %v4324_v19 = vpack.c.bf16 %v4308_v33, %v4307_v32  ;;  %v4835_v32 = vld [vmem:[#allocation2 + $0xa0] sm:$0xff]  ;;  %v4838_v33 = vld [vmem:[#allocation2 + $0xb8] sm:$0xff] }
 0x42e   : > { %6840 = vmatmul.mubr.bf16.gmra.mrb[60].mxu0 %v4324_v19  ;;  %v7396_v19 = vld [vmem:[#allocation12 + $0x118] sm:$0xff]  }
 0x42f   : > { %6496 = vmatprep.mubr.msk.bf16.mxu0 %vm545_vm0, %v4816_v37  ;;  %6904 = vmatpush3.bf16.msra.mxu1 %v7396_v19  ;;  %v7397_v37 = vld [vmem:[#allocation12 + $0xe0] sm:$0xff]  }
 0x430   : > { %6905 = vmatprep.subr.bf16.mxu1 %v7689_v62 }
 0x433   : > { %6906 = vmatpush3.bf16.msra.mxu1 %v7398_v41 }
 0x434   : > { %6907 = vmatprep.subr.bf16.mxu1 %v7689_v62 }
 0x436   : > { %5000 = vmatmul.mubr.bf16.vlgmr.msra.gmra.mrb[64].mxu0 %v4815_v44  ;;  %v7399_v44 = vld [vmem:[#allocation12 + $0xe8] sm:$0xff]  }
 0x437   : > { %6497 = vmatprep.mubr.msk.bf16.mxu0 %vm545_vm0, %v4818_v18  ;;  %6844 = vmatpush3.bf16.msra.mxu0 %v7389_v42  ;;  %v4837_v42 = vld [vmem:[#allocation2 + $0xb0] sm:$0xff]  ;;  %v7400_v18 = vld [vmem:[#allocation12 + $0x128] sm:$0xff]  }
 0x438   : > { %6845 = vmatprep.subr.bf16.mxu0 %v7390_v54  ;;  %6908 = vmatpush3.bf16.msra.mxu1 %v7400_v18 }
 0x439   : > { %6909 = vmatprep.subr.bf16.mxu1 %v7689_v62 }
 0x43b   : > { %6846 = vmatpush3.bf16.msra.mxu0 %v7390_v54  ;;  %v7401_v54 = vld [vmem:[#allocation12 + $0xf0] sm:$0xff]  }
 0x43c   : > { %6847 = vmatprep.subr.bf16.mxu0 %v7391_v25 }
 0x43e   : > { %5008 = vmatmul.mubr.bf16.gmra.mrb[68].mxu0 %v4817_v56  ;;  %v5663_v56 = vld [vmem:[%s9932_s7 + $0x4] sm:$0x1] }
 0x43f   : > { %6498 = vmatprep.mubr.msk.bf16.mxu0 %vm545_vm0, %v4820_v29  ;;  %6848 = vmatpush3.bf16.msra.mxu0 %v7391_v25  ;;  %v7402_v29 = vld [vmem:[#allocation12 + $0x130] sm:$0xff]  }
 0x440   : > { %6849 = vmatprep.subr.bf16.mxu0 %v7394_v3  ;;  %6910 = vmatpush3.bf16.msra.mxu1 %v7402_v29 }
 0x441   : > { %6911 = vmatprep.subr.bf16.mxu1 %v7689_v62  ;;  %v4845_v62 = vld [vmem:[#allocation2 + $0xf0] sm:$0xff] }
 0x443   : > { %6850 = vmatpush3.bf16.msra.mxu0 %v7394_v3  ;;  %v4842_v3 = vld [vmem:[#allocation2 + $0xd8] sm:$0xff] }
 0x444   : > { %6851 = vmatprep.subr.bf16.mxu0 %v7397_v37 }
 0x446   : > { %5016 = vmatmul.mubr.bf16.gmra.mrb[72].mxu0 %v4819_v36 }
 0x447   : > { %6499 = vmatprep.mubr.msk.bf16.mxu0 %vm545_vm0, %v4822_v5  ;;  %6852 = vmatpush3.bf16.msra.mxu0 %v7397_v37 }
 0x448   : > { %6853 = vmatprep.subr.bf16.mxu0 %v7399_v44 }
 0x44b   : > { %6854 = vmatpush3.bf16.msra.mxu0 %v7399_v44 }
 0x44c   : > { %6855 = vmatprep.subr.bf16.mxu0 %v7401_v54 }
 0x44e   : > { %5024 = vmatmul.mubr.bf16.gmra.mrb[76].mxu0 %v4821_v46  ;;  %v5664_v46 = vld [vmem:[%s9933_s8 + $0x4] sm:$0x1] }
 0x44f   : > { %6500 = vmatprep.mubr.msk.bf16.mxu0 %vm545_vm0, %v4824_v13  ;;  %6856 = vmatpush3.bf16.msra.mxu0 %v7401_v54 }
 0x456   : > { %5032 = vmatmul.mubr.bf16.gmra.mrb[80].mxu0 %v4823_v61 }
 0x457   : > { %6501 = vmatprep.mubr.msk.bf16.mxu0 %vm545_vm0, %v4826_v27  ;;  %v7403_v27 = vld [vmem:[#allocation12 + $0xf8] sm:$0xff]  }
 0x458   : > { %6857 = vmatprep.subr.bf16.mxu0 %v7403_v27 }
 0x459   : > { %6858 = vmatpush3.bf16.msra.mxu0 %v7403_v27 }
 0x45e   : > { %5040 = vmatmul.mubr.bf16.gmra.mrb[84].mxu0 %v4825_v24 }
 0x45f   : > { %6502 = vmatprep.mubr.msk.bf16.mxu0 %vm545_vm0, %v4828_v59  ;;  %v7404_v59 = vld [vmem:[#allocation12 + $0x138] sm:$0xff]  }
 0x460   : > { %6912 = vmatpush3.bf16.msra.mxu1 %v7404_v59 }
 0x466   : > { %5048 = vmatmul.mubr.bf16.gmra.mrb[88].mxu0 %v4827_v26 }
 0x467   : > { %6503 = vmatprep.mubr.msk.bf16.mxu0 %vm545_vm0, %v4830_v14 }
 0x46e   : > { %5056 = vmatmul.mubr.bf16.gmra.mrb[92].mxu0 %v4829_v28  ;;  %v4841_v28 = vld [vmem:[#allocation2 + $0xd0] sm:$0xff] }
 0x46f   : > { %6504 = vmatprep.mubr.msk.bf16.mxu0 %vm545_vm0, %v4832_v34  ;;  %v4844_v34 = vld [vmem:[#allocation2 + $0xe8] sm:$0xff] }
 0x476   : > { %5064 = vmatmul.mubr.bf16.gmra.mrb[96].mxu0 %v4831_v45  ;;  %v4843_v45 = vld [vmem:[#allocation2 + $0xe0] sm:$0xff] }
 0x477   : > { %6505 = vmatprep.mubr.msk.bf16.mxu0 %vm545_vm0, %v4834_v30  ;;  %v4846_v30 = vld [vmem:[#allocation2 + $0xf8] sm:$0xff] }
 0x47e   : > { %5072 = vmatmul.mubr.bf16.gmra.mrb[100].mxu0 %v4833_v2  ;;  %v9628_v2 = vld [vmem:[%s9932_s7 + $0x3] ss:$0 sm:$0xff] }
 0x47f   : > { %6506 = vmatprep.mubr.msk.bf16.mxu0 %vm545_vm0, %v4836_v53 }
 0x486   : > { %5080 = vmatmul.mubr.bf16.gmra.mrb[104].mxu0 %v4835_v32  ;;  %v9633_v32 = vld [vmem:[%s9933_s8 + $0x3] ss:$0 sm:$0xff] }
 0x487   : > { %6507 = vmatprep.mubr.msk.bf16.mxu0 %vm545_vm0, %v4838_v33  ;;  %v5657_v25 = vpop.f32.mrb[160].mxu1 }
 0x488   : > { %v5665_v36 = vmul.f32 %v5663_v56, %v5657_v25  ;;  %v6895_v5 = vpop.f32.mrb[161].mxu1 }
 0x489   : > { %v5660_v13 = vpop.f32.mrb[162].mxu1 }
 0x48a   : > { %v5666_v61 = vadd.f32 %v5665_v36, %v5664_v46  ;;  %v6896_v24 = vpop.f32.mrb[163].mxu1 }
 0x48c   : > { %v5667_v26 = vmax.f32 %v5666_v61, 0.0 }
 0x48e   : > { %5088 = vmatmul.mubr.bf16.gmra.mrb[108].mxu0 %v4837_v42  ;;  %v5668_v14 = vpack.c.bf16 %v5667_v26, %v5667_v26 }
 0x48f   : > { %6508 = vmatprep.mubr.msk.bf16.mxu0 %vm545_vm0, %v4840_v0 }
 0x490   : > { %6914 = vmatmul.mubr.bf16.vlgmr.msra.gmra.mrb[164].mxu1 %v5668_v14 }
 0x496   : > { %5096 = vmatmul.mubr.bf16.gmra.mrb[112].mxu0 %v4839_v35 }
 0x497   : > { %6509 = vmatprep.mubr.msk.bf16.mxu0 %vm545_vm0, %v4842_v3 }
 0x49e   : > { %5104 = vmatmul.mubr.bf16.gmra.mrb[116].mxu0 %v4841_v28 }
 0x49f   : > { %6510 = vmatprep.mubr.msk.bf16.mxu0 %vm545_vm0, %v4844_v34 }
 0x4a6   : > { %5112 = vmatmul.mubr.bf16.gmra.mrb[120].mxu0 %v4843_v45 }
 0x4a7   : > { %6511 = vmatprep.mubr.msk.bf16.mxu0 %vm545_vm0, %v4846_v30 }
 0x4ae   : > { %5120 = vmatmul.mubr.bf16.gmra.mrb[124].mxu0 %v4845_v62 }
 0x509   : > { %v5001_v53 = vpop.f32.mrb[64].mxu0 }
 0x50a   : > { %v5134_v33 = vmul.f32 %v9628_v2, %v5001_v53  ;;  %v5003_v19 = vpop.f32.mrb[65].mxu0 }
 0x50b   : > { %v5004_v37 = vpop.f32.mrb[66].mxu0 }
 0x50c   : > { %v5170_v42 = vadd.f32 %v9633_v32, %v5134_v33  ;;  %v5135_v41 = vmul.f32 %v9628_v2, %v5004_v37  ;;  %v5006_v0 = vpop.f32.mrb[67].mxu0 }
 0x50e   : > { %v5171_v44 = vadd.f32 %v9633_v32, %v5135_v41  ;;  %v5202_v18 = vmax.f32 %v5170_v42, 0.0 }
 0x510   : > { %v5203_v54 = vmax.f32 %v5171_v44, 0.0 }
 0x511   : > { %v5009_v35 = vpop.f32.mrb[68].mxu0 }
 0x512   : > { %v5136_v25 = vmul.f32 %v9628_v2, %v5009_v35  ;;  %v5011_v56 = vpop.f32.mrb[69].mxu0  ;;  %v5234_v29 = vpack.c.bf16 %v5203_v54, %v5202_v18 }
 0x513   : > { %v5012_v3 = vpop.f32.mrb[70].mxu0 }
 0x514   : > { %v5172_v36 = vadd.f32 %v9633_v32, %v5136_v25  ;;  %v5137_v5 = vmul.f32 %v9628_v2, %v5012_v3  ;;  %v5014_v46 = vpop.f32.mrb[71].mxu0  ;;  %6859 = vmatprep.mubr.bf16.mxu0 %v5234_v29 }
 0x516   : > { %v5173_v13 = vadd.f32 %v9633_v32, %v5137_v5  ;;  %v5204_v61 = vmax.f32 %v5172_v36, 0.0 }
 0x518   : > { %v5205_v27 = vmax.f32 %v5173_v13, 0.0 }
 0x519   : > { %v5017_v24 = vpop.f32.mrb[72].mxu0 }
 0x51a   : > { %v5235_v59 = vpack.c.bf16 %v5205_v27, %v5204_v61  ;;  %v5138_v26 = vmul.f32 %v9628_v2, %v5017_v24  ;;  %v5019_v14 = vpop.f32.mrb[73].mxu0 }
 0x51b   : > { %v5020_v28 = vpop.f32.mrb[74].mxu0 }
 0x51c   : > { %v5174_v34 = vadd.f32 %v9633_v32, %v5138_v26  ;;  %v5139_v45 = vmul.f32 %v9628_v2, %v5020_v28  ;;  %v5022_v30 = vpop.f32.mrb[75].mxu0  ;;  %6860 = vmatmul.mubr.bf16.vlgmr.msra.gmra.mrb[32].mxu0 %v5235_v59 }
 0x51e   : > { %v5175_v62 = vadd.f32 %v9633_v32, %v5139_v45  ;;  %v5206_v53 = vmax.f32 %v5174_v34, 0.0 }
 0x520   : > { %v5207_v33 = vmax.f32 %v5175_v62, 0.0 }
 0x521   : > { %v5025_v19 = vpop.f32.mrb[76].mxu0 }
 0x522   : > { %v5140_v37 = vmul.f32 %v9628_v2, %v5025_v19  ;;  %v5027_v42 = vpop.f32.mrb[77].mxu0  ;;  %v5236_v41 = vpack.c.bf16 %v5207_v33, %v5206_v53 }
 0x523   : > { %v5028_v0 = vpop.f32.mrb[78].mxu0 }
 0x524   : > { %v5176_v44 = vadd.f32 %v9633_v32, %v5140_v37  ;;  %v5141_v18 = vmul.f32 %v9628_v2, %v5028_v0  ;;  %v5030_v54 = vpop.f32.mrb[79].mxu0  ;;  %6863 = vmatprep.mubr.bf16.mxu0 %v5236_v41 }
 0x526   : > { %v5177_v35 = vadd.f32 %v9633_v32, %v5141_v18  ;;  %v5208_v25 = vmax.f32 %v5176_v44, 0.0 }
 0x528   : > { %v5209_v56 = vmax.f32 %v5177_v35, 0.0 }
 0x529   : > { %v5033_v29 = vpop.f32.mrb[80].mxu0 }
 0x52a   : > { %v5142_v3 = vmul.f32 %v9628_v2, %v5033_v29  ;;  %v5035_v36 = vpop.f32.mrb[81].mxu0  ;;  %v5237_v5 = vpack.c.bf16 %v5209_v56, %v5208_v25 }
 0x52b   : > { %v5036_v46 = vpop.f32.mrb[82].mxu0 }
 0x52c   : > { %v5178_v13 = vadd.f32 %v9633_v32, %v5142_v3  ;;  %v5143_v61 = vmul.f32 %v9628_v2, %v5036_v46  ;;  %v5038_v27 = vpop.f32.mrb[83].mxu0  ;;  %6864 = vmatmul.mubr.bf16.gmra.mrb[36].mxu0 %v5237_v5 }
 0x52e   : > { %v5179_v24 = vadd.f32 %v9633_v32, %v5143_v61  ;;  %v5210_v59 = vmax.f32 %v5178_v13, 0.0 }
 0x530   : > { %v5211_v26 = vmax.f32 %v5179_v24, 0.0 }
 0x531   : > { %v5041_v14 = vpop.f32.mrb[84].mxu0 }
 0x532   : > { %v5144_v28 = vmul.f32 %v9628_v2, %v5041_v14  ;;  %v5043_v34 = vpop.f32.mrb[85].mxu0  ;;  %v5238_v45 = vpack.c.bf16 %v5211_v26, %v5210_v59 }
 0x533   : > { %v5044_v30 = vpop.f32.mrb[86].mxu0 }
 0x534   : > { %v5180_v62 = vadd.f32 %v9633_v32, %v5144_v28  ;;  %v5145_v53 = vmul.f32 %v9628_v2, %v5044_v30  ;;  %v5046_v33 = vpop.f32.mrb[87].mxu0  ;;  %6867 = vmatprep.mubr.bf16.mxu0 %v5238_v45 }
 0x536   : > { %v5181_v19 = vadd.f32 %v9633_v32, %v5145_v53  ;;  %v5212_v37 = vmax.f32 %v5180_v62, 0.0 }
 0x538   : > { %v5213_v42 = vmax.f32 %v5181_v19, 0.0 }
 0x539   : > { %v5049_v41 = vpop.f32.mrb[88].mxu0 }
 0x53a   : > { %v5146_v0 = vmul.f32 %v9628_v2, %v5049_v41  ;;  %v5051_v44 = vpop.f32.mrb[89].mxu0  ;;  %v5239_v18 = vpack.c.bf16 %v5213_v42, %v5212_v37 }
 0x53b   : > { %v5052_v54 = vpop.f32.mrb[90].mxu0 }
 0x53c   : > { %v5182_v35 = vadd.f32 %v9633_v32, %v5146_v0  ;;  %v5147_v25 = vmul.f32 %v9628_v2, %v5052_v54  ;;  %v5054_v56 = vpop.f32.mrb[91].mxu0  ;;  %6868 = vmatmul.mubr.bf16.gmra.mrb[40].mxu0 %v5239_v18 }
 0x53e   : > { %v5183_v29 = vadd.f32 %v9633_v32, %v5147_v25  ;;  %v5214_v3 = vmax.f32 %v5182_v35, 0.0 }
 0x540   : > { %v5215_v36 = vmax.f32 %v5183_v29, 0.0 }
 0x541   : > { %v5057_v5 = vpop.f32.mrb[92].mxu0 }
 0x542   : > { %v5148_v46 = vmul.f32 %v9628_v2, %v5057_v5  ;;  %v5059_v13 = vpop.f32.mrb[93].mxu0  ;;  %v5240_v61 = vpack.c.bf16 %v5215_v36, %v5214_v3 }
 0x543   : > { %v5060_v27 = vpop.f32.mrb[94].mxu0 }
 0x544   : > { %v5184_v24 = vadd.f32 %v9633_v32, %v5148_v46  ;;  %v5149_v59 = vmul.f32 %v9628_v2, %v5060_v27  ;;  %v5062_v26 = vpop.f32.mrb[95].mxu0  ;;  %6871 = vmatprep.mubr.bf16.mxu0 %v5240_v61 }
 0x546   : > { %v5185_v14 = vadd.f32 %v9633_v32, %v5149_v59  ;;  %v5216_v28 = vmax.f32 %v5184_v24, 0.0 }
 0x548   : > { %v5217_v34 = vmax.f32 %v5185_v14, 0.0 }
 0x549   : > { %v5065_v45 = vpop.f32.mrb[96].mxu0 }
 0x54a   : > { %v5150_v30 = vmul.f32 %v9628_v2, %v5065_v45  ;;  %v5067_v62 = vpop.f32.mrb[97].mxu0  ;;  %v5241_v53 = vpack.c.bf16 %v5217_v34, %v5216_v28 }
 0x54b   : > { %v5068_v33 = vpop.f32.mrb[98].mxu0 }
 0x54c   : > { %v5186_v19 = vadd.f32 %v9633_v32, %v5150_v30  ;;  %v5151_v37 = vmul.f32 %v9628_v2, %v5068_v33  ;;  %v5070_v42 = vpop.f32.mrb[99].mxu0  ;;  %6872 = vmatmul.mubr.bf16.gmra.mrb[44].mxu0 %v5241_v53 }
 0x54e   : > { %v5187_v41 = vadd.f32 %v9633_v32, %v5151_v37  ;;  %v5218_v0 = vmax.f32 %v5186_v19, 0.0 }
 0x550   : > { %v5219_v44 = vmax.f32 %v5187_v41, 0.0 }
 0x551   : > { %v5073_v18 = vpop.f32.mrb[100].mxu0 }
 0x552   : > { %v5152_v54 = vmul.f32 %v9628_v2, %v5073_v18  ;;  %v5075_v35 = vpop.f32.mrb[101].mxu0  ;;  %v5242_v25 = vpack.c.bf16 %v5219_v44, %v5218_v0 }
 0x553   : > { %v5076_v56 = vpop.f32.mrb[102].mxu0 }
 0x554   : > { %v5188_v29 = vadd.f32 %v9633_v32, %v5152_v54  ;;  %v5153_v3 = vmul.f32 %v9628_v2, %v5076_v56  ;;  %v5078_v36 = vpop.f32.mrb[103].mxu0  ;;  %6875 = vmatprep.mubr.bf16.mxu0 %v5242_v25 }
 0x556   : > { %v5189_v5 = vadd.f32 %v9633_v32, %v5153_v3  ;;  %v5220_v46 = vmax.f32 %v5188_v29, 0.0 }
 0x558   : > { %v5221_v13 = vmax.f32 %v5189_v5, 0.0 }
 0x559   : > { %v5081_v61 = vpop.f32.mrb[104].mxu0 }
 0x55a   : > { %v5154_v27 = vmul.f32 %v9628_v2, %v5081_v61  ;;  %v5083_v24 = vpop.f32.mrb[105].mxu0  ;;  %v5243_v59 = vpack.c.bf16 %v5221_v13, %v5220_v46 }
 0x55b   : > { %v5084_v26 = vpop.f32.mrb[106].mxu0 }
 0x55c   : > { %v5190_v14 = vadd.f32 %v9633_v32, %v5154_v27  ;;  %v5155_v28 = vmul.f32 %v9628_v2, %v5084_v26  ;;  %v5086_v34 = vpop.f32.mrb[107].mxu0  ;;  %6876 = vmatmul.mubr.bf16.gmra.mrb[48].mxu0 %v5243_v59 }
 0x55e   : > { %v5191_v45 = vadd.f32 %v9633_v32, %v5155_v28  ;;  %v5222_v30 = vmax.f32 %v5190_v14, 0.0 }
 0x560   : > { %v5223_v62 = vmax.f32 %v5191_v45, 0.0 }
 0x561   : > { %v5089_v53 = vpop.f32.mrb[108].mxu0 }
 0x562   : > { %v5156_v33 = vmul.f32 %v9628_v2, %v5089_v53  ;;  %v5091_v19 = vpop.f32.mrb[109].mxu0  ;;  %v5244_v37 = vpack.c.bf16 %v5223_v62, %v5222_v30 }
 0x563   : > { %v5092_v42 = vpop.f32.mrb[110].mxu0  ;;  %v5768_v27 = vpop.f32.mrb[164].mxu1 }
 0x564   : > { %v5192_v41 = vadd.f32 %v9633_v32, %v5156_v33  ;;  %v5157_v0 = vmul.f32 %v9628_v2, %v5092_v42  ;;  %v5094_v44 = vpop.f32.mrb[111].mxu0  ;;  %6879 = vmatprep.mubr.bf16.mxu0 %v5244_v37  ;;  %v6915_v26 = vpop.f32.mrb[165].mxu1 }
 0x565   : > { %v5771_v28 = vpop.f32.mrb[166].mxu1 }
 0x566   : > { %v5193_v18 = vadd.f32 %v9633_v32, %v5157_v0  ;;  %v5224_v54 = vmax.f32 %v5192_v41, 0.0  ;;  %v6916_v62 = vpop.f32.mrb[167].mxu1 }
 0x568   : > { %v5225_v35 = vmax.f32 %v5193_v18, 0.0 }
 0x569   : > { %v5097_v25 = vpop.f32.mrb[112].mxu0 }
 0x56a   : > { %v5158_v56 = vmul.f32 %v9628_v2, %v5097_v25  ;;  %v5099_v29 = vpop.f32.mrb[113].mxu0  ;;  %v5245_v3 = vpack.c.bf16 %v5225_v35, %v5224_v54 }
 0x56b   : > { %v5100_v36 = vpop.f32.mrb[114].mxu0 }
 0x56c   : > { %v5194_v5 = vadd.f32 %v9633_v32, %v5158_v56  ;;  %v5159_v46 = vmul.f32 %v9628_v2, %v5100_v36  ;;  %v5102_v13 = vpop.f32.mrb[115].mxu0  ;;  %6880 = vmatmul.mubr.bf16.gmra.mrb[52].mxu0 %v5245_v3 }
 0x56e   : > { %v5195_v61 = vadd.f32 %v9633_v32, %v5159_v46  ;;  %v5226_v24 = vmax.f32 %v5194_v5, 0.0 }
 0x570   : > { %v5227_v59 = vmax.f32 %v5195_v61, 0.0 }
 0x571   : > { %v5105_v14 = vpop.f32.mrb[116].mxu0 }
 0x572   : > { %v5160_v34 = vmul.f32 %v9628_v2, %v5105_v14  ;;  %v5107_v45 = vpop.f32.mrb[117].mxu0  ;;  %v5246_v30 = vpack.c.bf16 %v5227_v59, %v5226_v24 }
 0x573   : > { %v5108_v53 = vpop.f32.mrb[118].mxu0 }
 0x574   : > { %v5196_v33 = vadd.f32 %v9633_v32, %v5160_v34  ;;  %v5161_v19 = vmul.f32 %v9628_v2, %v5108_v53  ;;  %v5110_v37 = vpop.f32.mrb[119].mxu0  ;;  %6883 = vmatprep.mubr.bf16.mxu0 %v5246_v30 }
 0x576   : > { %v5197_v42 = vadd.f32 %v9633_v32, %v5161_v19  ;;  %v5228_v41 = vmax.f32 %v5196_v33, 0.0  ;;  %v5774_v33 = vlaneseq }
 0x578   : > { %v5229_v0 = vmax.f32 %v5197_v42, 0.0  ;;  %v5775_v19 = vshrl.u32 %v5774_v33, 7 }
 0x579   : > { %v5113_v44 = vpop.f32.mrb[120].mxu0 }
 0x57a   : > { %v5162_v18 = vmul.f32 %v9628_v2, %v5113_v44  ;;  %v5115_v54 = vpop.f32.mrb[121].mxu0  ;;  %v5247_v35 = vpack.c.bf16 %v5229_v0, %v5228_v41  ;;  %v5776_v37 = vsub.s32 0, %v5775_v19 }
 0x57b   : > { %v5116_v25 = vpop.f32.mrb[122].mxu0 }
 0x57c   : > { %v5198_v56 = vadd.f32 %v9633_v32, %v5162_v18  ;;  %v5163_v29 = vmul.f32 %v9628_v2, %v5116_v25  ;;  %v5118_v3 = vpop.f32.mrb[123].mxu0  ;;  %6884 = vmatmul.mubr.bf16.gmra.mrb[56].mxu0 %v5247_v35  ;;  %v9699_v42 = vrot.slane %v5768_v27, %v5776_v37  ;;  %v9713_v27 = vld [vmem:[%s9933_s8 + $0x5] ss:$0 sm:$0xff] }
 0x57e   : > { %v5199_v36 = vadd.f32 %v9633_v32, %v5163_v29  ;;  %v5230_v5 = vmax.f32 %v5198_v56, 0.0 }
 0x580   : > { %v5231_v46 = vmax.f32 %v5199_v36, 0.0 }
 0x581   : > { %v5121_v13 = vpop.f32.mrb[124].mxu0 }
 0x582   : > { %v5164_v61 = vmul.f32 %v9628_v2, %v5121_v13  ;;  %v5123_v24 = vpop.f32.mrb[125].mxu0  ;;  %v5248_v59 = vpack.c.bf16 %v5231_v46, %v5230_v5 }
 0x583   : > { %v5124_v26 = vpop.f32.mrb[126].mxu0 }
 0x584   : > { %v5200_v14 = vadd.f32 %v9633_v32, %v5164_v61  ;;  %v5165_v28 = vmul.f32 %v9628_v2, %v5124_v26  ;;  %v5126_v34 = vpop.f32.mrb[127].mxu0  ;;  %6887 = vmatprep.mubr.bf16.mxu0 %v5248_v59  ;;  %v9705_v2 = vld [vmem:[%s9932_s7 + $0x5] ss:$0 sm:$0xff] }
 0x586   : > { %v5201_v45 = vadd.f32 %v9633_v32, %v5165_v28  ;;  %v5232_v30 = vmax.f32 %v5200_v14, 0.0 }
 0x588   : > { %v5233_v62 = vmax.f32 %v5201_v45, 0.0 }
 0x58a   : > { %v5249_v53 = vpack.c.bf16 %v5233_v62, %v5232_v30 }
 0x58c   : > { %6888 = vmatmul.mubr.bf16.gmra.mrb[60].mxu0 %v5249_v53 }
 0x5ef   : > { %v6861_v41 = vpop.f32.mrb[32].mxu0 }
 0x5f0   : > { %v6917_v0 = vadd.f32 %v6861_v41, %v9286_v12  ;;  %v5349_v44 = vpop.f32.mrb[33].mxu0 }
 0x5f1   : > { %v6918_v32 = vadd.f32 %v5349_v44, %v9289_v52  ;;  %v6862_v18 = vpop.f32.mrb[34].mxu0 }
 0x5f2   : > { %v5780_v54 = vadd.f32 %v6917_v0, %v9699_v42  ;;  %v6919_v35 = vadd.f32 %v6862_v18, %v9292_v23  ;;  %v5352_v25 = vpop.f32.mrb[35].mxu0 }
 0x5f3   : > { %v5778_v12 = vadd.f32 %v6918_v32, %v9699_v42  ;;  %v6920_v56 = vadd.f32 %v5352_v25, %v9296_v39 }
 0x5f4   : > { %v5818_v29 = vmul.f32 %v9705_v2, %v5780_v54  ;;  %v5781_v52 = vadd.f32 %v6919_v35, %v9699_v42 }
 0x5f5   : > { %v5816_v3 = vmul.f32 %v9705_v2, %v5778_v12  ;;  %v5779_v36 = vadd.f32 %v6920_v56, %v9699_v42 }
 0x5f6   : > { %v5819_v23 = vmul.f32 %v9705_v2, %v5781_v52  ;;  %v5854_v5 = vadd.f32 %v9713_v27, %v5818_v29 }
 0x5f7   : > { %v5852_v46 = vadd.f32 %v9713_v27, %v5816_v3  ;;  %v5817_v13 = vmul.f32 %v9705_v2, %v5779_v36 }
 0x5f8   : > { %v5855_v61 = vadd.f32 %v9713_v27, %v5819_v23  ;;  %v5886_v39 = vmax.f32 %v5854_v5, 0.0 }
 0x5f9   : > { %v5884_v24 = vmax.f32 %v5852_v46, 0.0  ;;  %v5853_v59 = vadd.f32 %v9713_v27, %v5817_v13 }
 0x5fa   : > { %v5887_v26 = vmax.f32 %v5855_v61, 0.0  ;;  %5918 = vst [vmem:[%s9728_s29 + $0x10] sm:$0xff] %v5886_v39 }
 0x5fb   : > { %5916 = vst [vmem:[%s9728_s29] sm:$0xff] %v5884_v24  ;;  %v5885_v14 = vmax.f32 %v5853_v59, 0.0 }
 0x5fc   : > { %5919 = vst [vmem:[%s9728_s29 + $0x18] sm:$0xff] %v5887_v26 }
 0x5fd   : > { %5917 = vst [vmem:[%s9728_s29 + $0x8] sm:$0xff] %v5885_v14 }
 0x5ff   : > { %v6865_v28 = vpop.f32.mrb[36].mxu0 }
 0x600   : > { %v6921_v34 = vadd.f32 %v6865_v28, %v9314_v21  ;;  %v5365_v45 = vpop.f32.mrb[37].mxu0 }
 0x601   : > { %v6922_v30 = vadd.f32 %v5365_v45, %v9316_v31  ;;  %v6866_v62 = vpop.f32.mrb[38].mxu0 }
 0x602   : > { %v5784_v53 = vadd.f32 %v6921_v34, %v9699_v42  ;;  %v6923_v33 = vadd.f32 %v6866_v62, %v9318_v6  ;;  %v5368_v19 = vpop.f32.mrb[39].mxu0 }
 0x603   : > { %v5782_v37 = vadd.f32 %v6922_v30, %v9699_v42  ;;  %v6924_v41 = vadd.f32 %v5368_v19, %v9321_v10 }
 0x604   : > { %v5822_v0 = vmul.f32 %v9705_v2, %v5784_v53  ;;  %v5785_v21 = vadd.f32 %v6923_v33, %v9699_v42 }
 0x605   : > { %v5820_v31 = vmul.f32 %v9705_v2, %v5782_v37  ;;  %v5783_v44 = vadd.f32 %v6924_v41, %v9699_v42 }
 0x606   : > { %v5858_v32 = vadd.f32 %v9713_v27, %v5822_v0  ;;  %v5823_v6 = vmul.f32 %v9705_v2, %v5785_v21 }
 0x607   : > { %v5856_v18 = vadd.f32 %v9713_v27, %v5820_v31  ;;  %v5821_v54 = vmul.f32 %v9705_v2, %v5783_v44 }
 0x608   : > { %v5890_v35 = vmax.f32 %v5858_v32, 0.0  ;;  %v5859_v10 = vadd.f32 %v9713_v27, %v5823_v6 }
 0x609   : > { %v5888_v25 = vmax.f32 %v5856_v18, 0.0  ;;  %v5857_v12 = vadd.f32 %v9713_v27, %v5821_v54 }
 0x60a   : > { %5922 = vst [vmem:[%s9728_s29 + $0x30] sm:$0xff] %v5890_v35  ;;  %v5891_v56 = vmax.f32 %v5859_v10, 0.0 }
 0x60b   : > { %5920 = vst [vmem:[%s9728_s29 + $0x20] sm:$0xff] %v5888_v25  ;;  %v5889_v29 = vmax.f32 %v5857_v12, 0.0 }
 0x60c   : > { %5923 = vst [vmem:[%s9728_s29 + $0x38] sm:$0xff] %v5891_v56 }
 0x60d   : > { %5921 = vst [vmem:[%s9728_s29 + $0x28] sm:$0xff] %v5889_v29 }
 0x60f   : > { %v6869_v52 = vpop.f32.mrb[40].mxu0 }
 0x610   : > { %v6925_v3 = vadd.f32 %v6869_v52, %v9343_v16  ;;  %v5381_v36 = vpop.f32.mrb[41].mxu0 }
 0x611   : > { %v6926_v23 = vadd.f32 %v5381_v36, %v9346_v8  ;;  %v6870_v5 = vpop.f32.mrb[42].mxu0 }
 0x612   : > { %v5788_v46 = vadd.f32 %v6925_v3, %v9699_v42  ;;  %v6927_v13 = vadd.f32 %v6870_v5, %v9350_v15  ;;  %v5384_v61 = vpop.f32.mrb[43].mxu0 }
 0x613   : > { %v5786_v39 = vadd.f32 %v6926_v23, %v9699_v42  ;;  %v6928_v24 = vadd.f32 %v5384_v61, %v9354_v17 }
 0x614   : > { %v5826_v59 = vmul.f32 %v9705_v2, %v5788_v46  ;;  %v5789_v16 = vadd.f32 %v6927_v13, %v9699_v42 }
 0x615   : > { %v5824_v8 = vmul.f32 %v9705_v2, %v5786_v39  ;;  %v5787_v26 = vadd.f32 %v6928_v24, %v9699_v42 }
 0x616   : > { %v5862_v14 = vadd.f32 %v9713_v27, %v5826_v59  ;;  %v5827_v15 = vmul.f32 %v9705_v2, %v5789_v16 }
 0x617   : > { %v5860_v28 = vadd.f32 %v9713_v27, %v5824_v8  ;;  %v5825_v34 = vmul.f32 %v9705_v2, %v5787_v26 }
 0x618   : > { %v5894_v45 = vmax.f32 %v5862_v14, 0.0  ;;  %v5863_v17 = vadd.f32 %v9713_v27, %v5827_v15 }
 0x619   : > { %v5892_v30 = vmax.f32 %v5860_v28, 0.0  ;;  %v5861_v62 = vadd.f32 %v9713_v27, %v5825_v34 }
 0x61a   : > { %5926 = vst [vmem:[%s9728_s29 + $0x50] sm:$0xff] %v5894_v45  ;;  %v5895_v53 = vmax.f32 %v5863_v17, 0.0 }
 0x61b   : > { %5924 = vst [vmem:[%s9728_s29 + $0x40] sm:$0xff] %v5892_v30  ;;  %v5893_v33 = vmax.f32 %v5861_v62, 0.0 }
 0x61c   : > { %5927 = vst [vmem:[%s9728_s29 + $0x58] sm:$0xff] %v5895_v53 }
 0x61d   : > { %5925 = vst [vmem:[%s9728_s29 + $0x48] sm:$0xff] %v5893_v33 }
 0x61f   : > { %v6873_v19 = vpop.f32.mrb[44].mxu0 }
 0x620   : > { %v6929_v37 = vadd.f32 %v6873_v19, %v9371_v38  ;;  %v5397_v41 = vpop.f32.mrb[45].mxu0 }
 0x621   : > { %v6930_v0 = vadd.f32 %v5397_v41, %v9375_v7  ;;  %v6874_v21 = vpop.f32.mrb[46].mxu0 }
 0x622   : > { %v5792_v31 = vadd.f32 %v6929_v37, %v9699_v42  ;;  %v6931_v44 = vadd.f32 %v6874_v21, %v9377_v22  ;;  %v5400_v32 = vpop.f32.mrb[47].mxu0 }
 0x623   : > { %v5790_v6 = vadd.f32 %v6930_v0, %v9699_v42  ;;  %v6932_v18 = vadd.f32 %v5400_v32, %v9379_v43 }
 0x624   : > { %v5830_v54 = vmul.f32 %v9705_v2, %v5792_v31  ;;  %v5793_v38 = vadd.f32 %v6931_v44, %v9699_v42 }
 0x625   : > { %v5828_v7 = vmul.f32 %v9705_v2, %v5790_v6  ;;  %v5791_v35 = vadd.f32 %v6932_v18, %v9699_v42 }
 0x626   : > { %v5866_v10 = vadd.f32 %v9713_v27, %v5830_v54  ;;  %v5831_v22 = vmul.f32 %v9705_v2, %v5793_v38 }
 0x627   : > { %v5864_v25 = vadd.f32 %v9713_v27, %v5828_v7  ;;  %v5829_v12 = vmul.f32 %v9705_v2, %v5791_v35 }
 0x628   : > { %v5898_v56 = vmax.f32 %v5866_v10, 0.0  ;;  %v5867_v43 = vadd.f32 %v9713_v27, %v5831_v22 }
 0x629   : > { %v5896_v29 = vmax.f32 %v5864_v25, 0.0  ;;  %v5865_v52 = vadd.f32 %v9713_v27, %v5829_v12 }
 0x62a   : > { %5930 = vst [vmem:[%s9728_s29 + $0x70] sm:$0xff] %v5898_v56  ;;  %v5899_v3 = vmax.f32 %v5867_v43, 0.0 }
 0x62b   : > { %5928 = vst [vmem:[%s9728_s29 + $0x60] sm:$0xff] %v5896_v29  ;;  %v5897_v36 = vmax.f32 %v5865_v52, 0.0 }
 0x62c   : > { %5931 = vst [vmem:[%s9728_s29 + $0x78] sm:$0xff] %v5899_v3 }
 0x62d   : > { %5929 = vst [vmem:[%s9728_s29 + $0x68] sm:$0xff] %v5897_v36 }
 0x62f   : > { %v6877_v23 = vpop.f32.mrb[48].mxu0 }
 0x630   : > { %v6933_v5 = vadd.f32 %v6877_v23, %v9388_v48  ;;  %v5413_v46 = vpop.f32.mrb[49].mxu0 }
 0x631   : > { %v6934_v13 = vadd.f32 %v5413_v46, %v9390_v49  ;;  %v6878_v61 = vpop.f32.mrb[50].mxu0 }
 0x632   : > { %v5796_v39 = vadd.f32 %v6933_v5, %v9699_v42  ;;  %v6935_v24 = vadd.f32 %v6878_v61, %v9392_v50  ;;  %v5416_v59 = vpop.f32.mrb[51].mxu0 }
 0x633   : > { %v5794_v16 = vadd.f32 %v6934_v13, %v9699_v42  ;;  %v6936_v8 = vadd.f32 %v5416_v59, %v9395_v55 }
 0x634   : > { %v5834_v26 = vmul.f32 %v9705_v2, %v5796_v39  ;;  %v5797_v48 = vadd.f32 %v6935_v24, %v9699_v42 }
 0x635   : > { %v5832_v49 = vmul.f32 %v9705_v2, %v5794_v16  ;;  %v5795_v14 = vadd.f32 %v6936_v8, %v9699_v42 }
 0x636   : > { %v5870_v15 = vadd.f32 %v9713_v27, %v5834_v26  ;;  %v5835_v50 = vmul.f32 %v9705_v2, %v5797_v48 }
 0x637   : > { %v5868_v28 = vadd.f32 %v9713_v27, %v5832_v49  ;;  %v5833_v34 = vmul.f32 %v9705_v2, %v5795_v14 }
 0x638   : > { %v5902_v45 = vmax.f32 %v5870_v15, 0.0  ;;  %v5871_v55 = vadd.f32 %v9713_v27, %v5835_v50 }
 0x639   : > { %v5900_v17 = vmax.f32 %v5868_v28, 0.0  ;;  %v5869_v30 = vadd.f32 %v9713_v27, %v5833_v34 }
 0x63a   : > { %5934 = vst [vmem:[%s9728_s29 + $0x90] sm:$0xff] %v5902_v45  ;;  %v5903_v62 = vmax.f32 %v5871_v55, 0.0 }
 0x63b   : > { %5932 = vst [vmem:[%s9728_s29 + $0x80] sm:$0xff] %v5900_v17  ;;  %v5901_v53 = vmax.f32 %v5869_v30, 0.0 }
 0x63c   : > { %5935 = vst [vmem:[%s9728_s29 + $0x98] sm:$0xff] %v5903_v62 }
 0x63d   : > { %5933 = vst [vmem:[%s9728_s29 + $0x88] sm:$0xff] %v5901_v53 }
 0x63f   : > { %v6881_v33 = vpop.f32.mrb[52].mxu0 }
 0x640   : > { %v6937_v19 = vadd.f32 %v6881_v33, %v9402_v47  ;;  %v5429_v37 = vpop.f32.mrb[53].mxu0 }
 0x641   : > { %v6938_v41 = vadd.f32 %v5429_v37, %v9404_v57  ;;  %v6882_v0 = vpop.f32.mrb[54].mxu0 }
 0x642   : > { %v5800_v21 = vadd.f32 %v6937_v19, %v9699_v42  ;;  %v6939_v31 = vadd.f32 %v6882_v0, %v9406_v60  ;;  %v5432_v44 = vpop.f32.mrb[55].mxu0 }
 0x643   : > { %v5798_v32 = vadd.f32 %v6938_v41, %v9699_v42  ;;  %v6940_v6 = vadd.f32 %v5432_v44, %v9408_v63 }
 0x644   : > { %v5838_v18 = vmul.f32 %v9705_v2, %v5800_v21  ;;  %v5801_v47 = vadd.f32 %v6939_v31, %v9699_v42 }
 0x645   : > { %v5836_v57 = vmul.f32 %v9705_v2, %v5798_v32  ;;  %v5799_v54 = vadd.f32 %v6940_v6, %v9699_v42 }
 0x646   : > { %v5874_v38 = vadd.f32 %v9713_v27, %v5838_v18  ;;  %v5839_v60 = vmul.f32 %v9705_v2, %v5801_v47 }
 0x647   : > { %v5872_v7 = vadd.f32 %v9713_v27, %v5836_v57  ;;  %v5837_v35 = vmul.f32 %v9705_v2, %v5799_v54 }
 0x648   : > { %v5906_v10 = vmax.f32 %v5874_v38, 0.0  ;;  %v5875_v63 = vadd.f32 %v9713_v27, %v5839_v60 }
 0x649   : > { %v5904_v22 = vmax.f32 %v5872_v7, 0.0  ;;  %v5873_v25 = vadd.f32 %v9713_v27, %v5837_v35 }
 0x64a   : > { %5938 = vst [vmem:[%s9728_s29 + $0xb0] sm:$0xff] %v5906_v10  ;;  %v5907_v12 = vmax.f32 %v5875_v63, 0.0 }
 0x64b   : > { %5936 = vst [vmem:[%s9728_s29 + $0xa0] sm:$0xff] %v5904_v22  ;;  %v5905_v56 = vmax.f32 %v5873_v25, 0.0 }
 0x64c   : > { %5939 = vst [vmem:[%s9728_s29 + $0xb8] sm:$0xff] %v5907_v12 }
 0x64d   : > { %5937 = vst [vmem:[%s9728_s29 + $0xa8] sm:$0xff] %v5905_v56 }
 0x64f   : > { %v6885_v43 = vpop.f32.mrb[56].mxu0 }
 0x650   : > { %v6941_v29 = vadd.f32 %v6885_v43, %v9414_v51  ;;  %v5445_v52 = vpop.f32.mrb[57].mxu0 }
 0x651   : > { %v6942_v3 = vadd.f32 %v5445_v52, %v9417_v4  ;;  %v6886_v36 = vpop.f32.mrb[58].mxu0 }
 0x652   : > { %v5804_v23 = vadd.f32 %v6941_v29, %v9699_v42  ;;  %v6943_v5 = vadd.f32 %v6886_v36, %v9419_v58  ;;  %v5448_v46 = vpop.f32.mrb[59].mxu0 }
 0x653   : > { %v5802_v13 = vadd.f32 %v6942_v3, %v9699_v42  ;;  %v6944_v61 = vadd.f32 %v5448_v46, %v9422_v20 }
 0x654   : > { %v5842_v39 = vmul.f32 %v9705_v2, %v5804_v23  ;;  %v5805_v51 = vadd.f32 %v6943_v5, %v9699_v42 }
 0x655   : > { %v5840_v4 = vmul.f32 %v9705_v2, %v5802_v13  ;;  %v5803_v24 = vadd.f32 %v6944_v61, %v9699_v42 }
 0x656   : > { %v5878_v59 = vadd.f32 %v9713_v27, %v5842_v39  ;;  %v5843_v58 = vmul.f32 %v9705_v2, %v5805_v51 }
 0x657   : > { %v5876_v16 = vadd.f32 %v9713_v27, %v5840_v4  ;;  %v5841_v8 = vmul.f32 %v9705_v2, %v5803_v24 }
 0x658   : > { %v5910_v26 = vmax.f32 %v5878_v59, 0.0  ;;  %v5879_v20 = vadd.f32 %v9713_v27, %v5843_v58 }
 0x659   : > { %v5908_v48 = vmax.f32 %v5876_v16, 0.0  ;;  %v5877_v49 = vadd.f32 %v9713_v27, %v5841_v8 }
 0x65a   : > { %5942 = vst [vmem:[%s9728_s29 + $0xd0] sm:$0xff] %v5910_v26  ;;  %v5911_v14 = vmax.f32 %v5879_v20, 0.0 }
 0x65b   : > { %5940 = vst [vmem:[%s9728_s29 + $0xc0] sm:$0xff] %v5908_v48  ;;  %v5909_v15 = vmax.f32 %v5877_v49, 0.0 }
 0x65c   : > { %5943 = vst [vmem:[%s9728_s29 + $0xd8] sm:$0xff] %v5911_v14 }
 0x65d   : > { %5941 = vst [vmem:[%s9728_s29 + $0xc8] sm:$0xff] %v5909_v15 }
 0x65f   : > { %v6889_v50 = vpop.f32.mrb[60].mxu0 }
 0x660   : > { %v6945_v28 = vadd.f32 %v6889_v50, %v9428_v9  ;;  %v5461_v34 = vpop.f32.mrb[61].mxu0 }
 0x661   : > { %v6946_v45 = vadd.f32 %v5461_v34, %v9430_v1  ;;  %v6890_v55 = vpop.f32.mrb[62].mxu0 }
 0x662   : > { %v5808_v17 = vadd.f32 %v6945_v28, %v9699_v42  ;;  %v6947_v30 = vadd.f32 %v6890_v55, %v9432_v11  ;;  %v5464_v62 = vpop.f32.mrb[63].mxu0 }
 0x663   : > { %v5806_v53 = vadd.f32 %v6946_v45, %v9699_v42  ;;  %v6948_v33 = vadd.f32 %v5464_v62, %v9435_v40 }
 0x664   : > { %v5846_v19 = vmul.f32 %v9705_v2, %v5808_v17  ;;  %v5809_v9 = vadd.f32 %v6947_v30, %v9699_v42 }
 0x665   : > { %v5844_v37 = vmul.f32 %v9705_v2, %v5806_v53  ;;  %v5807_v1 = vadd.f32 %v6948_v33, %v9699_v42 }
 0x666   : > { %v5882_v41 = vadd.f32 %v9713_v27, %v5846_v19  ;;  %v5847_v11 = vmul.f32 %v9705_v2, %v5809_v9 }
 0x667   : > { %v5880_v0 = vadd.f32 %v9713_v27, %v5844_v37  ;;  %v5845_v40 = vmul.f32 %v9705_v2, %v5807_v1 }
 0x668   : > { %v5914_v21 = vmax.f32 %v5882_v41, 0.0  ;;  %v5883_v31 = vadd.f32 %v9713_v27, %v5847_v11 }
 0x669   : > { %v5912_v44 = vmax.f32 %v5880_v0, 0.0  ;;  %v5881_v42 = vadd.f32 %v9713_v27, %v5845_v40 }
 0x66a   : > { %5946 = vst [vmem:[%s9728_s29 + $0xf0] sm:$0xff] %v5914_v21  ;;  %v5915_v32 = vmax.f32 %v5883_v31, 0.0 }
 0x66b   : > { %5944 = vst [vmem:[%s9728_s29 + $0xe0] sm:$0xff] %v5912_v44  ;;  %v5913_v2 = vmax.f32 %v5881_v42, 0.0 }
 0x66c   : > { %5947 = vst [vmem:[%s9728_s29 + $0xf8] sm:$0xff] %v5915_v32 }
 0x66d   : > { %5945 = vst [vmem:[%s9728_s29 + $0xe8] sm:$0xff] %v5913_v2 }
 0x66e   : > { %7606 = shalt.err (!%p7603_p8)
}
 0x66f   : > { %s7607_s20 = scalar_lea.hbm %s9876_s13, 4096  ;;  %s7611_s16 = scalar_lea.hbm %s9959_s9, 8192 }
 0x670   : > { %p7608_p6 = scmp.ne.s32.totalorder %s9876_s13, %s7607_s20  ;;  %p7612_p3 = scmp.lt.u32.totalorder %s9876_s13, %s9959_s9 }
 0x671   : > { %p7613_p5 = scmp.lt.u32.totalorder %s7611_s16, %s7607_s20  ;;  %p7615_p7 = scmp.lt.u32.totalorder %s7607_s20, %s9876_s13 }
 0x672   : > { %p7609_p10 = pnand %p7608_p6, %p9960_p4 }
 0x673   : > { %p7614_p9 = por %p7613_p5, %p7612_p3 }
 0x674   : > { %p7610_p11 = pneg %p7609_p10 }
 0x675   : > { %p7616_p12 = por %p7615_p7, %p7614_p9 }
 0x677   : > { %p7617_p1 = pnand %p7616_p12, %p7610_p11 }
 0x679   : > { %7620 = shalt.err (!%p7617_p1)
}
 0x67a   : > { %s7692_s14 = smov 128   ;;  %s7693_s17 = smov 8  }
 0x67b   : > { %7035 = dma.vmem_to_hbm [thread:$0]  (%p9960_p4), %s9878_s23, 4096, %s9876_s13, %s5949_s15, %s7692_s14, %s7692_s14, %s7693_s17  }
 0x67c PF: > { %s5977_s21 = sand.u32 1, %s7659_s30   ;;  %p9961_p13 = scmp.ne.s32.totalorder %s9949_s28, 0 }
 0x67d   : > { %p9962_p0 = scmp.ge.s32.totalorder %s7671_s12, 2  ;;  %s5978_s26 = scalar_lea.sflag [#allocation5], %s5977_s21 }
 0x67f   : > { %p7058_p2 = pnand %p9962_p0, %p9961_p13 }
 0x681   : > { %7654 = dma.done.wait (!%p7058_p2), %s5978_s26, 4096  }
 0x682   : > { %7656 = vsyncadd (!%p7058_p2), %s5978_s26, 4294963200  ;;  %p25_p8 = scmp.ge.s32.totalorder %s7917_s27, 4   ;;  %s9963_s30 = smov %s7663_s10 }
 0x683   : > { %s9964_s10 = smov %s7667_s11  ;;  %s9965_s11 = smov %s7929_s22 }
 0x684   : > { %s9966_s12 = smov %s7917_s27  ;;  %27 = sbr.rel (!%p25_p8) target bundleno = 11 (0xb), region = 131 }
 0x68b   :  { %5983 = vsyncpa [#allocation4], 1 }
 0x68c   :  { %5985 = vsyncpa [#allocation4 + $0x1], 1 }
 0x68d   :  { %5986 = vsyncpa [#allocation7], 1 }
 0x68e   :  { %5987 = vsyncpa [#allocation10], 1 }
 0x68f   :  { %5988 = vsyncpa [#allocation13], 1 }
 0x690   :  { %5989 = vsyncpa [#allocation5], 1 }
 0x691   :  { %5991 = vsyncpa [#allocation5 + $0x1], 1 }

</bundles_post_ra>
